<compile_context>
chip_gen: v7x
topology: tpu7x:2x2x1
jax: 0.10.0
libtpu: 0.0.40
codegen_flags: <defaults>
</compile_context>

<pallas_src>
import functools

import jax
import jax.numpy as jnp
from jax.experimental import pallas as pl
from jax.experimental.pallas import tpu as pltpu


# --------------------------------------------------------------------------
# helpers
# --------------------------------------------------------------------------
def _round_up(x, m):
    return (x + m - 1) // m * m


def _row_tiles(n_rows, tile_rows):
    """Row tile rounded to 16 (native sublane tile for bf16 and f32)."""
    tr = _round_up(min(tile_rows, n_rows), 16)
    return tr, _round_up(n_rows, tr)


def _col_tile(n, cap=256):
    """Largest multiple-of-128 divisor of n that is <= cap (else full n)."""
    best = n
    c = 128
    while c <= min(cap, n):
        if n % c == 0:
            best = c
        c += 128
    return best


def _pad_rows(x, r_pad):
    r = x.shape[0]
    if r_pad == r:
        return x
    return jnp.pad(x, ((0, r_pad - r), (0, 0)))


def _compiler_params(dimension_semantics, block_bytes):
    # Scoped-VMEM budget ~ double-buffered blocks + headroom, clamped below
    # v7x's 64 MiB physical VMEM (re-derive per generation for big models).
    est = 2 * int(block_bytes) + (2 << 20)
    return pltpu.CompilerParams(
        dimension_semantics=dimension_semantics,
        vmem_limit_bytes=int(min(max(est, 16 << 20), 48 << 20)))


# --------------------------------------------------------------------------
# kernels
# --------------------------------------------------------------------------
def _norm_matmul_kernel(x_ref, s_ref, w_ref, o_ref, *, eps):
    """o[:, j-tile] = (RMSNorm(x) * scale) @ W[:, j-tile]  (bf16 MXU operands)."""
    x = x_ref[...].astype(jnp.float32)
    inv = jax.lax.rsqrt(jnp.mean(x * x, axis=-1, keepdims=True) + eps)
    normed = (x * (inv * s_ref[...])).astype(jnp.bfloat16)   # recomputed per j (cheap VPU)
    o_ref[...] = jnp.dot(normed, w_ref[...],
                         preferred_element_type=jnp.float32).astype(o_ref.dtype)


def _matmul_residual_kernel(a_ref, w_ref, r_ref, o_ref):
    """o[:, j-tile] = a @ W[:, j-tile] + r[:, j-tile]  (fused residual add)."""
    y = jnp.dot(a_ref[...], w_ref[...], preferred_element_type=jnp.float32)
    o_ref[...] = (y + r_ref[...].astype(jnp.float32)).astype(o_ref.dtype)


def _norm_swiglu_residual_kernel(h_ref, s_ref, w1_ref, w3_ref, w2_ref, o_ref,
                                 normed_ref, acc_ref, *, eps):
    """o = h + sum_j (silu(n @ W1_j) * (n @ W3_j)) @ W2_j,  n = RMSNorm(h)*scale.

    Hidden dim is tiled by the j grid axis ("arbitrary"); partial products are
    accumulated into a (tr, d) f32 VMEM scratch.
    """
    j = pl.program_id(1)

    @pl.when(j == 0)
    def _():
        h = h_ref[...].astype(jnp.float32)
        inv = jax.lax.rsqrt(jnp.mean(h * h, axis=-1, keepdims=True) + eps)
        normed_ref[...] = (h * (inv * s_ref[...])).astype(normed_ref.dtype)
        acc_ref[...] = jnp.zeros_like(acc_ref)

    n = normed_ref[...]                                     # bf16 MXU operand
    a = jnp.dot(n, w1_ref[...], preferred_element_type=jnp.float32)
    g = jnp.dot(n, w3_ref[...], preferred_element_type=jnp.float32)
    silu = a * pl.reciprocal(1.0 + jnp.exp(-a), approx=True)  # EUP exp + rcp
    acc_ref[...] += jnp.dot((silu * g).astype(jnp.bfloat16), w2_ref[...],
                            preferred_element_type=jnp.float32)

    @pl.when(j == pl.num_programs(1) - 1)
    def _():
        o_ref[...] = (acc_ref[...] + h_ref[...].astype(jnp.float32)).astype(o_ref.dtype)


def _attn_rope_kernel(qkv_ref, cos_ref, sin_ref, o_ref, *, n_head, sm_scale):
    """One batch, all heads: RoPE (half-split) + softmax(QK^T)V per head.

    qkv_ref is the (T, 3D) row-slab of this batch; heads are static column
    slices (unrolled loop). Output is one lane-dense (T, D) block in the same
    (B, T, C) layout the out-projection consumes -> no wrapper transposes.
    """
    d = o_ref.shape[1]
    hd = d // n_head
    hd2 = hd // 2
    cos = cos_ref[...]                                      # (T, hd/2) f32
    sin = sin_ref[...]

    def rot(xe, xo):  # half-split RoPE, one concat -> single hd-wide dot later
        return jnp.concatenate(
            [xe * cos - xo * sin, xo * cos + xe * sin], axis=-1).astype(jnp.bfloat16)

    heads_out = []
    for h in range(n_head):                                 # unrolled, n_head small
        q = qkv_ref[:, h * hd:(h + 1) * hd].astype(jnp.float32)
        k = qkv_ref[:, d + h * hd:d + (h + 1) * hd].astype(jnp.float32)
        v = qkv_ref[:, 2 * d + h * hd:2 * d + (h + 1) * hd]   # bf16
        qr = rot(q[:, :hd2], q[:, hd2:])
        kr = rot(k[:, :hd2], k[:, hd2:])
        s = jax.lax.dot_general(qr, kr, (((1,), (1,)), ((), ())),
                                preferred_element_type=jnp.float32) * sm_scale
        s = s - jnp.max(s, axis=-1, keepdims=True)
        p = jnp.exp(s)
        p = p * pl.reciprocal(jnp.sum(p, axis=-1, keepdims=True), approx=True)
        heads_out.append(jnp.dot(p.astype(jnp.bfloat16), v,
                                 preferred_element_type=jnp.float32))
    o_ref[...] = jnp.concatenate(heads_out, axis=-1).astype(o_ref.dtype)


# --------------------------------------------------------------------------
# pallas_call wrappers (all inputs arrive pre-padded to a multiple of tr)
# --------------------------------------------------------------------------
def fused_rmsnorm_matmul(x2d, scale, w, *, eps, tr):
    r_pad, d = x2d.shape
    n = w.shape[1]
    tn = _col_tile(n)
    blk = tr * d * 4 + d * 4 + d * tn * 2 + tr * tn * 2
    return pl.pallas_call(
        functools.partial(_norm_matmul_kernel, eps=eps),
        out_shape=jax.ShapeDtypeStruct((r_pad, n), jnp.bfloat16),
        grid_spec=pltpu.PrefetchScalarGridSpec(
            num_scalar_prefetch=0,
            grid=(r_pad // tr, n // tn),
            in_specs=[
                pl.BlockSpec((tr, d), lambda i, j: (i, 0)),
                pl.BlockSpec((1, d), lambda i, j: (0, 0)),
                pl.BlockSpec((d, tn), lambda i, j: (0, j)),
            ],
            out_specs=pl.BlockSpec((tr, tn), lambda i, j: (i, j)),
        ),
        compiler_params=_compiler_params(("parallel", "parallel"), blk),
    )(x2d, scale, w)


def matmul_residual(a2d, w, resid2d, *, tr):
    r_pad, d = a2d.shape
    n = w.shape[1]
    tn = _col_tile(n)
    blk = tr * d * 2 + d * tn * 2 + 2 * tr * tn * 4
    return pl.pallas_call(
        _matmul_residual_kernel,
        out_shape=jax.ShapeDtypeStruct((r_pad, n), resid2d.dtype),
        grid_spec=pltpu.PrefetchScalarGridSpec(
            num_scalar_prefetch=0,
            grid=(r_pad // tr, n // tn),
            in_specs=[
                pl.BlockSpec((tr, d), lambda i, j: (i, 0)),
                pl.BlockSpec((d, tn), lambda i, j: (0, j)),
                pl.BlockSpec((tr, tn), lambda i, j: (i, j)),
            ],
            out_specs=pl.BlockSpec((tr, tn), lambda i, j: (i, j)),
        ),
        compiler_params=_compiler_params(("parallel", "parallel"), blk),
    )(a2d, w, resid2d)


def fused_rmsnorm_swiglu_residual(h2d, scale, w1, w3, w2, *, eps, tr):
    r_pad, d = h2d.shape
    hidden = w1.shape[1]
    th = _col_tile(hidden)
    blk = (tr * d * 4 + d * 4 + 2 * d * th * 2 + th * d * 2 + tr * d * 4
           + tr * d * 2 + tr * d * 4)
    return pl.pallas_call(
        functools.partial(_norm_swiglu_residual_kernel, eps=eps),
        out_shape=jax.ShapeDtypeStruct((r_pad, d), h2d.dtype),
        grid_spec=pltpu.PrefetchScalarGridSpec(
            num_scalar_prefetch=0,
            grid=(r_pad // tr, hidden // th),
            in_specs=[
                pl.BlockSpec((tr, d), lambda i, j: (i, 0)),
                pl.BlockSpec((1, d), lambda i, j: (0, 0)),
                pl.BlockSpec((d, th), lambda i, j: (0, j)),
                pl.BlockSpec((d, th), lambda i, j: (0, j)),
                pl.BlockSpec((th, d), lambda i, j: (j, 0)),
            ],
            out_specs=pl.BlockSpec((tr, d), lambda i, j: (i, 0)),
            scratch_shapes=[pltpu.VMEM((tr, d), jnp.bfloat16),
                            pltpu.VMEM((tr, d), jnp.float32)],
        ),
        compiler_params=_compiler_params(("parallel", "arbitrary"), blk),
    )(h2d, scale, w1, w3, w2)


def attention_heads_fused(qkv, cos_tab, sin_tab, *, batch, seq, n_head):
    r_pad, three_d = qkv.shape
    d = three_d // 3
    hd = d // n_head
    blk = seq * three_d * 2 + 2 * seq * (hd // 2) * 4 + seq * d * 2
    return pl.pallas_call(
        functools.partial(_attn_rope_kernel, n_head=n_head,
                          sm_scale=1.0 / (hd ** 0.5)),
        out_shape=jax.ShapeDtypeStruct((r_pad, d), jnp.bfloat16),
        grid_spec=pltpu.PrefetchScalarGridSpec(
            num_scalar_prefetch=0,
            grid=(batch,),
            in_specs=[
                pl.BlockSpec((seq, three_d), lambda b: (b, 0)),
                pl.BlockSpec((seq, hd // 2), lambda b: (0, 0)),
                pl.BlockSpec((seq, hd // 2), lambda b: (0, 0)),
            ],
            out_specs=pl.BlockSpec((seq, d), lambda b: (b, 0)),
        ),
        compiler_params=_compiler_params(("parallel",), blk),
    )(qkv, cos_tab, sin_tab)


# --------------------------------------------------------------------------
# parameter preparation (done ONCE, not per forward call)
# --------------------------------------------------------------------------
def prepare_params(raw, *, n_head, rope_base=10000.0, max_seq_len=2048,
                   param_dtype=jnp.bfloat16):
    d = raw["w_qkv"].shape[0]
    hd = d // n_head
    assert hd % 2 == 0, "head dim must be even"

    # De-interleave q/k weight columns per head: [0,2,...,hd-2, 1,3,...,hd-1].
    # Applied to BOTH q and k, this keeps q.k^T invariant and turns interleaved
    # RoPE into the cheap half-split form used in-kernel.
    head_perm = jnp.concatenate([jnp.arange(0, hd, 2), jnp.arange(1, hd, 2)])
    full_perm = (jnp.arange(n_head)[:, None] * hd + head_perm[None, :]).reshape(-1)
    w_qkv = raw["w_qkv"]
    w_qkv_perm = jnp.concatenate(
        [w_qkv[:, :d][:, full_perm], w_qkv[:, d:2 * d][:, full_perm],
         w_qkv[:, 2 * d:]], axis=1)

    # RoPE tables in half-split layout: angle(t, i) = t * theta_i.
    theta = 1.0 / (rope_base ** (jnp.arange(0, hd, 2, dtype=jnp.float32) / hd))
    ang = jnp.arange(max_seq_len, dtype=jnp.float32)[:, None] * theta[None, :]

    return {
        "norm1_scale": raw["norm1_scale"].astype(jnp.float32).reshape(1, d),
        "norm2_scale": raw["norm2_scale"].astype(jnp.float32).reshape(1, d),
        "w_qkv": w_qkv_perm.astype(param_dtype),
        "w_proj": raw["w_proj"].astype(param_dtype),
        "w1": raw["w1"].astype(param_dtype),
        "w3": raw["w3"].astype(param_dtype),
        "w2": raw["w2"].astype(param_dtype),
        "rope_cos": jnp.cos(ang),
        "rope_sin": jnp.sin(ang),
    }


# --------------------------------------------------------------------------
# TransformerBlock forward (Pallas path)
# --------------------------------------------------------------------------
def transformer_block(x, params, *, n_head, eps=1e-6, tile_rows=256):
    b, t, d = x.shape
    r = b * t
    tr, r_pad = _row_tiles(r, tile_rows)
    # Pad ONCE; keep the padded row layout through all four stages.
    x2d = _pad_rows(x.reshape(r, d), r_pad)

    cos_tab = params["rope_cos"][:t]
    sin_tab = params["rope_sin"][:t]

    # Stage 1: qkv = (RMSNorm(x) * scale1) @ Wqkv   (norm fused, N-tiled, bf16)
    qkv = fused_rmsnorm_matmul(x2d, params["norm1_scale"], params["w_qkv"],
                               eps=eps, tr=tr)                      # (R, 3D) bf16

    # Stage 2: per-batch attention with fused RoPE; heads read straight from
    # the qkv column layout, output written lane-dense in (B, T, C) layout.
    attn = attention_heads_fused(qkv, cos_tab, sin_tab,
                                 batch=b, seq=t, n_head=n_head)     # (R, D) bf16

    # Stage 3: h = attn @ Wproj + x   (output projection + fused residual)
    h2d = matmul_residual(attn, params["w_proj"], x2d, tr=tr)       # (R, D) f32

    # Stage 4: out = h + SwiGLU(RMSNorm(h) * scale2)   (hidden-tiled, accumulated)
    out2d = fused_rmsnorm_swiglu_residual(h2d, params["norm2_scale"],
                                          params["w1"], params["w3"],
                                          params["w2"], eps=eps, tr=tr)
    # TODO(synk): attn_mask, dropout>0 and kv_cache/return_kv_cache not supported;
    # the reference path (mask=None, dropout=0, kv_cache=None) is computed.
    return out2d[:r].reshape(b, t, d)


# --------------------------------------------------------------------------
# pure-JAX reference (mirrors the PyTorch forward exactly, f32)
# --------------------------------------------------------------------------
def reference_block(x, params, *, n_head, eps, rope_base):
    b, t, d = x.shape
    h = n_head
    hd = d // h

    def rmsnorm(v, scale):
        v32 = v.astype(jnp.float32)
        n = v32 * jax.lax.rsqrt(jnp.mean(v32 * v32, axis=-1, keepdims=True) + eps)
        return n * scale

    xn = rmsnorm(x, params["norm1_scale"])
    qkv = xn @ params["w_qkv"]
    q, k, v = jnp.split(qkv, 3, axis=-1)
    q = q.reshape(b, t, h, hd)
    k = k.reshape(b, t, h, hd)
    v = v.reshape(b, t, h, hd)

    theta = 1.0 / (rope_base ** (jnp.arange(0, hd, 2, dtype=jnp.float32) / hd))
    ang = jnp.arange(t, dtype=jnp.float32)[:, None] * theta[None, :]
    cos = jnp.cos(ang)[None, :, None, :]
    sin = jnp.sin(ang)[None, :, None, :]

    def rope_interleaved(z):
        z2 = z.reshape(b, t, h, hd // 2, 2)
        o0 = z2[..., 0] * cos - z2[..., 1] * sin
        o1 = z2[..., 1] * cos + z2[..., 0] * sin
        return jnp.stack([o0, o1], axis=-1).reshape(b, t, h, hd)

    q = rope_interleaved(q).transpose(0, 2, 1, 3)   # (B, H, T, hd)
    k = rope_interleaved(k).transpose(0, 2, 1, 3)
    v = v.transpose(0, 2, 1, 3)

    s = jnp.einsum("bhqd,bhkd->bhqk", q, k) / jnp.sqrt(jnp.float32(hd))
    p = jax.nn.softmax(s, axis=-1)
    ao = jnp.einsum("bhqk,bhkd->bhqd", p, v)
    ao = ao.transpose(0, 2, 1, 3).reshape(b, t, d)

    hres = x + ao @ params["w_proj"]
    hn = rmsnorm(hres, params["norm2_scale"])
    mlp = (jax.nn.silu(hn @ params["w1"]) * (hn @ params["w3"])) @ params["w2"]
    return hres + mlp


# --------------------------------------------------------------------------
# demo / correctness check
# --------------------------------------------------------------------------
if __name__ == "__main__":
    batch, seq = 2, 16
    n_dim, n_head = 128, 4          # lane-dense feature dim (multiple of 128)
    hidden = 4 * n_dim
    eps = 1e-6
    rope_base = 10000.0

    key = jax.random.PRNGKey(0)
    ks = jax.random.split(key, 8)
    x = jax.random.normal(ks[0], (batch, seq, n_dim), dtype=jnp.float32)

    raw_params = {
        "norm1_scale": 1.0 + 0.1 * jax.random.normal(ks[1], (n_dim,), jnp.float32),
        "norm2_scale": 1.0 + 0.1 * jax.random.normal(ks[2], (n_dim,), jnp.float32),
        "w_qkv": 0.06 * jax.random.normal(ks[3], (n_dim, 3 * n_dim), jnp.float32),
        "w_proj": 0.06 * jax.random.normal(ks[4], (n_dim, n_dim), jnp.float32),
        "w1": 0.06 * jax.random.normal(ks[5], (n_dim, hidden), jnp.float32),
        "w3": 0.06 * jax.random.normal(ks[6], (n_dim, hidden), jnp.float32),
        "w2": 0.06 * jax.random.normal(ks[7], (hidden, n_dim), jnp.float32),
    }

    # One-time parameter preparation (bf16 weights, permuted qkv, RoPE tables).
    prepared = prepare_params(raw_params, n_head=n_head, rope_base=rope_base,
                              max_seq_len=seq)

    fwd = jax.jit(functools.partial(transformer_block, n_head=n_head, eps=eps,
                                    tile_rows=16))
    y = fwd(x, prepared)
    jax.block_until_ready(y)

    # Reference in f32 (weights rounded to bf16 to match the stored params);
    # tolerance relaxed for bf16 MXU operands with f32 accumulation.
    ref_params = {k: (v.astype(jnp.bfloat16).astype(jnp.float32)
                      if k.startswith("w") else v)
                  for k, v in raw_params.items()}
    ref = reference_block(x, ref_params, n_head=n_head, eps=eps,
                          rope_base=rope_base)

    assert y.shape == ref.shape
    err = float(jnp.max(jnp.abs(y.astype(jnp.float32) - ref)))
    assert err < 1e-1, f"mismatch vs reference: max abs err = {err}"

    print("KERNEL_OK")
</pallas_src>

<mosaic_0001>
module attributes {stable_mosaic.version = 11 : i64} {
  func.func @_matmul_residual_kernel(%arg0: i32, %arg1: i32, %arg2: memref<16x128xbf16, #tpu.memory_space<vmem>>, %arg3: memref<128x128xbf16, #tpu.memory_space<vmem>>, %arg4: memref<16x128xf32, #tpu.memory_space<vmem>>, %arg5: memref<16x128xf32, #tpu.memory_space<vmem>>) attributes {dimension_semantics = [#tpu.dimension_semantics<parallel>, #tpu.dimension_semantics<parallel>], iteration_bounds = array<i64: 2, 1>, scalar_prefetch = 0 : i64, scratch_operands = 0 : i64, tpu.core_type = #tpu.core_type<tc>, window_params = [{transform_indices = @transform_0, window_bounds = array<i64: 16, 128>}, {transform_indices = @transform_1, window_bounds = array<i64: 128, 128>}, {transform_indices = @transform_2, window_bounds = array<i64: 16, 128>}, {transform_indices = @transform_3, window_bounds = array<i64: 16, 128>}]} {
    %c0 = arith.constant 0 : index
    %c0_0 = arith.constant 0 : index
    %0 = vector.load %arg2[%c0, %c0_0] : memref<16x128xbf16, #tpu.memory_space<vmem>>, vector<16x128xbf16>
    %c0_1 = arith.constant 0 : index
    %c0_2 = arith.constant 0 : index
    %1 = vector.load %arg3[%c0_1, %c0_2] : memref<128x128xbf16, #tpu.memory_space<vmem>>, vector<128x128xbf16>
    %cst = arith.constant dense<0.000000e+00> : vector<16x128xf32>
    %2 = tpu.matmul %0, %1, %cst {dimension_numbers = #tpu.dot_dimension_numbers<[1], [0], [0], [1], [0, 0, 1, 1], [], []>} : vector<16x128xbf16>, vector<128x128xbf16>, vector<16x128xf32> -> vector<16x128xf32>
    %c0_3 = arith.constant 0 : index
    %c0_4 = arith.constant 0 : index
    %3 = vector.load %arg4[%c0_3, %c0_4] : memref<16x128xf32, #tpu.memory_space<vmem>>, vector<16x128xf32>
    %4 = arith.addf %2, %3 : vector<16x128xf32>
    %c0_5 = arith.constant 0 : index
    %c0_6 = arith.constant 0 : index
    %5 = vector.load %arg5[%c0_5, %c0_6] : memref<16x128xf32, #tpu.memory_space<vmem>>, vector<16x128xf32>
    tpu.vector_store %arg5[%c0_5, %c0_6], %4 {strides = array<i32>} : memref<16x128xf32, #tpu.memory_space<vmem>>, vector<16x128xf32>,
    return
  }
  func.func @transform_0(%arg0: i32, %arg1: i32) -> (i32, i32) {
    %c0_i32 = arith.constant 0 : i32
    %c0_i32_0 = arith.constant 0 : i32
    return %arg0, %c0_i32 : i32, i32
  }
  func.func @transform_1(%arg0: i32, %arg1: i32) -> (i32, i32) {
    %c0_i32 = arith.constant 0 : i32
    %c0_i32_0 = arith.constant 0 : i32
    return %c0_i32, %arg1 : i32, i32
  }
  func.func @transform_2(%arg0: i32, %arg1: i32) -> (i32, i32) {
    %c0_i32 = arith.constant 0 : i32
    return %arg0, %arg1 : i32, i32
  }
  func.func @transform_3(%arg0: i32, %arg1: i32) -> (i32, i32) {
    %c0_i32 = arith.constant 0 : i32
    return %arg0, %arg1 : i32, i32
  }
}

module attributes {stable_mosaic.version = 11 : i64} {
  func.func @_norm_swiglu_residual_kernel(%arg0: i32, %arg1: i32, %arg2: memref<16x128xf32, #tpu.memory_space<vmem>>, %arg3: memref<1x128xf32, #tpu.memory_space<vmem>>, %arg4: memref<128x256xbf16, #tpu.memory_space<vmem>>, %arg5: memref<128x256xbf16, #tpu.memory_space<vmem>>, %arg6: memref<256x128xbf16, #tpu.memory_space<vmem>>, %arg7: memref<16x128xf32, #tpu.memory_space<vmem>>, %arg8: memref<16x128xbf16, #tpu.memory_space<vmem>>, %arg9: memref<16x128xf32, #tpu.memory_space<vmem>>) attributes {dimension_semantics = [#tpu.dimension_semantics<parallel>, #tpu.dimension_semantics<arbitrary>], iteration_bounds = array<i64: 2, 2>, scalar_prefetch = 0 : i64, scratch_operands = 2 : i64, tpu.core_type = #tpu.core_type<tc>, window_params = [{transform_indices = @transform_0, window_bounds = array<i64: 16, 128>}, {pipeline_mode = #tpu.pipeline_mode<synchronous>, transform_indices = @transform_1, window_bounds = array<i64: 1, 128>}, {transform_indices = @transform_2, window_bounds = array<i64: 128, 256>}, {transform_indices = @transform_3, window_bounds = array<i64: 128, 256>}, {transform_indices = @transform_4, window_bounds = array<i64: 256, 128>}, {transform_indices = @transform_5, window_bounds = array<i64: 16, 128>}]} {
    %c0_i32 = arith.constant 0 : i32
    %0 = arith.cmpi eq, %arg1, %c0_i32 : i32
    %1 = arith.extui %0 : i1 to i32
    %c0_i32_0 = arith.constant 0 : i32
    %2 = arith.cmpi ne, %1, %c0_i32_0 : i32
    scf.if %2 {
      %c0_17 = arith.constant 0 : index
      %c0_18 = arith.constant 0 : index
      %25 = vector.load %arg2[%c0_17, %c0_18] : memref<16x128xf32, #tpu.memory_space<vmem>>, vector<16x128xf32>
      %26 = arith.mulf %25, %25 : vector<16x128xf32>
      %cst_19 = arith.constant dense<0.000000e+00> : vector<16xf32>
      %27 = vector.multi_reduction <add>, %26, %cst_19 [1] : vector<16x128xf32> to vector<16xf32>
      %28 = vector.shape_cast %27 : vector<16xf32> to vector<16x1xf32>
      %cst_20 = arith.constant 1.280000e+02 : f32
      %29 = vector.broadcast %cst_20 : f32 to vector<16x1xf32>
      %30 = arith.divf %28, %29 : vector<16x1xf32>
      %cst_21 = arith.constant 9.99999997E-7 : f32
      %31 = vector.broadcast %cst_21 : f32 to vector<16x1xf32>
      %32 = arith.addf %30, %31 : vector<16x1xf32>
      %33 = math.rsqrt %32 : vector<16x1xf32>
      %c0_22 = arith.constant 0 : index
      %c0_23 = arith.constant 0 : index
      %34 = vector.load %arg3[%c0_22, %c0_23] : memref<1x128xf32, #tpu.memory_space<vmem>>, vector<1x128xf32>
      %35 = vector.broadcast %33 : vector<16x1xf32> to vector<16x128xf32>
      %36 = vector.broadcast %34 : vector<1x128xf32> to vector<16x128xf32>
      %37 = arith.mulf %35, %36 : vector<16x128xf32>
      %38 = arith.mulf %25, %37 : vector<16x128xf32>
      %39 = arith.truncf %38 : vector<16x128xf32> to vector<16x128xbf16>
      %c0_24 = arith.constant 0 : index
      %c0_25 = arith.constant 0 : index
      %40 = vector.load %arg8[%c0_24, %c0_25] : memref<16x128xbf16, #tpu.memory_space<vmem>>, vector<16x128xbf16>
      tpu.vector_store %arg8[%c0_24, %c0_25], %39 {strides = array<i32>} : memref<16x128xbf16, #tpu.memory_space<vmem>>, vector<16x128xbf16>,
      %cst_26 = arith.constant 0.000000e+00 : f32
      %41 = vector.broadcast %cst_26 : f32 to vector<16x128xf32>
      %c0_27 = arith.constant 0 : index
      %c0_28 = arith.constant 0 : index
      %42 = vector.load %arg9[%c0_27, %c0_28] : memref<16x128xf32, #tpu.memory_space<vmem>>, vector<16x128xf32>
      tpu.vector_store %arg9[%c0_27, %c0_28], %41 {strides = array<i32>} : memref<16x128xf32, #tpu.memory_space<vmem>>, vector<16x128xf32>,
    } else {
    }
    %c0 = arith.constant 0 : index
    %c0_1 = arith.constant 0 : index
    %3 = vector.load %arg8[%c0, %c0_1] : memref<16x128xbf16, #tpu.memory_space<vmem>>, vector<16x128xbf16>
    %c0_2 = arith.constant 0 : index
    %c0_3 = arith.constant 0 : index
    %4 = vector.load %arg4[%c0_2, %c0_3] : memref<128x256xbf16, #tpu.memory_space<vmem>>, vector<128x256xbf16>
    %cst = arith.constant dense<0.000000e+00> : vector<16x256xf32>
    %5 = tpu.matmul %3, %4, %cst {dimension_numbers = #tpu.dot_dimension_numbers<[1], [0], [0], [1], [0, 0, 1, 1], [], []>} : vector<16x128xbf16>, vector<128x256xbf16>, vector<16x256xf32> -> vector<16x256xf32>
    %c0_4 = arith.constant 0 : index
    %c0_5 = arith.constant 0 : index
    %6 = vector.load %arg5[%c0_4, %c0_5] : memref<128x256xbf16, #tpu.memory_space<vmem>>, vector<128x256xbf16>
    %cst_6 = arith.constant dense<0.000000e+00> : vector<16x256xf32>
    %7 = tpu.matmul %3, %6, %cst_6 {dimension_numbers = #tpu.dot_dimension_numbers<[1], [0], [0], [1], [0, 0, 1, 1], [], []>} : vector<16x128xbf16>, vector<128x256xbf16>, vector<16x256xf32> -> vector<16x256xf32>
    %cst_7 = arith.constant 0.000000e+00 : f32
    %8 = vector.broadcast %cst_7 : f32 to vector<16x256xf32>
    %9 = arith.subf %8, %5 : vector<16x256xf32>
    %10 = math.exp %9 : vector<16x256xf32>
    %cst_8 = arith.constant 1.000000e+00 : f32
    %11 = vector.broadcast %cst_8 : f32 to vector<16x256xf32>
    %12 = arith.addf %11, %10 : vector<16x256xf32>
    %13 = tpu.reciprocal %12 {approx = true} : vector<16x256xf32> -> vector<16x256xf32>
    %14 = arith.mulf %5, %13 : vector<16x256xf32>
    %c0_9 = arith.constant 0 : index
    %c0_10 = arith.constant 0 : index
    %15 = vector.load %arg9[%c0_9, %c0_10] : memref<16x128xf32, #tpu.memory_space<vmem>>, vector<16x128xf32>
    %16 = arith.mulf %14, %7 : vector<16x256xf32>
    %17 = arith.truncf %16 : vector<16x256xf32> to vector<16x256xbf16>
    %c0_11 = arith.constant 0 : index
    %c0_12 = arith.constant 0 : index
    %18 = vector.load %arg6[%c0_11, %c0_12] : memref<256x128xbf16, #tpu.memory_space<vmem>>, vector<256x128xbf16>
    %cst_13 = arith.constant dense<0.000000e+00> : vector<16x128xf32>
    %19 = tpu.matmul %17, %18, %cst_13 {dimension_numbers = #tpu.dot_dimension_numbers<[1], [0], [0], [1], [0, 0, 1, 1], [], []>} : vector<16x256xbf16>, vector<256x128xbf16>, vector<16x128xf32> -> vector<16x128xf32>
    %20 = arith.addf %15, %19 : vector<16x128xf32>
    %c0_14 = arith.constant 0 : index
    %c0_15 = arith.constant 0 : index
    %21 = vector.load %arg9[%c0_14, %c0_15] : memref<16x128xf32, #tpu.memory_space<vmem>>, vector<16x128xf32>
    tpu.vector_store %arg9[%c0_14, %c0_15], %20 {strides = array<i32>} : memref<16x128xf32, #tpu.memory_space<vmem>>, vector<16x128xf32>,
    %c1_i32 = arith.constant 1 : i32
    %22 = arith.cmpi eq, %arg1, %c1_i32 : i32
    %23 = arith.extui %22 : i1 to i32
    %c0_i32_16 = arith.constant 0 : i32
    %24 = arith.cmpi ne, %23, %c0_i32_16 : i32
    scf.if %24 {
      %c0_17 = arith.constant 0 : index
      %c0_18 = arith.constant 0 : index
      %25 = vector.load %arg9[%c0_17, %c0_18] : memref<16x128xf32, #tpu.memory_space<vmem>>, vector<16x128xf32>
      %c0_19 = arith.constant 0 : index
      %c0_20 = arith.constant 0 : index
      %26 = vector.load %arg2[%c0_19, %c0_20] : memref<16x128xf32, #tpu.memory_space<vmem>>, vector<16x128xf32>
      %27 = arith.addf %25, %26 : vector<16x128xf32>
      %c0_21 = arith.constant 0 : index
      %c0_22 = arith.constant 0 : index
      %28 = vector.load %arg7[%c0_21, %c0_22] : memref<16x128xf32, #tpu.memory_space<vmem>>, vector<16x128xf32>
      tpu.vector_store %arg7[%c0_21, %c0_22], %27 {strides = array<i32>} : memref<16x128xf32, #tpu.memory_space<vmem>>, vector<16x128xf32>,
    } else {
    }
    return
  }
  func.func @transform_0(%arg0: i32, %arg1: i32) -> (i32, i32) {
    %c0_i32 = arith.constant 0 : i32
    %c0_i32_0 = arith.constant 0 : i32
    return %arg0, %c0_i32 : i32, i32
  }
  func.func @transform_1(%arg0: i32, %arg1: i32) -> (i32, i32) {
    %c0_i32 = arith.constant 0 : i32
    %c0_i32_0 = arith.constant 0 : i32
    %c0_i32_1 = arith.constant 0 : i32
    return %c0_i32, %c0_i32_0 : i32, i32
  }
  func.func @transform_2(%arg0: i32, %arg1: i32) -> (i32, i32) {
    %c0_i32 = arith.constant 0 : i32
    %c0_i32_0 = arith.constant 0 : i32
    return %c0_i32, %arg1 : i32, i32
  }
  func.func @transform_3(%arg0: i32, %arg1: i32) -> (i32, i32) {
    %c0_i32 = arith.constant 0 : i32
    %c0_i32_0 = arith.constant 0 : i32
    return %c0_i32, %arg1 : i32, i32
  }
  func.func @transform_4(%arg0: i32, %arg1: i32) -> (i32, i32) {
    %c0_i32 = arith.constant 0 : i32
    %c0_i32_0 = arith.constant 0 : i32
    return %arg1, %c0_i32 : i32, i32
  }
  func.func @transform_5(%arg0: i32, %arg1: i32) -> (i32, i32) {
    %c0_i32 = arith.constant 0 : i32
    %c0_i32_0 = arith.constant 0 : i32
    return %arg0, %c0_i32 : i32, i32
  }
}

module attributes {stable_mosaic.version = 11 : i64} {
  func.func @_attn_rope_kernel(%arg0: i32, %arg1: memref<16x384xbf16, #tpu.memory_space<vmem>>, %arg2: memref<16x16xf32, #tpu.memory_space<vmem>>, %arg3: memref<16x16xf32, #tpu.memory_space<vmem>>, %arg4: memref<16x128xbf16, #tpu.memory_space<vmem>>) attributes {dimension_semantics = [#tpu.dimension_semantics<parallel>], iteration_bounds = array<i64: 2>, scalar_prefetch = 0 : i64, scratch_operands = 0 : i64, tpu.core_type = #tpu.core_type<tc>, window_params = [{transform_indices = @transform_0, window_bounds = array<i64: 16, 384>}, {pipeline_mode = #tpu.pipeline_mode<synchronous>, transform_indices = @transform_1, window_bounds = array<i64: 16, 16>}, {pipeline_mode = #tpu.pipeline_mode<synchronous>, transform_indices = @transform_2, window_bounds = array<i64: 16, 16>}, {transform_indices = @transform_3, window_bounds = array<i64: 16, 128>}]} {
    %c0 = arith.constant 0 : index
    %c0_0 = arith.constant 0 : index
    %0 = vector.load %arg2[%c0, %c0_0] : memref<16x16xf32, #tpu.memory_space<vmem>>, vector<16x16xf32>
    %c0_1 = arith.constant 0 : index
    %c0_2 = arith.constant 0 : index
    %1 = vector.load %arg3[%c0_1, %c0_2] : memref<16x16xf32, #tpu.memory_space<vmem>>, vector<16x16xf32>
    %c0_3 = arith.constant 0 : index
    %c0_4 = arith.constant 0 : index
    %2 = vector.load %arg1[%c0_3, %c0_4] : memref<16x384xbf16, #tpu.memory_space<vmem>>, vector<16x32xbf16>
    %3 = arith.extf %2 : vector<16x32xbf16> to vector<16x32xf32>
    %c0_5 = arith.constant 0 : index
    %c128 = arith.constant 128 : index
    %4 = vector.load %arg1[%c0_5, %c128] : memref<16x384xbf16, #tpu.memory_space<vmem>>, vector<16x32xbf16>
    %5 = arith.extf %4 : vector<16x32xbf16> to vector<16x32xf32>
    %c0_6 = arith.constant 0 : index
    %c256 = arith.constant 256 : index
    %6 = vector.load %arg1[%c0_6, %c256] : memref<16x384xbf16, #tpu.memory_space<vmem>>, vector<16x32xbf16>
    %7 = vector.extract_strided_slice %3 {offsets = [0, 0], sizes = [16, 16], strides = [1, 1]} : vector<16x32xf32> to vector<16x16xf32>
    %8 = vector.extract_strided_slice %3 {offsets = [0, 16], sizes = [16, 16], strides = [1, 1]} : vector<16x32xf32> to vector<16x16xf32>
    %9 = arith.mulf %7, %0 : vector<16x16xf32>
    %10 = arith.mulf %8, %1 : vector<16x16xf32>
    %11 = arith.subf %9, %10 : vector<16x16xf32>
    %12 = arith.mulf %8, %0 : vector<16x16xf32>
    %13 = arith.mulf %7, %1 : vector<16x16xf32>
    %14 = arith.addf %12, %13 : vector<16x16xf32>
    %15 = tpu.concatenate %11, %14 in 1 : vector<16x16xf32>, vector<16x16xf32> -> vector<16x32xf32>
    %16 = arith.truncf %15 : vector<16x32xf32> to vector<16x32xbf16>
    %17 = vector.extract_strided_slice %5 {offsets = [0, 0], sizes = [16, 16], strides = [1, 1]} : vector<16x32xf32> to vector<16x16xf32>
    %18 = vector.extract_strided_slice %5 {offsets = [0, 16], sizes = [16, 16], strides = [1, 1]} : vector<16x32xf32> to vector<16x16xf32>
    %19 = arith.mulf %17, %0 : vector<16x16xf32>
    %20 = arith.mulf %18, %1 : vector<16x16xf32>
    %21 = arith.subf %19, %20 : vector<16x16xf32>
    %22 = arith.mulf %18, %0 : vector<16x16xf32>
    %23 = arith.mulf %17, %1 : vector<16x16xf32>
    %24 = arith.addf %22, %23 : vector<16x16xf32>
    %25 = tpu.concatenate %21, %24 in 1 : vector<16x16xf32>, vector<16x16xf32> -> vector<16x32xf32>
    %26 = arith.truncf %25 : vector<16x32xf32> to vector<16x32xbf16>
    %cst = arith.constant dense<0.000000e+00> : vector<16x16xf32>
    %27 = tpu.matmul %16, %26, %cst {dimension_numbers = #tpu.dot_dimension_numbers<[1], [1], [0], [0], [0, 0, 1, 0], [], []>} : vector<16x32xbf16>, vector<16x32xbf16>, vector<16x16xf32> -> vector<16x16xf32>
    %cst_7 = arith.constant 0.176776692 : f32
    %28 = vector.broadcast %cst_7 : f32 to vector<16x16xf32>
    %29 = arith.mulf %27, %28 : vector<16x16xf32>
    %cst_8 = arith.constant dense<0xFF800000> : vector<16xf32>
    %30 = vector.multi_reduction <maximumf>, %29, %cst_8 [1] : vector<16x16xf32> to vector<16xf32>
    %31 = vector.shape_cast %30 : vector<16xf32> to vector<16x1xf32>
    %32 = vector.broadcast %31 : vector<16x1xf32> to vector<16x16xf32>
    %33 = arith.subf %29, %32 : vector<16x16xf32>
    %34 = math.exp %33 : vector<16x16xf32>
    %cst_9 = arith.constant dense<0.000000e+00> : vector<16xf32>
    %35 = vector.multi_reduction <add>, %34, %cst_9 [1] : vector<16x16xf32> to vector<16xf32>
    %36 = vector.shape_cast %35 : vector<16xf32> to vector<16x1xf32>
    %37 = tpu.reciprocal %36 {approx = true} : vector<16x1xf32> -> vector<16x1xf32>
    %38 = vector.broadcast %37 : vector<16x1xf32> to vector<16x16xf32>
    %39 = arith.mulf %34, %38 : vector<16x16xf32>
    %40 = arith.truncf %39 : vector<16x16xf32> to vector<16x16xbf16>
    %cst_10 = arith.constant dense<0.000000e+00> : vector<16x32xf32>
    %41 = tpu.matmul %40, %6, %cst_10 {dimension_numbers = #tpu.dot_dimension_numbers<[1], [0], [0], [1], [0, 0, 1, 1], [], []>} : vector<16x16xbf16>, vector<16x32xbf16>, vector<16x32xf32> -> vector<16x32xf32>
    %c0_11 = arith.constant 0 : index
    %c32 = arith.constant 32 : index
    %42 = vector.load %arg1[%c0_11, %c32] : memref<16x384xbf16, #tpu.memory_space<vmem>>, vector<16x32xbf16>
    %43 = arith.extf %42 : vector<16x32xbf16> to vector<16x32xf32>
    %c0_12 = arith.constant 0 : index
    %c160 = arith.constant 160 : index
    %44 = vector.load %arg1[%c0_12, %c160] : memref<16x384xbf16, #tpu.memory_space<vmem>>, vector<16x32xbf16>
    %45 = arith.extf %44 : vector<16x32xbf16> to vector<16x32xf32>
    %c0_13 = arith.constant 0 : index
    %c288 = arith.constant 288 : index
    %46 = vector.load %arg1[%c0_13, %c288] : memref<16x384xbf16, #tpu.memory_space<vmem>>, vector<16x32xbf16>
    %47 = vector.extract_strided_slice %43 {offsets = [0, 0], sizes = [16, 16], strides = [1, 1]} : vector<16x32xf32> to vector<16x16xf32>
    %48 = vector.extract_strided_slice %43 {offsets = [0, 16], sizes = [16, 16], strides = [1, 1]} : vector<16x32xf32> to vector<16x16xf32>
    %49 = arith.mulf %47, %0 : vector<16x16xf32>
    %50 = arith.mulf %48, %1 : vector<16x16xf32>
    %51 = arith.subf %49, %50 : vector<16x16xf32>
    %52 = arith.mulf %48, %0 : vector<16x16xf32>
    %53 = arith.mulf %47, %1 : vector<16x16xf32>
    %54 = arith.addf %52, %53 : vector<16x16xf32>
    %55 = tpu.concatenate %51, %54 in 1 : vector<16x16xf32>, vector<16x16xf32> -> vector<16x32xf32>
    %56 = arith.truncf %55 : vector<16x32xf32> to vector<16x32xbf16>
    %57 = vector.extract_strided_slice %45 {offsets = [0, 0], sizes = [16, 16], strides = [1, 1]} : vector<16x32xf32> to vector<16x16xf32>
    %58 = vector.extract_strided_slice %45 {offsets = [0, 16], sizes = [16, 16], strides = [1, 1]} : vector<16x32xf32> to vector<16x16xf32>
    %59 = arith.mulf %57, %0 : vector<16x16xf32>
    %60 = arith.mulf %58, %1 : vector<16x16xf32>
    %61 = arith.subf %59, %60 : vector<16x16xf32>
    %62 = arith.mulf %58, %0 : vector<16x16xf32>
    %63 = arith.mulf %57, %1 : vector<16x16xf32>
    %64 = arith.addf %62, %63 : vector<16x16xf32>
    %65 = tpu.concatenate %61, %64 in 1 : vector<16x16xf32>, vector<16x16xf32> -> vector<16x32xf32>
    %66 = arith.truncf %65 : vector<16x32xf32> to vector<16x32xbf16>
    %cst_14 = arith.constant dense<0.000000e+00> : vector<16x16xf32>
    %67 = tpu.matmul %56, %66, %cst_14 {dimension_numbers = #tpu.dot_dimension_numbers<[1], [1], [0], [0], [0, 0, 1, 0], [], []>} : vector<16x32xbf16>, vector<16x32xbf16>, vector<16x16xf32> -> vector<16x16xf32>
    %cst_15 = arith.constant 0.176776692 : f32
    %68 = vector.broadcast %cst_15 : f32 to vector<16x16xf32>
    %69 = arith.mulf %67, %68 : vector<16x16xf32>
    %cst_16 = arith.constant dense<0xFF800000> : vector<16xf32>
    %70 = vector.multi_reduction <maximumf>, %69, %cst_16 [1] : vector<16x16xf32> to vector<16xf32>
    %71 = vector.shape_cast %70 : vector<16xf32> to vector<16x1xf32>
    %72 = vector.broadcast %71 : vector<16x1xf32> to vector<16x16xf32>
    %73 = arith.subf %69, %72 : vector<16x16xf32>
    %74 = math.exp %73 : vector<16x16xf32>
    %cst_17 = arith.constant dense<0.000000e+00> : vector<16xf32>
    %75 = vector.multi_reduction <add>, %74, %cst_17 [1] : vector<16x16xf32> to vector<16xf32>
    %76 = vector.shape_cast %75 : vector<16xf32> to vector<16x1xf32>
    %77 = tpu.reciprocal %76 {approx = true} : vector<16x1xf32> -> vector<16x1xf32>
    %78 = vector.broadcast %77 : vector<16x1xf32> to vector<16x16xf32>
    %79 = arith.mulf %74, %78 : vector<16x16xf32>
    %80 = arith.truncf %79 : vector<16x16xf32> to vector<16x16xbf16>
    %cst_18 = arith.constant dense<0.000000e+00> : vector<16x32xf32>
    %81 = tpu.matmul %80, %46, %cst_18 {dimension_numbers = #tpu.dot_dimension_numbers<[1], [0], [0], [1], [0, 0, 1, 1], [], []>} : vector<16x16xbf16>, vector<16x32xbf16>, vector<16x32xf32> -> vector<16x32xf32>
    %c0_19 = arith.constant 0 : index
    %c64 = arith.constant 64 : index
    %82 = vector.load %arg1[%c0_19, %c64] : memref<16x384xbf16, #tpu.memory_space<vmem>>, vector<16x32xbf16>
    %83 = arith.extf %82 : vector<16x32xbf16> to vector<16x32xf32>
    %c0_20 = arith.constant 0 : index
    %c192 = arith.constant 192 : index
    %84 = vector.load %arg1[%c0_20, %c192] : memref<16x384xbf16, #tpu.memory_space<vmem>>, vector<16x32xbf16>
    %85 = arith.extf %84 : vector<16x32xbf16> to vector<16x32xf32>
    %c0_21 = arith.constant 0 : index
    %c320 = arith.constant 320 : index
    %86 = vector.load %arg1[%c0_21, %c320] : memref<16x384xbf16, #tpu.memory_space<vmem>>, vector<16x32xbf16>
    %87 = vector.extract_strided_slice %83 {offsets = [0, 0], sizes = [16, 16], strides = [1, 1]} : vector<16x32xf32> to vector<16x16xf32>
    %88 = vector.extract_strided_slice %83 {offsets = [0, 16], sizes = [16, 16], strides = [1, 1]} : vector<16x32xf32> to vector<16x16xf32>
    %89 = arith.mulf %87, %0 : vector<16x16xf32>
    %90 = arith.mulf %88, %1 : vector<16x16xf32>
    %91 = arith.subf %89, %90 : vector<16x16xf32>
    %92 = arith.mulf %88, %0 : vector<16x16xf32>
    %93 = arith.mulf %87, %1 : vector<16x16xf32>
    %94 = arith.addf %92, %93 : vector<16x16xf32>
    %95 = tpu.concatenate %91, %94 in 1 : vector<16x16xf32>, vector<16x16xf32> -> vector<16x32xf32>
    %96 = arith.truncf %95 : vector<16x32xf32> to vector<16x32xbf16>
    %97 = vector.extract_strided_slice %85 {offsets = [0, 0], sizes = [16, 16], strides = [1, 1]} : vector<16x32xf32> to vector<16x16xf32>
    %98 = vector.extract_strided_slice %85 {offsets = [0, 16], sizes = [16, 16], strides = [1, 1]} : vector<16x32xf32> to vector<16x16xf32>
    %99 = arith.mulf %97, %0 : vector<16x16xf32>
    %100 = arith.mulf %98, %1 : vector<16x16xf32>
    %101 = arith.subf %99, %100 : vector<16x16xf32>
    %102 = arith.mulf %98, %0 : vector<16x16xf32>
    %103 = arith.mulf %97, %1 : vector<16x16xf32>
    %104 = arith.addf %102, %103 : vector<16x16xf32>
    %105 = tpu.concatenate %101, %104 in 1 : vector<16x16xf32>, vector<16x16xf32> -> vector<16x32xf32>
    %106 = arith.truncf %105 : vector<16x32xf32> to vector<16x32xbf16>
    %cst_22 = arith.constant dense<0.000000e+00> : vector<16x16xf32>
    %107 = tpu.matmul %96, %106, %cst_22 {dimension_numbers = #tpu.dot_dimension_numbers<[1], [1], [0], [0], [0, 0, 1, 0], [], []>} : vector<16x32xbf16>, vector<16x32xbf16>, vector<16x16xf32> -> vector<16x16xf32>
    %cst_23 = arith.constant 0.176776692 : f32
    %108 = vector.broadcast %cst_23 : f32 to vector<16x16xf32>
    %109 = arith.mulf %107, %108 : vector<16x16xf32>
    %cst_24 = arith.constant dense<0xFF800000> : vector<16xf32>
    %110 = vector.multi_reduction <maximumf>, %109, %cst_24 [1] : vector<16x16xf32> to vector<16xf32>
    %111 = vector.shape_cast %110 : vector<16xf32> to vector<16x1xf32>
    %112 = vector.broadcast %111 : vector<16x1xf32> to vector<16x16xf32>
    %113 = arith.subf %109, %112 : vector<16x16xf32>
    %114 = math.exp %113 : vector<16x16xf32>
    %cst_25 = arith.constant dense<0.000000e+00> : vector<16xf32>
    %115 = vector.multi_reduction <add>, %114, %cst_25 [1] : vector<16x16xf32> to vector<16xf32>
    %116 = vector.shape_cast %115 : vector<16xf32> to vector<16x1xf32>
    %117 = tpu.reciprocal %116 {approx = true} : vector<16x1xf32> -> vector<16x1xf32>
    %118 = vector.broadcast %117 : vector<16x1xf32> to vector<16x16xf32>
    %119 = arith.mulf %114, %118 : vector<16x16xf32>
    %120 = arith.truncf %119 : vector<16x16xf32> to vector<16x16xbf16>
    %cst_26 = arith.constant dense<0.000000e+00> : vector<16x32xf32>
    %121 = tpu.matmul %120, %86, %cst_26 {dimension_numbers = #tpu.dot_dimension_numbers<[1], [0], [0], [1], [0, 0, 1, 1], [], []>} : vector<16x16xbf16>, vector<16x32xbf16>, vector<16x32xf32> -> vector<16x32xf32>
    %c0_27 = arith.constant 0 : index
    %c96 = arith.constant 96 : index
    %122 = vector.load %arg1[%c0_27, %c96] : memref<16x384xbf16, #tpu.memory_space<vmem>>, vector<16x32xbf16>
    %123 = arith.extf %122 : vector<16x32xbf16> to vector<16x32xf32>
    %c0_28 = arith.constant 0 : index
    %c224 = arith.constant 224 : index
    %124 = vector.load %arg1[%c0_28, %c224] : memref<16x384xbf16, #tpu.memory_space<vmem>>, vector<16x32xbf16>
    %125 = arith.extf %124 : vector<16x32xbf16> to vector<16x32xf32>
    %c0_29 = arith.constant 0 : index
    %c352 = arith.constant 352 : index
    %126 = vector.load %arg1[%c0_29, %c352] : memref<16x384xbf16, #tpu.memory_space<vmem>>, vector<16x32xbf16>
    %127 = vector.extract_strided_slice %123 {offsets = [0, 0], sizes = [16, 16], strides = [1, 1]} : vector<16x32xf32> to vector<16x16xf32>
    %128 = vector.extract_strided_slice %123 {offsets = [0, 16], sizes = [16, 16], strides = [1, 1]} : vector<16x32xf32> to vector<16x16xf32>
    %129 = arith.mulf %127, %0 : vector<16x16xf32>
    %130 = arith.mulf %128, %1 : vector<16x16xf32>
    %131 = arith.subf %129, %130 : vector<16x16xf32>
    %132 = arith.mulf %128, %0 : vector<16x16xf32>
    %133 = arith.mulf %127, %1 : vector<16x16xf32>
    %134 = arith.addf %132, %133 : vector<16x16xf32>
    %135 = tpu.concatenate %131, %134 in 1 : vector<16x16xf32>, vector<16x16xf32> -> vector<16x32xf32>
    %136 = arith.truncf %135 : vector<16x32xf32> to vector<16x32xbf16>
    %137 = vector.extract_strided_slice %125 {offsets = [0, 0], sizes = [16, 16], strides = [1, 1]} : vector<16x32xf32> to vector<16x16xf32>
    %138 = vector.extract_strided_slice %125 {offsets = [0, 16], sizes = [16, 16], strides = [1, 1]} : vector<16x32xf32> to vector<16x16xf32>
    %139 = arith.mulf %137, %0 : vector<16x16xf32>
    %140 = arith.mulf %138, %1 : vector<16x16xf32>
    %141 = arith.subf %139, %140 : vector<16x16xf32>
    %142 = arith.mulf %138, %0 : vector<16x16xf32>
    %143 = arith.mulf %137, %1 : vector<16x16xf32>
    %144 = arith.addf %142, %143 : vector<16x16xf32>
    %145 = tpu.concatenate %141, %144 in 1 : vector<16x16xf32>, vector<16x16xf32> -> vector<16x32xf32>
    %146 = arith.truncf %145 : vector<16x32xf32> to vector<16x32xbf16>
    %cst_30 = arith.constant dense<0.000000e+00> : vector<16x16xf32>
    %147 = tpu.matmul %136, %146, %cst_30 {dimension_numbers = #tpu.dot_dimension_numbers<[1], [1], [0], [0], [0, 0, 1, 0], [], []>} : vector<16x32xbf16>, vector<16x32xbf16>, vector<16x16xf32> -> vector<16x16xf32>
    %cst_31 = arith.constant 0.176776692 : f32
    %148 = vector.broadcast %cst_31 : f32 to vector<16x16xf32>
    %149 = arith.mulf %147, %148 : vector<16x16xf32>
    %cst_32 = arith.constant dense<0xFF800000> : vector<16xf32>
    %150 = vector.multi_reduction <maximumf>, %149, %cst_32 [1] : vector<16x16xf32> to vector<16xf32>
    %151 = vector.shape_cast %150 : vector<16xf32> to vector<16x1xf32>
    %152 = vector.broadcast %151 : vector<16x1xf32> to vector<16x16xf32>
    %153 = arith.subf %149, %152 : vector<16x16xf32>
    %154 = math.exp %153 : vector<16x16xf32>
    %cst_33 = arith.constant dense<0.000000e+00> : vector<16xf32>
    %155 = vector.multi_reduction <add>, %154, %cst_33 [1] : vector<16x16xf32> to vector<16xf32>
    %156 = vector.shape_cast %155 : vector<16xf32> to vector<16x1xf32>
    %157 = tpu.reciprocal %156 {approx = true} : vector<16x1xf32> -> vector<16x1xf32>
    %158 = vector.broadcast %157 : vector<16x1xf32> to vector<16x16xf32>
    %159 = arith.mulf %154, %158 : vector<16x16xf32>
    %160 = arith.truncf %159 : vector<16x16xf32> to vector<16x16xbf16>
    %cst_34 = arith.constant dense<0.000000e+00> : vector<16x32xf32>
    %161 = tpu.matmul %160, %126, %cst_34 {dimension_numbers = #tpu.dot_dimension_numbers<[1], [0], [0], [1], [0, 0, 1, 1], [], []>} : vector<16x16xbf16>, vector<16x32xbf16>, vector<16x32xf32> -> vector<16x32xf32>
    %162 = tpu.concatenate %41, %81, %121, %161 in 1 : vector<16x32xf32>, vector<16x32xf32>, vector<16x32xf32>, vector<16x32xf32> -> vector<16x128xf32>
    %163 = arith.truncf %162 : vector<16x128xf32> to vector<16x128xbf16>
    %c0_35 = arith.constant 0 : index
    %c0_36 = arith.constant 0 : index
    %164 = vector.load %arg4[%c0_35, %c0_36] : memref<16x128xbf16, #tpu.memory_space<vmem>>, vector<16x128xbf16>
    tpu.vector_store %arg4[%c0_35, %c0_36], %163 {strides = array<i32>} : memref<16x128xbf16, #tpu.memory_space<vmem>>, vector<16x128xbf16>,
    return
  }
  func.func @transform_0(%arg0: i32) -> (i32, i32) {
    %c0_i32 = arith.constant 0 : i32
    %c0_i32_0 = arith.constant 0 : i32
    return %arg0, %c0_i32 : i32, i32
  }
  func.func @transform_1(%arg0: i32) -> (i32, i32) {
    %c0_i32 = arith.constant 0 : i32
    %c0_i32_0 = arith.constant 0 : i32
    %c0_i32_1 = arith.constant 0 : i32
    return %c0_i32, %c0_i32_0 : i32, i32
  }
  func.func @transform_2(%arg0: i32) -> (i32, i32) {
    %c0_i32 = arith.constant 0 : i32
    %c0_i32_0 = arith.constant 0 : i32
    %c0_i32_1 = arith.constant 0 : i32
    return %c0_i32, %c0_i32_0 : i32, i32
  }
  func.func @transform_3(%arg0: i32) -> (i32, i32) {
    %c0_i32 = arith.constant 0 : i32
    %c0_i32_0 = arith.constant 0 : i32
    return %arg0, %c0_i32 : i32, i32
  }
}

module attributes {stable_mosaic.version = 11 : i64} {
  func.func @_norm_matmul_kernel(%arg0: i32, %arg1: i32, %arg2: memref<16x128xf32, #tpu.memory_space<vmem>>, %arg3: memref<1x128xf32, #tpu.memory_space<vmem>>, %arg4: memref<128x128xbf16, #tpu.memory_space<vmem>>, %arg5: memref<16x128xbf16, #tpu.memory_space<vmem>>) attributes {dimension_semantics = [#tpu.dimension_semantics<parallel>, #tpu.dimension_semantics<parallel>], iteration_bounds = array<i64: 2, 3>, scalar_prefetch = 0 : i64, scratch_operands = 0 : i64, tpu.core_type = #tpu.core_type<tc>, window_params = [{transform_indices = @transform_0, window_bounds = array<i64: 16, 128>}, {pipeline_mode = #tpu.pipeline_mode<synchronous>, transform_indices = @transform_1, window_bounds = array<i64: 1, 128>}, {transform_indices = @transform_2, window_bounds = array<i64: 128, 128>}, {transform_indices = @transform_3, window_bounds = array<i64: 16, 128>}]} {
    %c0 = arith.constant 0 : index
    %c0_0 = arith.constant 0 : index
    %0 = vector.load %arg2[%c0, %c0_0] : memref<16x128xf32, #tpu.memory_space<vmem>>, vector<16x128xf32>
    %1 = arith.mulf %0, %0 : vector<16x128xf32>
    %cst = arith.constant dense<0.000000e+00> : vector<16xf32>
    %2 = vector.multi_reduction <add>, %1, %cst [1] : vector<16x128xf32> to vector<16xf32>
    %3 = vector.shape_cast %2 : vector<16xf32> to vector<16x1xf32>
    %cst_1 = arith.constant 1.280000e+02 : f32
    %4 = vector.broadcast %cst_1 : f32 to vector<16x1xf32>
    %5 = arith.divf %3, %4 : vector<16x1xf32>
    %cst_2 = arith.constant 9.99999997E-7 : f32
    %6 = vector.broadcast %cst_2 : f32 to vector<16x1xf32>
    %7 = arith.addf %5, %6 : vector<16x1xf32>
    %8 = math.rsqrt %7 : vector<16x1xf32>
    %c0_3 = arith.constant 0 : index
    %c0_4 = arith.constant 0 : index
    %9 = vector.load %arg3[%c0_3, %c0_4] : memref<1x128xf32, #tpu.memory_space<vmem>>, vector<1x128xf32>
    %10 = vector.broadcast %8 : vector<16x1xf32> to vector<16x128xf32>
    %11 = vector.broadcast %9 : vector<1x128xf32> to vector<16x128xf32>
    %12 = arith.mulf %10, %11 : vector<16x128xf32>
    %13 = arith.mulf %0, %12 : vector<16x128xf32>
    %14 = arith.truncf %13 : vector<16x128xf32> to vector<16x128xbf16>
    %c0_5 = arith.constant 0 : index
    %c0_6 = arith.constant 0 : index
    %15 = vector.load %arg4[%c0_5, %c0_6] : memref<128x128xbf16, #tpu.memory_space<vmem>>, vector<128x128xbf16>
    %cst_7 = arith.constant dense<0.000000e+00> : vector<16x128xf32>
    %16 = tpu.matmul %14, %15, %cst_7 {dimension_numbers = #tpu.dot_dimension_numbers<[1], [0], [0], [1], [0, 0, 1, 1], [], []>} : vector<16x128xbf16>, vector<128x128xbf16>, vector<16x128xf32> -> vector<16x128xf32>
    %17 = arith.truncf %16 : vector<16x128xf32> to vector<16x128xbf16>
    %c0_8 = arith.constant 0 : index
    %c0_9 = arith.constant 0 : index
    %18 = vector.load %arg5[%c0_8, %c0_9] : memref<16x128xbf16, #tpu.memory_space<vmem>>, vector<16x128xbf16>
    tpu.vector_store %arg5[%c0_8, %c0_9], %17 {strides = array<i32>} : memref<16x128xbf16, #tpu.memory_space<vmem>>, vector<16x128xbf16>,
    return
  }
  func.func @transform_0(%arg0: i32, %arg1: i32) -> (i32, i32) {
    %c0_i32 = arith.constant 0 : i32
    %c0_i32_0 = arith.constant 0 : i32
    return %arg0, %c0_i32 : i32, i32
  }
  func.func @transform_1(%arg0: i32, %arg1: i32) -> (i32, i32) {
    %c0_i32 = arith.constant 0 : i32
    %c0_i32_0 = arith.constant 0 : i32
    %c0_i32_1 = arith.constant 0 : i32
    return %c0_i32, %c0_i32_0 : i32, i32
  }
  func.func @transform_2(%arg0: i32, %arg1: i32) -> (i32, i32) {
    %c0_i32 = arith.constant 0 : i32
    %c0_i32_0 = arith.constant 0 : i32
    return %c0_i32, %arg1 : i32, i32
  }
  func.func @transform_3(%arg0: i32, %arg1: i32) -> (i32, i32) {
    %c0_i32 = arith.constant 0 : i32
    return %arg0, %arg1 : i32, i32
  }
}

</mosaic_0001>

<bundles_post_ra>
// kernel: transformer_block.4
= control target key start
LH: loop header
LB: loop body
LE: loop exit
PB: predicated region body
PF: predicated region fallthrough
CT: control target
= control target key end

     0   :  { %s1347_s0 = inlined_call_operand.hbm [shape: f32[32,128], index: 0, kind: input, shape index: {}]   ;;  %s1348_s1 = inlined_call_operand.hbm [shape: f32[1,128], index: 1, kind: input, shape index: {}]   ;;  %s1349_s2 = inlined_call_operand.hbm [shape: bf16[128,384], index: 2, kind: input, shape index: {}]   ;;  %s1350_s3 = inlined_call_operand.vmem [shape: bf16[32,384], index: 3, kind: output, shape index: {}]  }
   0x1   :  { %1364 = sst [smem:[#allocation20_spill]] %s1347_s0 }
   0x2   :  { %1365 = sst [smem:[#allocation21_spill]] %s1350_s3 }
   0x3   :  { %8 = vsyncpa [#allocation3], 0 }
   0x4   :  { %10 = vsyncpa [#allocation3 + $0x1], 0 }
   0x5   :  { %11 = vsyncpa [#allocation5], 0  ;;  %s1003_s12 = smov 0   ;;  %s1005_s13 = smov 0  }
   0x6   :  { %s1007_s14 = smov 0   ;;  %s1009_s15 = smov 0  }
   0x7   :  { %s1011_s16 = smov 0   ;;  %s1013_s17 = smov 0  }
   0x8   :  { %s1015_s18 = smov 0   ;;  %s1017_s19 = smov 0  }
   0x9   :  { %s1019_s20 = smov 0   ;;  %s1021_s21 = smov 0  }
   0xa   :  { %s1023_s22 = smov 0   ;;  %s1025_s23 = smov 0  }
   0xb   :  { %s1027_s24 = smov 0  }
   0xc LB: > { %1366 = sst [smem:[#allocation11_spill]] %s939_s16  ;;  %s26_s25 = sadd.s32 1, %s963_s22  ;;  %s971_s24 = sphi %s1027_s24, %s17_s24   ;;  %s967_s23 = sphi %s1025_s23, %s1406_s23   ;;  %s963_s22 = sphi %s1023_s22, %s1415_s22   ;;  %s959_s21 = sphi %s1021_s21, %s1414_s21   ;;  %s955_s20 = sphi %s1019_s20, %s1403_s20   ;;  %s951_s19 = sphi %s1017_s19, %s1413_s19   ;;  %s947_s18 = sphi %s1015_s18, %s1412_s18   ;;  %s943_s17 = sphi %s1013_s17, %s1411_s17   ;;  %s939_s16 = sphi %s1011_s16, %s1400_s16   ;;  %s935_s15 = sphi %s1009_s15, %s1410_s15   ;;  %s931_s14 = sphi %s1007_s14, %s1409_s14   ;;  %s927_s13 = sphi %s1005_s13, %s1408_s13   ;;  %s923_s12 = sphi %s1003_s12, %s1407_s12  }
   0xd   : > { %1367 = sst [smem:[#allocation12_spill]] %s951_s19  ;;  %s29_s26 = sadd.s32 1, %s967_s23 }
   0xe   : > { %1368 = sst [smem:[#allocation13_spill]] %s955_s20  ;;  %p27_p0 = scmp.ge.s32.totalorder %s26_s25, 3 }
   0xf   : > { %1369 = sst [smem:[#allocation14_spill]] %s963_s22  ;;  %s36_s27 = sadd.s32 1, %s951_s19 }
  0x10   : > { %1370 = sst [smem:[#allocation15_spill]] %s967_s23  ;;  %p43_p1 = scmp.ne.s32.totalorder %s951_s19, %s947_s18 }
  0x11   : > { %p1354_p2 = scmp.eq.s32.totalorder %s971_s24, 0  ;;  %s1417_s25 = smov (%p27_p0, %s26_s25), 0 }
  0x12   : > { %1371 = sst [smem:[#allocation16_spill]] %s1417_s25  ;;  %s1419_s26 = smov (!%p27_p0, %s29_s26), %s967_s23 }
  0x13   : > { %p1079_p3 = por %p1354_p2, %p43_p1  ;;  %s1085_s29 = ssub.s32 %s963_s22, %s1417_s25 }
  0x14   : > { %p31_p4 = scmp.ge.s32.totalorder %s1419_s26, 2  ;;  %p1353_p6 = scmp.lt.s32.totalorder %s971_s24, 6 }
  0x15   : > { %s159_s30 = sand.u32 1, %s971_s24   ;;  %s161_s4 = sand.u32 1, %s951_s19  }
  0x16   : > { %s1421_s26 = smov (%p31_p4, %s1419_s26), 0  ;;  %s558_s8 = sshll.u32 %s161_s4, 4 }
  0x17   : > { %1373 = sst [smem:[#allocation17_spill]] %s1421_s26  ;;  %s33_s5 = ssub.s32 %s967_s23, %s1421_s26 }
  0x18   : > { %p34_p7 = scmp.eq.s32.totalorder %s33_s5, 0  ;;  %s108_s6 = sor.u32 %s1085_s29, %s33_s5 }
  0x19   : > { %p1096_p8 = scmp.eq.s32.totalorder %s108_s6, 0  ;;  %s585_s10 = sshll.u32 %s967_s23, 8 }
  0x1a   : > { %s1101_s9 = scalar_select %p34_p7, %s951_s19, %s36_s27  }
  0x1b   : > { %s1376_s0 = sld [smem:[#allocation20_spill]]  ;;  %s163_s26 = scalar_lea.vmem [#allocation2], %s558_s8 }
  0x1c   : > { %1375 = sst [smem:[#allocation18_spill]] %s1101_s9  ;;  %s170_s20 = sshll.u32 %s163_s26, 4  ;;  %s1109_s20 = int_to_ptr.vmem [resolvable:$true] %s170_s20 }
  0x1d   : > { %p1115_p9 = pnand %p1353_p6, %p1079_p3  ;;  %s1119_s27 = scalar_lea.sflag [#allocation3], %s159_s30 }
  0x1f   : > { %p771_p11 = pneg %p1115_p9 }
  0x21   : > { %s1107_s3 = scalar_lea.hbm %s1376_s0, %s585_s10  ;;  %s774_s28 = scalar_lea.hbm %s1376_s0, 512 }
  0x22   : > { %s769_s25 = scalar_lea.hbm %s1107_s3, 256  ;;  %p775_p0 = scmp.lt.u32.totalorder %s1107_s3, %s1376_s0 }
  0x23   : > { %p770_p10 = scmp.ne.s32.totalorder %s1107_s3, %s769_s25  ;;  %p776_p1 = scmp.lt.u32.totalorder %s774_s28, %s769_s25 }
  0x24   : > { %p778_p4 = scmp.lt.u32.totalorder %s769_s25, %s1107_s3 }
  0x25   : > { %p772_p12 = pnand %p771_p11, %p770_p10  ;;  %p777_p3 = por %p776_p1, %p775_p0 }
  0x27   : > { %p773_p13 = pneg %p772_p12  ;;  %p779_p7 = por %p778_p4, %p777_p3 }
  0x29   : > { %p780_p6 = pnand %p779_p7, %p773_p13 }
  0x2b   : > { %783 = shalt.err (!%p780_p6)
}
  0x2c   : > { %s784_s30 = scalar_lea.vmem %s1109_s20, 256  ;;  %s973_s10 = smov [#allocation2]  }
  0x2d   : > { %p785_p10 = scmp.ne.s32.totalorder %s1109_s20, %s784_s30  ;;  %s789_s11 = sshll.u32 %s973_s10, 4  ;;  %s790_s11 = int_to_ptr.vmem [resolvable:$false] %s789_s11 }
  0x2e   : > { %s791_s26 = scalar_lea.vmem %s790_s11, 512  ;;  %p792_p5 = scmp.lt.s32.totalorder %s1109_s20, %s790_s11 }
  0x2f   : > { %p787_p12 = pnand %p785_p10, %p771_p11  ;;  %p793_p0 = scmp.lt.s32.totalorder %s791_s26, %s784_s30 }
  0x31   : > { %p788_p2 = pneg %p787_p12  ;;  %p794_p1 = por %p793_p0, %p792_p5 }
  0x33   : > { %p795_p3 = pnand %p794_p1, %p788_p2 }
  0x35   : > { %798 = shalt.err (!%p795_p3)
}
  0x36   : > { %s974_s25 = smov 128   ;;  %s975_s5 = smov 8  }
  0x37   : > { %638 = dma.hbm_to_vmem [thread:$0]  (!%p1115_p9), %s1107_s3, 256, %s1109_s20, %s1119_s27, %s974_s25, %s974_s25, %s975_s5  }
  0x38   : > { %s1148_s28 = sadd.s32 4294967295, %s971_s24   ;;  %p49_p2 = scmp.ne.s32.totalorder %s947_s18, %s943_s17 }
  0x39   : > { %p1359_p5 = scmp.eq.s32.totalorder %s1148_s28, 0  ;;  %s83_s6 = sadd.s32 1, %s939_s16 }
  0x3a   : > { %p90_p6 = scmp.ne.s32.totalorder %s939_s16, %s935_s15  ;;  %p96_p13 = scmp.ne.s32.totalorder %s935_s15, %s931_s14 }
  0x3b   : > { %p1158_p11 = por %p1359_p5, %p49_p2  ;;  %p1379_p4 = scmp.eq.s32.totalorder %s1085_s29, 0 }
  0x3c   : > { %p1381_p9 = scmp.eq.s32.totalorder %s971_s24, 0  ;;  %p1177_p10 = por %p96_p13, %p1359_p5 }
  0x3d   : > { %s1378_s8 = scalar_select %p1158_p11, 1, 0 }
  0x3e   : > { %s1167_s3 = scalar_select %p1379_p4, %s939_s16, %s83_s6  }
  0x3f   : > { %p1171_p7 = por %p90_p6, %p1381_p9  ;;  %s111_s4 = sadd.s32 1, %s927_s13 }
  0x40   : > { %1380 = sst [smem:[#allocation19_spill]] %s1167_s3  ;;  %p121_p12 = scmp.ne.s32.totalorder %s927_s13, %s923_s12 }
  0x41   : > { %s1383_s17 = scalar_select %p1177_p10, 1, 0 }
  0x42   : > { %s1187_s14 = scalar_select %p1096_p8, %s927_s13, %s111_s4  }
  0x43   : > { %p122_p0 = scmp.eq.s32.totalorder %s1148_s28, 5  ;;  %p555_p1 = scmp.ge.s32.totalorder %s971_s24, 1 }
  0x44   : > { %p135_p3 = scmp.lt.s32.totalorder %s971_s24, 7  ;;  %s976_s10 = smov [#allocation4]  }
  0x45   : > { %p1192_p2 = por %p122_p0, %p121_p12  ;;  %s148_s11 = sshll.u32 %s976_s10, 4  ;;  %s149_s11 = int_to_ptr.vmem [resolvable:$true] %s148_s11 }
  0x46   : > { %p1196_p6 = pnand %p555_p1, %p135_p3  ;;  %p1386_p13 = scmp.lt.s32.totalorder %s971_s24, 6 }
  0x47   : > { %s1384_s29 = scalar_select %p1192_p2, 1, 0 }
  0x48   : > { %s1385_s30 = scalar_select %p1196_p6, 1, 0 }
  0x49   : > { %p1204_p4 = pnand %p1386_p13, %p1171_p7  ;;  %p631_p8 = pneg %p1196_p6 }
  0x4a   : > { %s182_s26 = sand.u32 1, %s939_s16   ;;  %s562_s6 = sshll.u32 %s963_s22, 6 }
  0x4b   : > { %s1387_s7 = scalar_select %p1204_p4, 1, 0 }
  0x4c   : > { %s561_s25 = sshll.u32 %s182_s26, 6  ;;  %p1213_p9 = pnand %p631_p8, %p1359_p5 }
  0x4d   : > { %s184_s4 = scalar_lea.vmem [#allocation6], %s561_s25  ;;  %s1221_s23 = scalar_lea.hbm %s1349_s2, %s562_s6 }
  0x4e   : > { %s190_s10 = sshll.u32 %s184_s4, 4  ;;  %s799_s3 = scalar_lea.hbm %s1348_s1, 16  ;;  %s1239_s10 = int_to_ptr.vmem [resolvable:$true] %s190_s10 }
  0x4f   : > { %p800_p7 = scmp.ne.s32.totalorder %s1348_s1, %s799_s3  ;;  %p801_p12 = pneg %p1213_p9 }
  0x50   : > { %p806_p3 = scmp.lt.u32.totalorder %s799_s3, %s1348_s1 }
  0x51   : > { %p802_p0 = pnand %p801_p12, %p800_p7 }
  0x53   : > { %p803_p1 = pneg %p802_p0 }
  0x55   : > { %p808_p13 = pnand %p806_p3, %p803_p1 }
  0x57   : > { %811 = shalt.err (!%p808_p13)
}
  0x58   : > { %s812_s0 = scalar_lea.vmem %s149_s11, 16  ;;  %s819_s19 = scalar_lea.vmem %s149_s11, 32 }
  0x59   : > { %p813_p8 = scmp.ne.s32.totalorder %s149_s11, %s812_s0  ;;  %p820_p10 = scmp.lt.s32.totalorder %s149_s11, %s149_s11 }
  0x5a   : > { %p821_p11 = scmp.lt.s32.totalorder %s819_s19, %s812_s0 }
  0x5b   : > { %p815_p5 = pnand %p813_p8, %p801_p12 }
  0x5c   : > { %p822_p6 = por %p821_p11, %p820_p10 }
  0x5d   : > { %p816_p2 = pneg %p815_p5 }
  0x5f   : > { %p823_p4 = pnand %p822_p6, %p816_p2 }
  0x61   : > { %826 = shalt.err (!%p823_p4)
}
  0x62   : > { %634 = dma.hbm_to_vmem [thread:$0]  (!%p1213_p9), %s1348_s1, 16, %s149_s11, [#allocation5]  }
  0x63   : > { %s827_s22 = scalar_lea.hbm %s1221_s23, 1024  ;;  %p1389_p7 = scmp.ne.s32.totalorder %s1387_s7, 0 }
  0x64   : > { %p828_p5 = scmp.ne.s32.totalorder %s1221_s23, %s827_s22  ;;  %s832_s6 = scalar_lea.hbm %s1349_s2, 3072 }
  0x65   : > { %p829_p11 = pneg %p1389_p7  ;;  %p833_p6 = scmp.lt.u32.totalorder %s1221_s23, %s1349_s2 }
  0x66   : > { %p834_p4 = scmp.lt.u32.totalorder %s832_s6, %s827_s22  ;;  %p836_p12 = scmp.lt.u32.totalorder %s827_s22, %s1221_s23 }
  0x67   : > { %p830_p10 = pnand %p829_p11, %p828_p5 }
  0x68   : > { %p835_p9 = por %p834_p4, %p833_p6 }
  0x69   : > { %p831_p2 = pneg %p830_p10 }
  0x6a   : > { %p837_p0 = por %p836_p12, %p835_p9 }
  0x6c   : > { %p838_p1 = pnand %p837_p0, %p831_p2 }
  0x6e   : > { %841 = shalt.err (!%p838_p1)
}
  0x6f   : > { %s842_s11 = scalar_lea.vmem %s1239_s10, 1024  ;;  %s977_s26 = smov [#allocation6]  }
  0x70   : > { %p843_p3 = scmp.ne.s32.totalorder %s1239_s10, %s842_s11  ;;  %s847_s25 = sshll.u32 %s977_s26, 4  ;;  %s848_s25 = int_to_ptr.vmem [resolvable:$false] %s847_s25 }
  0x71   : > { %s849_s0 = scalar_lea.vmem %s848_s25, 2048  ;;  %p850_p5 = scmp.lt.s32.totalorder %s1239_s10, %s848_s25 }
  0x72   : > { %p845_p13 = pnand %p843_p3, %p829_p11  ;;  %p851_p10 = scmp.lt.s32.totalorder %s849_s0, %s842_s11 }
  0x74   : > { %p846_p8 = pneg %p845_p13  ;;  %p852_p6 = por %p851_p10, %p850_p5 }
  0x76   : > { %p853_p4 = pnand %p852_p6, %p846_p8 }
  0x78   : > { %856 = shalt.err (!%p853_p4)
}
  0x79   : > { %s978_s19 = smov 192   ;;  %s979_s16 = smov 64  }
  0x7a   : > { %s980_s9 = smov 4   ;;  %p1390_p11 = scmp.ne.s32.totalorder %s1385_s30, 0 }
  0x7b   : > { %641 = dma.hbm_to_vmem [thread:$0]  (!%p1389_p7), %s1221_s23, 1024, %s1239_s10, %s1119_s27, %s978_s19, %s979_s16, %s980_s9  }
  0x7c   : > { %202 = sbr.rel (%p1390_p11) target bundleno = 534 (0x216), region = 32  ;;  %s204_s22 = sand.u32 (!%p1390_p11), 1, %s1148_s28  }
  0x7d   : > { %s206_s3 = sand.u32 (!%p1390_p11), 1, %s947_s18   ;;  %s205_s6 = scalar_lea.sflag (!%p1390_p11), [#allocation3], %s204_s22 }
  0x7e   : > { %s564_s5 = sshll.u32 (!%p1390_p11), %s206_s3, 4  ;;  %p1391_p2 = scmp.ne.s32.totalorder (!%p1390_p11), %s1378_s8, 0 }
  0x7f   : > { %s208_s4 = scalar_lea.vmem (!%p1390_p11), [#allocation2], %s564_s5 }
  0x83   : > { %910 = dma.done.wait (%p1391_p2), %s205_s6, 256  }
  0x84   : > { %912 = vsyncadd (%p1391_p2), %s205_s6, 4294967040  ;;  %p1392_p9 = scmp.eq.s32.totalorder %s1148_s28, 0 }
  0x86   : > { %914 = dma.done.wait (%p1392_p9), [#allocation5], 16   ;;  %p1393_p7 = pmov %p1392_p9 }
  0x87   : > { %s219_s23 = sand.u32 1, %s935_s15   ;;  %p1394_p12 = scmp.ne.s32.totalorder %s1383_s17, 0 }
  0x88   : > { %916 = vsyncadd (%p1393_p7), [#allocation5], 4294967280  ;;  %s566_s27 = sshll.u32 %s219_s23, 6 }
  0x89   : > { %s1280_s30 = scalar_lea.vmem [#allocation6], %s566_s27 }
  0x8a   : > { %918 = dma.done.wait (%p1394_p12), %s205_s6, 1024  }
  0x8b   : > { %920 = vsyncadd (%p1394_p12), %s205_s6, 4294966272  ;;  %v981_v0 = vmov 0.0   ;;  %v251_v1 = vld [vmem:[%s208_s4] sm:$0xff]  ;;  %v252_v2 = vld [vmem:[%s208_s4 + $0x8] sm:$0xff]  ;;  %vm982_vm0 = vmmov 0   ;;  %s245_s28 = sand.u32 1, %s923_s12  }
  0x8c   : > { %602 = vmatprep.subr.bf16.mxu0 %v981_v0  ;;  %v253_v3 = vmul.f32 %v251_v1, %v251_v1  ;;  %v757_v4 = vld [vmem:[%s1280_s30] sm:$0xff]   ;;  %v758_v5 = vld [vmem:[%s1280_s30 + $0x8] sm:$0xff]   ;;  %v254_v6 = vmul.f32 %v252_v2, %v252_v2  ;;  %v759_v7 = vld [vmem:[%s1280_s30 + $0x10] sm:$0xff]   ;;  %618 = vmatprep.mubr.msk.bf16.mxu0 %vm982_vm0, %v981_v0  ;;  %s567_s8 = sshll.u32 %s245_s28, 3  ;;  %p1395_p0 = scmp.ne.s32.totalorder %s1384_s29, 0 }
  0x8d   : > { %603 = vmatpush3.bf16.msra.mxu0 %v757_v4  ;;  %v760_v8 = vld [vmem:[%s1280_s30 + $0x18] sm:$0xff]   ;;  %v761_v9 = vld [vmem:[%s1280_s30 + $0x20] sm:$0xff]   ;;  %v762_v10 = vld [vmem:[%s1280_s30 + $0x28] sm:$0xff]   ;;  %s247_s17 = scalar_lea.vmem [#allocation7], %s567_s8  ;;  %s1396_s7 = sld [smem:[#allocation13_spill]] (%p1395_p0) }
  0x8e   : > { %255 = vadd.xlane.f32.xlu0 %v253_v3  ;;  %604 = vmatprep.subr.bf16.mxu0 %v981_v0  ;;  %v763_v11 = vld [vmem:[%s1280_s30 + $0x30] sm:$0xff]   ;;  %v764_v12 = vld [vmem:[%s1280_s30 + $0x38] sm:$0xff]   ;;  %s622_s10 = smul.u32 (%p1395_p0), 6, %s959_s21  ;;  %s1397_s25 = sld [smem:[#allocation21_spill]] (%p1395_p0) }
  0x8f   : > { %v568_v20 = vld [vmem:[#allocation4] ss:$0 sm:$0xff] }
  0x91   : > { %605 = vmatpush3.bf16.msra.mxu0 %v758_v5 }
  0x92   : > { %257 = vadd.xlane.f32.xlu0 %v254_v6  ;;  %606 = vmatprep.subr.bf16.mxu0 %v981_v0 }
  0x93   : > { %s402_s20 = sadd.s32 (%p1395_p0), %s1396_s7, %s622_s10 }
  0x94   : > { %s582_s11 = sshll.u32 (%p1395_p0), %s402_s20, 2 }
  0x95   : > { %607 = vmatpush3.bf16.msra.mxu0 %v759_v7  ;;  %s404_s0 = scalar_lea.vmem (%p1395_p0), %s1397_s25, %s582_s11 }
  0x96   : > { %608 = vmatprep.subr.bf16.mxu0 %v981_v0 }
  0x99   : > { %609 = vmatpush3.bf16.msra.mxu0 %v760_v8 }
  0x9a   : > { %610 = vmatprep.subr.bf16.mxu0 %v981_v0 }
  0x9d   : > { %611 = vmatpush3.bf16.msra.mxu0 %v761_v9 }
  0x9e   : > { %612 = vmatprep.subr.bf16.mxu0 %v981_v0 }
  0xa1   : > { %613 = vmatpush3.bf16.msra.mxu0 %v762_v10 }
  0xa2   : > { %614 = vmatprep.subr.bf16.mxu0 %v981_v0 }
  0xa5   : > { %615 = vmatpush3.bf16.msra.mxu0 %v763_v11 }
  0xa6   : > { %616 = vmatprep.subr.bf16.mxu0 %v981_v0 }
  0xa9   : > { %617 = vmatpush3.bf16.msra.mxu0 %v764_v12 }
 0x11b   : > { %v256_v13 = vpop.xlane.xlu0 %255 }
 0x11c   : > { %v260_v14 = vmul.f32 0.0078125, %v256_v13 }
 0x11e   : > { %v262_v15 = vadd.f32 1e-06, %v260_v14 }
 0x11f   : > { %v258_v16 = vpop.xlane.xlu0 %257 }
 0x120   : > { %765 = vrsqrt.f32 %v262_v15  ;;  %v261_v17 = vmul.f32 0.0078125, %v258_v16 }
 0x122   : > { %v263_v18 = vadd.f32 1e-06, %v261_v17 }
 0x124   : > { %767 = vrsqrt.f32 %v263_v18 }
 0x12a   : > { %v766_v19 = vpop.eup %765 }
 0x12b   : > { %v273_v21 = vmul.f32 %v766_v19, %v568_v20 }
 0x12d   : > { %v275_v24 = vmul.f32 %v273_v21, %v251_v1 }
 0x12e   : > { %v768_v22 = vpop.eup %767 }
 0x12f   : > { %v274_v23 = vmul.f32 %v768_v22, %v568_v20 }
 0x131   : > { %v276_v25 = vmul.f32 %v274_v23, %v252_v2 }
 0x133   : > { %v277_v26 = vpack.c.bf16 %v276_v25, %v275_v24 }
 0x135   : > { %619 = vmatmul.mubr.bf16.vlgmr.msra.gmra.mrb[0].mxu0 %v277_v26 }
 0x207   : > { %399 = sbr.rel (!%p1395_p0) target bundleno = 534 (0x216), region = 48 }
 0x208   : > { %v376_v27 = vpop.f32.mrb[0].mxu0 }
 0x209   : > { %v620_v28 = vpop.f32.mrb[1].mxu0 }
 0x20a   : > { %v379_v29 = vpop.f32.mrb[2].mxu0 }
 0x20b   : > { %v591_v30 = vpack.c.bf16 %v379_v29, %v376_v27  ;;  %v621_v31 = vpop.f32.mrb[3].mxu0 }
 0x20d   : > { %592 = vst [vmem:[%s247_s17] sm:$0xff] %v591_v30  }
 0x214   : > { %v420_v32 = vld [vmem:[%s247_s17] sm:$0xf]  ;;  %v422_v33 = vld [vmem:[%s247_s17 + $0x4] sm:$0xf] }
 0x215   : > { %421 = vst [vmem:[%s404_s0] sm:$0xf] %v420_v32  ;;  %423 = vst [vmem:[%s404_s0 + $0xc] sm:$0xf] %v422_v33 }
 0x216 PF: > { %s17_s24 = sadd.s32 1, %s971_s24   ;;  %s1399_s21 = sld [smem:[#allocation11_spill]] }
 0x217   : > { %p1303_p1 = scmp.ge.s32.totalorder %s17_s24, 8   ;;  %s1400_s16 = sld [smem:[#allocation19_spill]] }
 0x218   : > { %s1401_s19 = sld [smem:[#allocation12_spill]]  ;;  %s1402_s9 = sld [smem:[#allocation18_spill]] }
 0x219   : > { %s1403_s20 = sld [smem:[#allocation14_spill]]  ;;  %s1404_s22 = sld [smem:[#allocation15_spill]] }
 0x21a   : > { %s1405_s3 = sld [smem:[#allocation16_spill]]  ;;  %s1406_s23 = sld [smem:[#allocation17_spill]] }
 0x21b   : > { %s1407_s12 = smov %s927_s13  ;;  %s1408_s13 = smov %s1187_s14 }
 0x21c   : > { %s1409_s14 = smov %s935_s15  ;;  %s1410_s15 = smov %s1399_s21 }
 0x21d   : > { %s1411_s17 = smov %s947_s18  ;;  %16 = sbr.rel (!%p1303_p1) target bundleno = 12 (0xc), region = 128 }
 0x21e   : > { %s1412_s18 = smov %s1401_s19  ;;  %s1413_s19 = smov %s1402_s9 }
 0x21f   : > { %s1414_s21 = smov %s1404_s22 }
 0x220   : > { %s1415_s22 = smov %s1405_s3 }
 0x224   :  { %460 = vsyncpa [#allocation3], 1 }
 0x225   :  { %462 = vsyncpa [#allocation3 + $0x1], 1 }
 0x226   :  { %463 = vsyncpa [#allocation5], 1 }

// kernel: transformer_block.6
= control target key start
LH: loop header
LB: loop body
LE: loop exit
PB: predicated region body
PF: predicated region fallthrough
CT: control target
= control target key end

     0   :  { %8 = vsyncpa [#allocation3], 0  ;;  %s942_s0 = inlined_call_operand.vmem [shape: bf16[32,128], index: 0, kind: input, shape index: {}]   ;;  %s943_s1 = inlined_call_operand.hbm [shape: bf16[128,128], index: 1, kind: input, shape index: {}]   ;;  %s944_s2 = inlined_call_operand.hbm [shape: f32[32,128], index: 2, kind: input, shape index: {}]   ;;  %s945_s3 = inlined_call_operand.vmem [shape: f32[32,128], index: 3, kind: output, shape index: {}]  }
   0x1   :  { %9 = vsyncpa [#allocation5], 0 }
   0x2   :  { %11 = vsyncpa [#allocation5 + $0x1], 0  ;;  %s771_s12 = smov 0   ;;  %s773_s13 = smov 0  }
   0x3   :  { %s775_s14 = smov 0   ;;  %s777_s15 = smov 0  }
   0x4   :  { %s779_s16 = smov 0   ;;  %s781_s17 = smov 0  }
   0x5 LB: > { %s492_s18 = sadd.s32 4294967295, %s741_s17   ;;  %p103_p0 = scmp.ne.s32.totalorder %s725_s13, %s721_s12  ;;  %s741_s17 = sphi %s781_s17, %s17_s17   ;;  %s737_s16 = sphi %s779_s16, %s962_s16   ;;  %s733_s15 = sphi %s777_s15, %s961_s15   ;;  %s729_s14 = sphi %s775_s14, %s960_s14   ;;  %s725_s13 = sphi %s773_s13, %s959_s13   ;;  %s721_s12 = sphi %s771_s12, %s958_s12  }
   0x6   : > { %p801_p1 = scmp.eq.s32.totalorder %s492_s18, 0  ;;  %p494_p2 = scmp.ge.s32.totalorder %s741_s17, 1 }
   0x7   : > { %p142_p3 = scmp.lt.s32.totalorder %s741_s17, 3  ;;  %s743_s22 = smov [#allocation2]  }
   0x8   : > { %s950_s19 = scalar_select %p801_p1, 1, 0 }
   0x9   : > { %p809_p4 = por %p801_p1, %p103_p0  ;;  %p813_p5 = pnand %p494_p2, %p142_p3 }
   0xa   : > { %s156_s23 = sshll.u32 %s743_s22, 4  ;;  %s29_s25 = sadd.s32 1, %s737_s16  ;;  %s157_s23 = int_to_ptr.vmem [resolvable:$true] %s156_s23 }
   0xb   : > { %s951_s20 = scalar_select %p809_p4, 1, 0 }
   0xc   : > { %s952_s21 = scalar_select %p813_p5, 1, 0 }
   0xd   : > { %p554_p6 = pneg %p813_p5  ;;  %s629_s28 = scalar_lea.hbm %s943_s1, 1024 }
   0xe   : > { %p630_p8 = scmp.ne.s32.totalorder %s943_s1, %s629_s28  ;;  %p636_p12 = scmp.lt.u32.totalorder %s629_s28, %s943_s1 }
   0xf   : > { %p821_p7 = pnand %p554_p6, %p801_p1 }
  0x11   : > { %p631_p9 = pneg %p821_p7 }
  0x13   : > { %p632_p10 = pnand %p631_p9, %p630_p8 }
  0x15   : > { %p633_p11 = pneg %p632_p10 }
  0x17   : > { %p638_p13 = pnand %p636_p12, %p633_p11 }
  0x19   : > { %641 = shalt.err (!%p638_p13)
}
  0x1a   : > { %s642_s6 = scalar_lea.vmem %s157_s23, 1024  ;;  %p650_p6 = scmp.lt.s32.totalorder %s157_s23, %s157_s23 }
  0x1b   : > { %p643_p0 = scmp.ne.s32.totalorder %s157_s23, %s642_s6  ;;  %p651_p4 = scmp.lt.s32.totalorder %s642_s6, %s642_s6 }
  0x1d   : > { %p645_p2 = pnand %p643_p0, %p631_p9  ;;  %p652_p1 = por %p651_p4, %p650_p6 }
  0x1f   : > { %p646_p3 = pneg %p645_p2 }
  0x21   : > { %p653_p5 = pnand %p652_p1, %p646_p3 }
  0x23   : > { %656 = shalt.err (!%p653_p5)
}
  0x24   : > { %s744_s7 = smov 64   ;;  %s745_s8 = smov 4  }
  0x25   : > { %557 = dma.hbm_to_vmem [thread:$0]  (!%p821_p7), %s943_s1, 1024, %s157_s23, [#allocation3], %s744_s7, %s744_s7, %s745_s8  }
  0x26   : > { %p31_p4 = scmp.ge.s32.totalorder %s29_s25, 2  ;;  %s90_s11 = sadd.s32 1, %s729_s14 }
  0x27   : > { %p97_p1 = scmp.ne.s32.totalorder %s729_s14, %s725_s13  ;;  %p98_p5 = scmp.eq.s32.totalorder %s741_s17, 0 }
  0x28   : > { %s964_s25 = smov (%p31_p4, %s29_s25), 0  ;;  %p563_p9 = scmp.lt.s32.totalorder %s741_s17, 2 }
  0x29   : > { %p99_p8 = por %p98_p5, %p97_p1  ;;  %s85_s12 = ssub.s32 %s737_s16, %s964_s25 }
  0x2a   : > { %s179_s18 = sand.u32 1, %s729_s14   ;;  %p88_p10 = scmp.eq.s32.totalorder %s85_s12, 0 }
  0x2b   : > { %s497_s22 = sshll.u32 %s179_s18, 4  ;;  %s518_s26 = sshll.u32 %s737_s16, 8 }
  0x2c   : > { %s854_s27 = scalar_select %p88_p10, %s729_s14, %s90_s11  }
  0x2d   : > { %s859_s23 = scalar_lea.hbm %s944_s2, %s518_s26  ;;  %s183_s29 = scalar_lea.vmem [#allocation4], %s497_s22 }
  0x2e   : > { %s191_s30 = sshll.u32 %s183_s29, 4  ;;  %p861_p7 = pnand %p563_p9, %p99_p8  ;;  %s865_s30 = int_to_ptr.vmem [resolvable:$true] %s191_s30 }
  0x2f   : > { %s867_s5 = scalar_lea.sflag [#allocation5], %s179_s18  ;;  %s657_s6 = scalar_lea.hbm %s859_s23, 256 }
  0x30   : > { %p658_p11 = scmp.ne.s32.totalorder %s859_s23, %s657_s6  ;;  %p659_p12 = pneg %p861_p7 }
  0x31   : > { %s662_s9 = scalar_lea.hbm %s944_s2, 512  ;;  %p663_p2 = scmp.lt.u32.totalorder %s859_s23, %s944_s2 }
  0x32   : > { %p660_p13 = pnand %p659_p12, %p658_p11  ;;  %p664_p3 = scmp.lt.u32.totalorder %s662_s9, %s657_s6 }
  0x33   : > { %p666_p4 = scmp.lt.u32.totalorder %s657_s6, %s859_s23 }
  0x34   : > { %p661_p0 = pneg %p660_p13  ;;  %p665_p6 = por %p664_p3, %p663_p2 }
  0x36   : > { %p667_p1 = por %p666_p4, %p665_p6 }
  0x38   : > { %p668_p5 = pnand %p667_p1, %p661_p0 }
  0x3a   : > { %671 = shalt.err (!%p668_p5)
}
  0x3b   : > { %s672_s12 = scalar_lea.vmem %s865_s30, 256  ;;  %s746_s18 = smov [#allocation4]  }
  0x3c   : > { %p673_p8 = scmp.ne.s32.totalorder %s865_s30, %s672_s12  ;;  %s677_s22 = sshll.u32 %s746_s18, 4  ;;  %s678_s22 = int_to_ptr.vmem [resolvable:$false] %s677_s22 }
  0x3d   : > { %s679_s26 = scalar_lea.vmem %s678_s22, 512  ;;  %p680_p11 = scmp.lt.s32.totalorder %s865_s30, %s678_s22 }
  0x3e   : > { %p675_p9 = pnand %p673_p8, %p659_p12  ;;  %p681_p13 = scmp.lt.s32.totalorder %s679_s26, %s672_s12 }
  0x40   : > { %p676_p10 = pneg %p675_p9  ;;  %p682_p2 = por %p681_p13, %p680_p11 }
  0x42   : > { %p683_p3 = pnand %p682_p2, %p676_p10 }
  0x44   : > { %686 = shalt.err (!%p683_p3)
}
  0x45   : > { %s747_s24 = smov 128   ;;  %s748_s28 = smov 8  }
  0x46   : > { %561 = dma.hbm_to_vmem [thread:$0]  (!%p861_p7), %s859_s23, 256, %s865_s30, %s867_s5, %s747_s24, %s747_s24, %s748_s28  }
  0x47   : > { %p955_p12 = scmp.ne.s32.totalorder %s952_s21, 0 }
  0x48   : > { %p956_p0 = scmp.ne.s32.totalorder (!%p955_p12), %s950_s19, 0 }
  0x49   : > { %203 = sbr.rel (%p955_p12) target bundleno = 335 (0x14f), region = 32 }
  0x50   : > { %712 = dma.done.wait (%p956_p0), [#allocation3], 1024  }
  0x51   : > { %714 = vsyncadd (%p956_p0), [#allocation3], 4294966272  ;;  %s209_s29 = sand.u32 1, %s725_s13   ;;  %p957_p6 = scmp.ne.s32.totalorder %s951_s20, 0 }
  0x52   : > { %s902_s6 = sshll.u32 %s209_s29, 4  ;;  %s210_s7 = scalar_lea.sflag [#allocation5], %s209_s29 }
  0x53   : > { %s213_s8 = scalar_lea.vmem [#allocation4], %s902_s6 }
  0x54   : > { %716 = dma.done.wait (%p957_p6), %s210_s7, 256  }
  0x55   : > { %718 = vsyncadd (%p957_p6), %s210_s7, 4294967040  ;;  %s503_s21 = sshll.u32 %s733_s15, 1  ;;  %v749_v0 = vmov 0.0   ;;  %vm750_vm0 = vmmov 0   ;;  %v620_v1 = vld [vmem:[#allocation2] sm:$0xff]   ;;  %v621_v2 = vld [vmem:[#allocation2 + $0x8] sm:$0xff]  }
  0x56   : > { %528 = vmatprep.subr.bf16.mxu0 %v749_v0  ;;  %544 = vmatprep.mubr.msk.bf16.mxu0 %vm750_vm0, %v749_v0  ;;  %p245_p7 = scmp.lt.s32.totalorder %s503_s21, 3  ;;  %v622_v3 = vld [vmem:[#allocation2 + $0x10] sm:$0xff]   ;;  %v623_v4 = vld [vmem:[#allocation2 + $0x18] sm:$0xff]   ;;  %v624_v5 = vld [vmem:[#allocation2 + $0x20] sm:$0xff]  }
  0x57   : > { %529 = vmatpush3.bf16.msra.mxu0 %v620_v1  ;;  %v625_v6 = vld [vmem:[#allocation2 + $0x28] sm:$0xff]   ;;  %v626_v7 = vld [vmem:[#allocation2 + $0x30] sm:$0xff]   ;;  %v627_v8 = vld [vmem:[#allocation2 + $0x38] sm:$0xff]  }
  0x58   : > { %s966_s21 = smov (!%p245_p7, %s503_s21), 3  ;;  %530 = vmatprep.subr.bf16.mxu0 %v749_v0  ;;  %v279_v10 = vld [vmem:[%s213_s8] sm:$0xff]  ;;  %v280_v12 = vld [vmem:[%s213_s8 + $0x8] sm:$0xff] }
  0x59   : > { %s504_s19 = sshll.u32 %s966_s21, 2  ;;  %s506_s30 = sshll.u32 %s966_s21, 3 }
  0x5a   : > { %s248_s15 = scalar_lea.vmem %s942_s0, %s504_s19  ;;  %s258_s9 = scalar_lea.vmem %s945_s3, %s506_s30 }
  0x5b   : > { %531 = vmatpush3.bf16.msra.mxu0 %v621_v2  ;;  %v628_v9 = vld [vmem:[%s248_s15] sm:$0xff]  }
  0x5c   : > { %532 = vmatprep.subr.bf16.mxu0 %v749_v0 }
  0x5f   : > { %533 = vmatpush3.bf16.msra.mxu0 %v622_v3 }
  0x60   : > { %534 = vmatprep.subr.bf16.mxu0 %v749_v0 }
  0x63   : > { %535 = vmatpush3.bf16.msra.mxu0 %v623_v4 }
  0x64   : > { %536 = vmatprep.subr.bf16.mxu0 %v749_v0 }
  0x67   : > { %537 = vmatpush3.bf16.msra.mxu0 %v624_v5 }
  0x68   : > { %538 = vmatprep.subr.bf16.mxu0 %v749_v0 }
  0x6b   : > { %539 = vmatpush3.bf16.msra.mxu0 %v625_v6 }
  0x6c   : > { %540 = vmatprep.subr.bf16.mxu0 %v749_v0 }
  0x6f   : > { %541 = vmatpush3.bf16.msra.mxu0 %v626_v7 }
  0x70   : > { %542 = vmatprep.subr.bf16.mxu0 %v749_v0 }
  0x73   : > { %543 = vmatpush3.bf16.msra.mxu0 %v627_v8 }
  0x76   : > { %545 = vmatmul.mubr.bf16.vlgmr.msra.gmra.mrb[0].mxu0 %v628_v9 }
 0x149   : > { %v369_v11 = vpop.f32.mrb[0].mxu0 }
 0x14a   : > { %v370_v13 = vadd.f32 %v369_v11, %v279_v10  ;;  %v546_v14 = vpop.f32.mrb[1].mxu0 }
 0x14b   : > { %v372_v15 = vpop.f32.mrb[2].mxu0 }
 0x14c   : > { %376 = vst [vmem:[%s258_s9] sm:$0xff] %v370_v13  ;;  %v373_v16 = vadd.f32 %v372_v15, %v280_v12  ;;  %v547_v17 = vpop.f32.mrb[3].mxu0 }
 0x14e   : > { %377 = vst [vmem:[%s258_s9 + $0x8] sm:$0xff] %v373_v16 }
 0x14f PF: > { %s17_s17 = sadd.s32 1, %s741_s17   ;;  %s958_s12 = smov %s725_s13 }
 0x150   : > { %p14_p4 = scmp.ge.s32.totalorder %s17_s17, 4   ;;  %s959_s13 = smov %s729_s14 }
 0x151   : > { %s960_s14 = smov %s854_s27  ;;  %s961_s15 = smov %s737_s16 }
 0x152   : > { %s962_s16 = smov %s964_s25  ;;  %16 = sbr.rel (!%p14_p4) target bundleno = 5 (0x5), region = 81 }
 0x159   :  { %406 = vsyncpa [#allocation3], 1 }
 0x15a   :  { %408 = vsyncpa [#allocation3 + $0x1], 1 }
 0x15b   :  { %409 = vsyncpa [#allocation5], 1 }
 0x15c   :  { %411 = vsyncpa [#allocation5 + $0x1], 1 }

// kernel: transformer_block.7
= control target key start
LH: loop header
LB: loop body
LE: loop exit
PB: predicated region body
PF: predicated region fallthrough
CT: control target
= control target key end

     0   :  { %s2112_s0 = inlined_call_operand.vmem [shape: f32[32,128], index: 0, kind: input, shape index: {}]   ;;  %s2113_s1 = inlined_call_operand.hbm [shape: f32[1,128], index: 1, kind: input, shape index: {}]   ;;  %s2114_s2 = inlined_call_operand.vmem [shape: bf16[128,512], index: 2, kind: input, shape index: {}]   ;;  %s2115_s3 = inlined_call_operand.vmem [shape: bf16[128,512], index: 3, kind: input, shape index: {}]   ;;  %s2116_s4 = inlined_call_operand.hbm [shape: bf16[512,128], index: 4, kind: input, shape index: {}]   ;;  %s2117_s5 = inlined_call_operand.hbm [shape: f32[32,128], index: 5, kind: output, shape index: {}]  }
   0x1   :  { %2127 = sst [smem:[#allocation20_spill]] %s2113_s1 }
   0x2   :  { %2128 = sst [smem:[#allocation21_spill]] %s2114_s2 }
   0x3   :  { %10 = vsyncpa [#allocation5], 0 }
   0x4   :  { %11 = vsyncpa [#allocation10], 0 }
   0x5   :  { %13 = vsyncpa [#allocation10 + $0x1], 0 }
   0x6   :  { %14 = vsyncpa [#allocation6], 0 }
   0x7   :  { %16 = vsyncpa [#allocation6 + $0x1], 0  ;;  %s1738_s18 = smov 0   ;;  %s1740_s19 = smov 0  }
   0x8   :  { %s1742_s20 = smov 0   ;;  %s1744_s21 = smov 0  }
   0x9   :  { %s1746_s22 = smov 0   ;;  %s1748_s23 = smov 0  }
   0xa   :  { %s1750_s24 = smov 0   ;;  %s1752_s25 = smov 0  }
   0xb   :  { %s1754_s26 = smov 0   ;;  %s1756_s27 = smov 0  }
   0xc   :  { %s1758_s28 = smov 0  }
   0xd LB: > { %2129 = sst [smem:[#allocation15_spill]] %s1693_s27  ;;  %s1213_s29 = sadd.s32 4294967295, %s1697_s28   ;;  %s1697_s28 = sphi %s1758_s28, %s22_s28   ;;  %s1693_s27 = sphi %s1756_s27, %s2155_s27   ;;  %s1689_s26 = sphi %s1754_s26, %s2163_s26   ;;  %s1685_s25 = sphi %s1752_s25, %s2153_s25   ;;  %s1681_s24 = sphi %s1750_s24, %s2162_s24   ;;  %s1677_s23 = sphi %s1748_s23, %s2161_s23   ;;  %s1673_s22 = sphi %s1746_s22, %s2160_s22   ;;  %s1669_s21 = sphi %s1744_s21, %s2159_s21   ;;  %s1665_s20 = sphi %s1742_s20, %s2158_s20   ;;  %s1661_s19 = sphi %s1740_s19, %s2157_s19   ;;  %s1657_s18 = sphi %s1738_s18, %s2156_s18  }
   0xe   : > { %s1214_s30 = sadd.s32 4294967294, %s1697_s28   ;;  %s31_s6 = sadd.s32 1, %s1689_s26 }
   0xf   : > { %s34_s7 = sadd.s32 1, %s1693_s27  ;;  %p32_p0 = scmp.ge.s32.totalorder %s31_s6, 2 }
  0x10   : > { %s88_s8 = sadd.s32 1, %s1677_s23  ;;  %p95_p1 = scmp.ne.s32.totalorder %s1677_s23, %s1673_s22 }
  0x11   : > { %p96_p2 = scmp.eq.s32.totalorder %s1697_s28, 0  ;;  %s2165_s6 = smov (%p32_p0, %s31_s6), 0 }
  0x12   : > { %2130 = sst [smem:[#allocation16_spill]] %s2165_s6  ;;  %s2167_s7 = smov (!%p32_p0, %s34_s7), %s1693_s27 }
  0x13   : > { %s85_s9 = ssub.s32 %s1689_s26, %s2165_s6  ;;  %p1804_p3 = por %p96_p2, %p95_p1 }
  0x14   : > { %p36_p4 = scmp.ge.s32.totalorder %s2167_s7, 2  ;;  %p86_p5 = scmp.eq.s32.totalorder %s85_s9, 0 }
  0x15   : > { %s2131_s10 = scalar_select %p1804_p3, 1, 0 }
  0x16   : > { %p153_p6 = scmp.ne.s32.totalorder %s1673_s22, %s1669_s21  ;;  %p1809_p7 = scmp.eq.s32.totalorder %s1213_s29, 0 }
  0x17   : > { %s2169_s7 = smov (%p36_p4, %s2167_s7), 0  ;;  %s166_s15 = sadd.s32 1, %s1665_s20 }
  0x18   : > { %s2132_s11 = scalar_select %p1809_p7, 1, 0 }
  0x19   : > { %2133 = sst [smem:[#allocation17_spill]] %s2169_s7  ;;  %p1820_p8 = por %p1809_p7, %p153_p6 }
  0x1a   : > { %s1816_s12 = scalar_select %p86_p5, %s1677_s23, %s88_s8  }
  0x1b   : > { %s2135_s13 = scalar_select %p1820_p8, 1, 0 }
  0x1c   : > { %2134 = sst [smem:[#allocation18_spill]] %s1816_s12  ;;  %s163_s14 = ssub.s32 %s1693_s27, %s2169_s7 }
  0x1d   : > { %p164_p9 = scmp.eq.s32.totalorder %s163_s14, 0  ;;  %p176_p10 = scmp.ne.s32.totalorder %s1665_s20, %s1661_s19 }
  0x1e   : > { %p177_p11 = scmp.eq.s32.totalorder %s1213_s29, 3  ;;  %p182_p13 = scmp.ne.s32.totalorder %s1661_s19, %s1657_s18 }
  0x1f   : > { %s1830_s16 = scalar_select %p164_p9, %s1665_s20, %s166_s15  }
  0x20   : > { %p1832_p12 = por %p177_p11, %p176_p10  ;;  %p183_p0 = scmp.eq.s32.totalorder %s1214_s30, 3 }
  0x21   : > { %2136 = sst [smem:[#allocation19_spill]] %s1830_s16  ;;  %p1215_p1 = scmp.ge.s32.totalorder %s1697_s28, 1 }
  0x22   : > { %s2137_s17 = scalar_select %p1832_p12, 1, 0 }
  0x23   : > { %p190_p2 = scmp.lt.s32.totalorder %s1697_s28, 5  ;;  %p1840_p4 = por %p183_p0, %p182_p13 }
  0x24   : > { %s1699_s29 = smov [#allocation4]   ;;  %s2141_s1 = sld [smem:[#allocation20_spill]] }
  0x25   : > { %s2138_s21 = scalar_select %p1840_p4, 1, 0 }
  0x26   : > { %p1844_p5 = pnand %p1215_p1, %p190_p2  ;;  %s203_s9 = sshll.u32 %s1699_s29, 4  ;;  %s204_s9 = int_to_ptr.vmem [resolvable:$true] %s203_s9 }
  0x28   : > { %s2139_s8 = scalar_select %p1844_p5, 1, 0 }
  0x29   : > { %p1325_p6 = pneg %p1844_p5 }
  0x2a   : > { %s1515_s7 = scalar_lea.hbm %s2141_s1, 16 }
  0x2b   : > { %p1852_p9 = pnand %p1325_p6, %p1809_p7  ;;  %p1516_p10 = scmp.ne.s32.totalorder %s2141_s1, %s1515_s7 }
  0x2c   : > { %p1522_p1 = scmp.lt.u32.totalorder %s1515_s7, %s2141_s1 }
  0x2d   : > { %p1517_p11 = pneg %p1852_p9 }
  0x2f   : > { %p1518_p13 = pnand %p1517_p11, %p1516_p10 }
  0x31   : > { %p1519_p0 = pneg %p1518_p13 }
  0x33   : > { %p1524_p2 = pnand %p1522_p1, %p1519_p0 }
  0x35   : > { %1527 = shalt.err (!%p1524_p2)
}
  0x36   : > { %s1528_s16 = scalar_lea.vmem %s204_s9, 16  ;;  %s1535_s30 = scalar_lea.vmem %s204_s9, 32 }
  0x37   : > { %p1529_p6 = scmp.ne.s32.totalorder %s204_s9, %s1528_s16  ;;  %p1536_p8 = scmp.lt.s32.totalorder %s204_s9, %s204_s9 }
  0x38   : > { %p1537_p7 = scmp.lt.s32.totalorder %s1535_s30, %s1528_s16 }
  0x39   : > { %p1531_p4 = pnand %p1529_p6, %p1517_p11 }
  0x3a   : > { %p1538_p5 = por %p1537_p7, %p1536_p8 }
  0x3b   : > { %p1532_p12 = pneg %p1531_p4 }
  0x3d   : > { %p1539_p3 = pnand %p1538_p5, %p1532_p12 }
  0x3f   : > { %1542 = shalt.err (!%p1539_p3)
}
  0x40   : > { %1328 = dma.hbm_to_vmem [thread:$0]  (!%p1852_p9), %s2141_s1, 16, %s204_s9, [#allocation5]  }
  0x41   : > { %p1217_p10 = scmp.ge.s32.totalorder %s1697_s28, 4 }
  0x42   : > { %p2142_p13 = scmp.ne.s32.totalorder (!%p1217_p10), %s2131_s10, 0 }
  0x43   : > { %210 = sbr.rel (%p1217_p10) target bundleno = 132 (0x84), region = 20 }
  0x4a   : > { %222 = sbr.rel (!%p2142_p13) target bundleno = 92 (0x5c), region = 28  ;;  %s224_s7 = sand.u32 (%p2142_p13), 1, %s1677_s23  }
  0x4b   : > { %s1291_s12 = sshll.u32 (%p2142_p13), %s1689_s26, 3  ;;  %s1218_s16 = sshll.u32 (%p2142_p13), %s224_s7, 7 }
  0x4c   : > { %s2143_s2 = sld [smem:[#allocation21_spill]] (%p2142_p13)  ;;  %s226_s9 = scalar_lea.vmem (%p2142_p13), [#allocation7], %s1218_s16 }
  0x52   : > { %s1880_s30 = scalar_lea.vmem %s2143_s2, %s1291_s12 }
  0x53   : > { %v287_v0 = vld [vmem:[%s1880_s30] sm:$0xff]  ;;  %v289_v1 = vld [vmem:[%s1880_s30 + $0x10] sm:$0xff] }
  0x54   : > { %v291_v2 = vld [vmem:[%s1880_s30 + $0x20] sm:$0xff]  ;;  %288 = vst [vmem:[%s226_s9] sm:$0xff] %v287_v0  ;;  %290 = vst [vmem:[%s226_s9 + $0x8] sm:$0xff] %v289_v1  ;;  %v293_v3 = vld [vmem:[%s1880_s30 + $0x30] sm:$0xff] }
  0x55   : > { %292 = vst [vmem:[%s226_s9 + $0x10] sm:$0xff] %v291_v2  ;;  %v295_v4 = vld [vmem:[%s1880_s30 + $0x40] sm:$0xff]  ;;  %v297_v5 = vld [vmem:[%s1880_s30 + $0x50] sm:$0xff]  ;;  %294 = vst [vmem:[%s226_s9 + $0x18] sm:$0xff] %v293_v3 }
  0x56   : > { %296 = vst [vmem:[%s226_s9 + $0x20] sm:$0xff] %v295_v4  ;;  %298 = vst [vmem:[%s226_s9 + $0x28] sm:$0xff] %v297_v5  ;;  %v299_v6 = vld [vmem:[%s1880_s30 + $0x60] sm:$0xff]  ;;  %v301_v7 = vld [vmem:[%s1880_s30 + $0x70] sm:$0xff] }
  0x57   : > { %v303_v8 = vld [vmem:[%s1880_s30 + $0x80] sm:$0xff]  ;;  %300 = vst [vmem:[%s226_s9 + $0x30] sm:$0xff] %v299_v6  ;;  %302 = vst [vmem:[%s226_s9 + $0x38] sm:$0xff] %v301_v7  ;;  %v305_v9 = vld [vmem:[%s1880_s30 + $0x90] sm:$0xff] }
  0x58   : > { %304 = vst [vmem:[%s226_s9 + $0x40] sm:$0xff] %v303_v8  ;;  %v307_v10 = vld [vmem:[%s1880_s30 + $0xa0] sm:$0xff]  ;;  %v309_v11 = vld [vmem:[%s1880_s30 + $0xb0] sm:$0xff]  ;;  %306 = vst [vmem:[%s226_s9 + $0x48] sm:$0xff] %v305_v9 }
  0x59   : > { %308 = vst [vmem:[%s226_s9 + $0x50] sm:$0xff] %v307_v10  ;;  %310 = vst [vmem:[%s226_s9 + $0x58] sm:$0xff] %v309_v11  ;;  %v311_v12 = vld [vmem:[%s1880_s30 + $0xc0] sm:$0xff]  ;;  %v313_v13 = vld [vmem:[%s1880_s30 + $0xd0] sm:$0xff] }
  0x5a   : > { %v315_v14 = vld [vmem:[%s1880_s30 + $0xe0] sm:$0xff]  ;;  %312 = vst [vmem:[%s226_s9 + $0x60] sm:$0xff] %v311_v12  ;;  %314 = vst [vmem:[%s226_s9 + $0x68] sm:$0xff] %v313_v13  ;;  %v317_v15 = vld [vmem:[%s1880_s30 + $0xf0] sm:$0xff] }
  0x5b   : > { %316 = vst [vmem:[%s226_s9 + $0x70] sm:$0xff] %v315_v14  ;;  %318 = vst [vmem:[%s226_s9 + $0x78] sm:$0xff] %v317_v15 }
  0x5c PF: > { %p2144_p3 = scmp.ne.s32.totalorder %s2131_s10, 0 }
  0x5d   : > { %s326_s14 = sand.u32 (%p2144_p3), 1, %s1677_s23   ;;  %s1292_s27 = sshll.u32 (%p2144_p3), %s1689_s26, 3 }
  0x5e   : > { %324 = sbr.rel (!%p2144_p3) target bundleno = 105 (0x69), region = 66  ;;  %s1221_s6 = sshll.u32 (%p2144_p3), %s326_s14, 7 }
  0x5f   : > { %s1905_s16 = scalar_lea.vmem (%p2144_p3), %s2115_s3, %s1292_s27  ;;  %s328_s15 = scalar_lea.vmem (%p2144_p3), [#allocation8], %s1221_s6 }
  0x60   : > { %v389_v16 = vld [vmem:[%s1905_s16] sm:$0xff] (%p2144_p3)  ;;  %v391_v17 = vld [vmem:[%s1905_s16 + $0x10] sm:$0xff] (%p2144_p3) }
  0x61   : > { %v393_v18 = vld [vmem:[%s1905_s16 + $0x20] sm:$0xff] (%p2144_p3)  ;;  %390 = vst [vmem:[%s328_s15] sm:$0xff] (%p2144_p3), %v389_v16  ;;  %392 = vst [vmem:[%s328_s15 + $0x8] sm:$0xff] (%p2144_p3), %v391_v17  ;;  %v395_v19 = vld [vmem:[%s1905_s16 + $0x30] sm:$0xff] (%p2144_p3) }
  0x62   : > { %394 = vst [vmem:[%s328_s15 + $0x10] sm:$0xff] (%p2144_p3), %v393_v18  ;;  %v397_v20 = vld [vmem:[%s1905_s16 + $0x40] sm:$0xff] (%p2144_p3)  ;;  %v399_v21 = vld [vmem:[%s1905_s16 + $0x50] sm:$0xff] (%p2144_p3)  ;;  %396 = vst [vmem:[%s328_s15 + $0x18] sm:$0xff] (%p2144_p3), %v395_v19 }
  0x63   : > { %398 = vst [vmem:[%s328_s15 + $0x20] sm:$0xff] (%p2144_p3), %v397_v20  ;;  %400 = vst [vmem:[%s328_s15 + $0x28] sm:$0xff] (%p2144_p3), %v399_v21  ;;  %v401_v22 = vld [vmem:[%s1905_s16 + $0x60] sm:$0xff] (%p2144_p3)  ;;  %v403_v23 = vld [vmem:[%s1905_s16 + $0x70] sm:$0xff] (%p2144_p3) }
  0x64   : > { %v405_v24 = vld [vmem:[%s1905_s16 + $0x80] sm:$0xff] (%p2144_p3)  ;;  %402 = vst [vmem:[%s328_s15 + $0x30] sm:$0xff] (%p2144_p3), %v401_v22  ;;  %404 = vst [vmem:[%s328_s15 + $0x38] sm:$0xff] (%p2144_p3), %v403_v23  ;;  %v407_v25 = vld [vmem:[%s1905_s16 + $0x90] sm:$0xff] (%p2144_p3) }
  0x65   : > { %406 = vst [vmem:[%s328_s15 + $0x40] sm:$0xff] %v405_v24  ;;  %v409_v26 = vld [vmem:[%s1905_s16 + $0xa0] sm:$0xff]  ;;  %v411_v27 = vld [vmem:[%s1905_s16 + $0xb0] sm:$0xff]  ;;  %408 = vst [vmem:[%s328_s15 + $0x48] sm:$0xff] %v407_v25 }
  0x66   : > { %410 = vst [vmem:[%s328_s15 + $0x50] sm:$0xff] %v409_v26  ;;  %412 = vst [vmem:[%s328_s15 + $0x58] sm:$0xff] %v411_v27  ;;  %v413_v28 = vld [vmem:[%s1905_s16 + $0xc0] sm:$0xff]  ;;  %v415_v29 = vld [vmem:[%s1905_s16 + $0xd0] sm:$0xff] }
  0x67   : > { %v417_v30 = vld [vmem:[%s1905_s16 + $0xe0] sm:$0xff]  ;;  %414 = vst [vmem:[%s328_s15 + $0x60] sm:$0xff] %v413_v28  ;;  %416 = vst [vmem:[%s328_s15 + $0x68] sm:$0xff] %v415_v29  ;;  %v419_v31 = vld [vmem:[%s1905_s16 + $0xf0] sm:$0xff] }
  0x68   : > { %418 = vst [vmem:[%s328_s15 + $0x70] sm:$0xff] %v417_v30  ;;  %420 = vst [vmem:[%s328_s15 + $0x78] sm:$0xff] %v419_v31 }
  0x69 PF: > { %s427_s29 = sand.u32 1, %s1677_s23   ;;  %s1293_s30 = sshll.u32 %s1689_s26, 11 }
  0x6a   : > { %s1224_s9 = sshll.u32 %s427_s29, 7  ;;  %s1928_s6 = scalar_lea.hbm %s2116_s4, %s1293_s30 }
  0x6b   : > { %s431_s7 = scalar_lea.vmem [#allocation9], %s1224_s9  ;;  %s1932_s16 = scalar_lea.sflag [#allocation10], %s427_s29 }
  0x6c   : > { %s438_s12 = sshll.u32 %s431_s7, 4  ;;  %s1543_s15 = scalar_lea.hbm %s1928_s6, 2048  ;;  %s1930_s12 = int_to_ptr.vmem [resolvable:$true] %s438_s12 }
  0x6d   : > { %p1544_p7 = scmp.ne.s32.totalorder %s1928_s6, %s1543_s15  ;;  %p2145_p8 = scmp.ne.s32.totalorder %s2131_s10, 0 }
  0x6e   : > { %s1547_s30 = scalar_lea.hbm %s2116_s4, 4096  ;;  %p1548_p5 = scmp.lt.u32.totalorder %s1928_s6, %s2116_s4 }
  0x6f   : > { %p1545_p12 = pnand %p1544_p7, %p2145_p8  ;;  %p1549_p9 = scmp.lt.u32.totalorder %s1547_s30, %s1543_s15 }
  0x70   : > { %p1551_p0 = scmp.lt.u32.totalorder %s1543_s15, %s1928_s6 }
  0x71   : > { %p1546_p4 = pneg %p1545_p12  ;;  %p1550_p11 = por %p1549_p9, %p1548_p5 }
  0x73   : > { %p1552_p1 = por %p1551_p0, %p1550_p11 }
  0x75   : > { %p1553_p2 = pnand %p1552_p1, %p1546_p4 }
  0x77   : > { %1556 = shalt.err (!%p1553_p2)
}
  0x78   : > { %s1557_s29 = scalar_lea.vmem %s1930_s12, 2048  ;;  %s1700_s1 = smov [#allocation9]  }
  0x79   : > { %p1558_p6 = scmp.ne.s32.totalorder %s1930_s12, %s1557_s29  ;;  %s1561_s2 = sshll.u32 %s1700_s1, 4  ;;  %s1562_s2 = int_to_ptr.vmem [resolvable:$false] %s1561_s2 }
  0x7a   : > { %s1563_s9 = scalar_lea.vmem %s1562_s2, 4096  ;;  %p1564_p3 = scmp.lt.s32.totalorder %s1930_s12, %s1562_s2 }
  0x7b   : > { %p1559_p10 = pnand %p1558_p6, %p2145_p8  ;;  %p1565_p7 = scmp.lt.s32.totalorder %s1563_s9, %s1557_s29 }
  0x7d   : > { %p1560_p13 = pneg %p1559_p10  ;;  %p1566_p12 = por %p1565_p7, %p1564_p3 }
  0x7f   : > { %p1567_p5 = pnand %p1566_p12, %p1560_p13 }
  0x81   : > { %1570 = shalt.err (!%p1567_p5)
}
  0x82   : > { %s1701_s7 = smov 64   ;;  %s1702_s15 = smov 4  }
  0x83   : > { %1319 = dma.hbm_to_vmem [thread:$0]  (%p2145_p8), %s1928_s6, 2048, %s1930_s12, %s1932_s16, %s1701_s7, %s1701_s7, %s1702_s15  }
  0x84 PF: > { %p2146_p4 = scmp.ne.s32.totalorder %s2139_s8, 0 }
  0x85   : > { %p2147_p9 = scmp.ne.s32.totalorder (!%p2146_p4), %s2132_s11, 0 }
  0x86   : > { %450 = sbr.rel (%p2146_p4) target bundleno = 864 (0x360), region = 108 }
  0x8d   : > { %1644 = dma.done.wait (%p2147_p9), [#allocation5], 16  }
  0x8e   : > { %1646 = vsyncadd (%p2147_p9), [#allocation5], 4294967280  ;;  %s457_s30 = sand.u32 1, %s1673_s22   ;;  %p2148_p8 = scmp.ne.s32.totalorder %s2135_s13, 0 }
  0x8f   : > { %s1229_s14 = sshll.u32 %s457_s30, 7  ;;  %s471_s10 = scalar_lea.sflag [#allocation10], %s457_s30 }
  0x90   : > { %s1963_s27 = scalar_lea.vmem [#allocation7], %s1229_s14  ;;  %s1965_s29 = scalar_lea.vmem [#allocation8], %s1229_s14 }
  0x91   : > { %s1967_s6 = scalar_lea.vmem [#allocation9], %s1229_s14 }
  0x92   : > { %1648 = dma.done.wait (%p2148_p8), %s471_s10, 2048  }
  0x93   : > { %1650 = vsyncadd (%p2148_p8), %s471_s10, 4294965248  ;;  %s511_s11 = sand.u32 1, %s1661_s19   ;;  %s1233_s8 = sshll.u32 %s1685_s25, 1 }
  0x94   : > { %s1232_s12 = sshll.u32 %s511_s11, 4  ;;  %p515_p11 = scmp.lt.s32.totalorder %s1233_s8, 3 }
  0x95   : > { %s1982_s7 = scalar_lea.vmem [#allocation11], %s1232_s12  ;;  %p1235_p0 = scmp.ne.s32.totalorder %s1681_s24, 0 }
  0x96   : > { %s2171_s8 = smov (!%p515_p11, %s1233_s8), 3  ;;  %v1703_v36 = vmov (!%p1235_p0), 0.0   ;;  %v1236_v44 = vld [vmem:[#allocation4] ss:$0 sm:$0xff] (!%p1235_p0) }
  0x97   : > { %s1234_s16 = sshll.u32 %s2171_s8, 3  ;;  %528 = sbr.rel (%p1235_p0) target bundleno = 324 (0x144), region = 128  ;;  %557 = vst [vmem:[#allocation3] sm:$0xff] (!%p1235_p0), %v1703_v36  ;;  %558 = vst [vmem:[#allocation3 + $0x8] sm:$0xff] (!%p1235_p0), %v1703_v36 }
  0x98   : > { %s1980_s9 = scalar_lea.vmem %s2112_s0, %s1234_s16 }
  0x99   : > { %v529_v32 = vld [vmem:[%s1980_s9] sm:$0xff] (!%p1235_p0)  ;;  %v530_v33 = vld [vmem:[%s1980_s9 + $0x8] sm:$0xff] (!%p1235_p0) }
  0x9a   : > { %v531_v34 = vmul.f32 (!%p1235_p0), %v529_v32, %v529_v32  ;;  %v532_v35 = vmul.f32 (!%p1235_p0), %v530_v33, %v530_v33 }
  0x9c   : > { %533 = vadd.xlane.f32.xlu0 (!%p1235_p0), %v531_v34 }
  0xa0   : > { %535 = vadd.xlane.f32.xlu0 %v532_v35 }
 0x129   : > { %v534_v37 = vpop.xlane.xlu0 %533 }
 0x12a   : > { %v538_v38 = vmul.f32 0.0078125, %v534_v37 }
 0x12c   : > { %v540_v39 = vadd.f32 1e-06, %v538_v38 }
 0x12d   : > { %v536_v40 = vpop.xlane.xlu0 %535 }
 0x12e   : > { %1431 = vrsqrt.f32 %v540_v39  ;;  %v539_v41 = vmul.f32 0.0078125, %v536_v40 }
 0x130   : > { %v541_v42 = vadd.f32 1e-06, %v539_v41 }
 0x132   : > { %1433 = vrsqrt.f32 %v541_v42 }
 0x138   : > { %v1432_v43 = vpop.eup %1431 }
 0x139   : > { %v551_v45 = vmul.f32 %v1432_v43, %v1236_v44 }
 0x13b   : > { %v553_v48 = vmul.f32 %v551_v45, %v529_v32 }
 0x13c   : > { %v1434_v46 = vpop.eup %1433 }
 0x13d   : > { %v552_v47 = vmul.f32 %v1434_v46, %v1236_v44 }
 0x13f   : > { %v554_v49 = vmul.f32 %v552_v47, %v530_v33 }
 0x141   : > { %v555_v50 = vpack.c.bf16 %v554_v49, %v553_v48 }
 0x143   : > { %556 = vst [vmem:[#allocation2] sm:$0xff] %v555_v50 }
 0x144 PF: > { %v1435_v51 = vld [vmem:[%s1963_s27 + $0x4] ss:$8 sps:$4 sm:$0xff]   ;;  %v1437_v52 = vld [vmem:[%s1963_s27] ss:$8 sps:$4 sm:$0xff]   ;;  %v1704_v53 = vmov 0   ;;  %v1487_v25 = vld [vmem:[%s1967_s6 + $0x50] sm:$0xff]  }
 0x145   : > { %688 = vmatprep.mubr.bf16.mxu0 %v1704_v53  ;;  %827 = vmatprep.mubr.bf16.mxu1 %v1704_v53  ;;  %v1438_v54 = vld [vmem:[%s1963_s27 + $0x14] ss:$8 sps:$4 sm:$0xff]   ;;  %v1440_v55 = vld [vmem:[%s1963_s27 + $0x10] ss:$8 sps:$4 sm:$0xff]   ;;  %v1441_v56 = vld [vmem:[%s1963_s27 + $0x24] ss:$8 sps:$4 sm:$0xff]  }
 0x146   : > { %656 = vmatprep.subr.bf16.mxu0 %v1435_v51  ;;  %v1443_v57 = vld [vmem:[%s1963_s27 + $0x20] ss:$8 sps:$4 sm:$0xff]   ;;  %v1444_v58 = vld [vmem:[%s1963_s27 + $0x34] ss:$8 sps:$4 sm:$0xff]   ;;  %v1456_v59 = vld [vmem:[%s1965_s29 + $0x4] ss:$8 sps:$4 sm:$0xff]  }
 0x147   : > { %657 = vmatpush1.bf16.msra.mxu0 %v1437_v52  ;;  %v1446_v60 = vld [vmem:[%s1963_s27 + $0x30] ss:$8 sps:$4 sm:$0xff]   ;;  %v1447_v61 = vld [vmem:[%s1963_s27 + $0x44] ss:$8 sps:$4 sm:$0xff]   ;;  %v1460_v62 = vld [vmem:[%s1965_s29] ss:$8 sps:$4 sm:$0xff]   ;;  %795 = vmatprep.subr.bf16.mxu1 %v1456_v59 }
 0x148   : > { %658 = vmatprep.subr.bf16.mxu0 %v1438_v54  ;;  %v1462_v63 = vld [vmem:[%s1965_s29 + $0x14] ss:$8 sps:$4 sm:$0xff]   ;;  %796 = vmatpush1.bf16.msra.mxu1 %v1460_v62  ;;  %v1464_v0 = vld [vmem:[%s1965_s29 + $0x10] ss:$8 sps:$4 sm:$0xff]   ;;  %v1465_v1 = vld [vmem:[%s1965_s29 + $0x24] ss:$8 sps:$4 sm:$0xff]  }
 0x149   : > { %797 = vmatprep.subr.bf16.mxu1 %v1462_v63  ;;  %v1449_v2 = vld [vmem:[%s1963_s27 + $0x40] ss:$8 sps:$4 sm:$0xff]   ;;  %v1450_v3 = vld [vmem:[%s1963_s27 + $0x54] ss:$8 sps:$4 sm:$0xff]   ;;  %v1452_v6 = vld [vmem:[%s1963_s27 + $0x50] ss:$8 sps:$4 sm:$0xff]  }
 0x14a   : > { %v1467_v4 = vld [vmem:[%s1965_s29 + $0x20] ss:$8 sps:$4 sm:$0xff]   ;;  %v1468_v5 = vld [vmem:[%s1965_s29 + $0x34] ss:$8 sps:$4 sm:$0xff]   ;;  %v1453_v7 = vld [vmem:[%s1963_s27 + $0x64] ss:$8 sps:$4 sm:$0xff]  }
 0x14b   : > { %659 = vmatpush1.bf16.msra.mxu0 %v1440_v55  ;;  %v1455_v8 = vld [vmem:[%s1963_s27 + $0x60] ss:$8 sps:$4 sm:$0xff]   ;;  %v1470_v9 = vld [vmem:[%s1965_s29 + $0x30] ss:$8 sps:$4 sm:$0xff]   ;;  %v1471_v10 = vld [vmem:[%s1965_s29 + $0x44] ss:$8 sps:$4 sm:$0xff]  }
 0x14c   : > { %660 = vmatprep.subr.bf16.mxu0 %v1441_v56  ;;  %798 = vmatpush1.bf16.msra.mxu1 %v1464_v0  ;;  %v1458_v11 = vld [vmem:[%s1963_s27 + $0x74] ss:$8 sps:$4 sm:$0xff]   ;;  %v1473_v12 = vld [vmem:[%s1965_s29 + $0x40] ss:$8 sps:$4 sm:$0xff]   ;;  %v1461_v14 = vld [vmem:[%s1963_s27 + $0x70] ss:$8 sps:$4 sm:$0xff]  }
 0x14d   : > { %799 = vmatprep.subr.bf16.mxu1 %v1465_v1  ;;  %v1474_v13 = vld [vmem:[%s1965_s29 + $0x54] ss:$8 sps:$4 sm:$0xff]   ;;  %v1476_v15 = vld [vmem:[%s1965_s29 + $0x50] ss:$8 sps:$4 sm:$0xff]   ;;  %v1477_v16 = vld [vmem:[%s1965_s29 + $0x64] ss:$8 sps:$4 sm:$0xff]  }
 0x14e   : > { %v559_v17 = vld [vmem:[#allocation2] sm:$0xff]  ;;  %v1480_v19 = vld [vmem:[%s1965_s29 + $0x74] ss:$8 sps:$4 sm:$0xff]   ;;  %v1482_v20 = vld [vmem:[%s1965_s29 + $0x70] ss:$8 sps:$4 sm:$0xff]   ;;  %p1285_p1 = scmp.ne.s32.totalorder %s1681_s24, 1 }
 0x14f   : > { %661 = vmatpush1.bf16.msra.mxu0 %v1443_v57  ;;  %v1479_v18 = vld [vmem:[%s1965_s29 + $0x60] ss:$8 sps:$4 sm:$0xff]   ;;  %v1488_v26 = vld [vmem:[%s1967_s6 + $0x10] sm:$0xff]   ;;  %v1489_v27 = vld [vmem:[%s1967_s6 + $0x58] sm:$0xff]  }
 0x150   : > { %662 = vmatprep.subr.bf16.mxu0 %v1444_v58  ;;  %800 = vmatpush1.bf16.msra.mxu1 %v1467_v4  ;;  %v1483_v21 = vld [vmem:[%s1967_s6 + $0x40] sm:$0xff]   ;;  %v1485_v23 = vld [vmem:[%s1967_s6 + $0x48] sm:$0xff]   ;;  %v1490_v28 = vld [vmem:[%s1967_s6 + $0x18] sm:$0xff]  }
 0x151   : > { %801 = vmatprep.subr.bf16.mxu1 %v1468_v5  ;;  %v1484_v22 = vld [vmem:[%s1967_s6] sm:$0xff]   ;;  %v1486_v24 = vld [vmem:[%s1967_s6 + $0x8] sm:$0xff]   ;;  %v1495_v33 = vld [vmem:[%s1967_s6 + $0x70] sm:$0xff]  }
 0x152   : > { %v1491_v29 = vld [vmem:[%s1967_s6 + $0x60] sm:$0xff]   ;;  %v1493_v31 = vld [vmem:[%s1967_s6 + $0x68] sm:$0xff]   ;;  %v1496_v34 = vld [vmem:[%s1967_s6 + $0x30] sm:$0xff]  }
 0x153   : > { %663 = vmatpush1.bf16.msra.mxu0 %v1446_v60  ;;  %v1492_v30 = vld [vmem:[%s1967_s6 + $0x20] sm:$0xff]   ;;  %v1494_v32 = vld [vmem:[%s1967_s6 + $0x28] sm:$0xff]   ;;  %v1497_v35 = vld [vmem:[%s1967_s6 + $0x78] sm:$0xff]  }
 0x154   : > { %664 = vmatprep.subr.bf16.mxu0 %v1447_v61  ;;  %802 = vmatpush1.bf16.msra.mxu1 %v1470_v9  ;;  %v1498_v36 = vld [vmem:[%s1967_s6 + $0x38] sm:$0xff]  }
 0x155   : > { %803 = vmatprep.subr.bf16.mxu1 %v1471_v10 }
 0x157   : > { %665 = vmatpush1.bf16.msra.mxu0 %v1449_v2 }
 0x158   : > { %666 = vmatprep.subr.bf16.mxu0 %v1450_v3  ;;  %804 = vmatpush1.bf16.msra.mxu1 %v1473_v12  ;;  %v862_v12 = vld [vmem:[#allocation3] sm:$0xff] }
 0x159   : > { %805 = vmatprep.subr.bf16.mxu1 %v1474_v13 }
 0x15b   : > { %667 = vmatpush1.bf16.msra.mxu0 %v1452_v6 }
 0x15c   : > { %668 = vmatprep.subr.bf16.mxu0 %v1453_v7  ;;  %806 = vmatpush1.bf16.msra.mxu1 %v1476_v15 }
 0x15d   : > { %807 = vmatprep.subr.bf16.mxu1 %v1477_v16  ;;  %v863_v16 = vld [vmem:[#allocation3 + $0x8] sm:$0xff] }
 0x15f   : > { %669 = vmatpush1.bf16.msra.mxu0 %v1455_v8 }
 0x160   : > { %670 = vmatprep.subr.bf16.mxu0 %v1458_v11  ;;  %808 = vmatpush1.bf16.msra.mxu1 %v1479_v18 }
 0x161   : > { %809 = vmatprep.subr.bf16.mxu1 %v1480_v19 }
 0x163   : > { %671 = vmatpush1.bf16.msra.mxu0 %v1461_v14 }
 0x164   : > { %810 = vmatpush1.bf16.msra.mxu1 %v1482_v20  ;;  %1295 = vmatprep.subr.bf16.mxu0 %v1483_v21 }
 0x166   : > { %689 = vmatmul.mubr.bf16.vlgmr.msra.gmra.mrb[0].mxu0 %v559_v17 }
 0x167   : > { %828 = vmatmul.mubr.bf16.vlgmr.msra.gmra.mrb[0].mxu1 %v559_v17  ;;  %1296 = vmatpush3.bf16.msra.mxu0 %v1484_v22  ;;  %v1049_v22 = vld [vmem:[%s1980_s9] sm:$0xff] (!%p1285_p1) }
 0x168   : > { %1297 = vmatprep.subr.bf16.mxu0 %v1485_v23 }
 0x16b   : > { %1298 = vmatpush3.bf16.msra.mxu0 %v1486_v24 }
 0x16c   : > { %1299 = vmatprep.subr.bf16.mxu0 %v1487_v25  ;;  %v1050_v25 = vld [vmem:[%s1980_s9 + $0x8] sm:$0xff] (!%p1285_p1) }
 0x16f   : > { %1300 = vmatpush3.bf16.msra.mxu0 %v1488_v26 }
 0x170   : > { %1301 = vmatprep.subr.bf16.mxu0 %v1489_v27 }
 0x173   : > { %1302 = vmatpush3.bf16.msra.mxu0 %v1490_v28 }
 0x174   : > { %1303 = vmatprep.subr.bf16.mxu0 %v1491_v29 }
 0x177   : > { %1304 = vmatpush3.bf16.msra.mxu0 %v1492_v30 }
 0x178   : > { %1305 = vmatprep.subr.bf16.mxu0 %v1493_v31 }
 0x17b   : > { %1306 = vmatpush3.bf16.msra.mxu0 %v1494_v32 }
 0x17c   : > { %1307 = vmatprep.subr.bf16.mxu0 %v1495_v33 }
 0x17f   : > { %1308 = vmatpush3.bf16.msra.mxu0 %v1496_v34 }
 0x180   : > { %1309 = vmatprep.subr.bf16.mxu0 %v1497_v35 }
 0x183   : > { %1310 = vmatpush3.bf16.msra.mxu0 %v1498_v36 }
 0x239   : > { %v690_v37 = vpop.f32.mrb[0].mxu0 }
 0x23a   : > { %v838_v38 = vsub.f32 0.0, %v690_v37  ;;  %v692_v39 = vpop.f32.mrb[1].mxu0  ;;  %v829_v49 = vpop.f32.mrb[0].mxu1 }
 0x23b   : > { %v839_v40 = vsub.f32 0.0, %v692_v39  ;;  %v694_v41 = vpop.f32.mrb[2].mxu0  ;;  %v831_v50 = vpop.f32.mrb[1].mxu1 }
 0x23c   : > { %v842_v42 = vmul.f32 1.442695, %v838_v38  ;;  %v840_v43 = vsub.f32 0.0, %v694_v41  ;;  %v696_v44 = vpop.f32.mrb[3].mxu0  ;;  %v833_v51 = vpop.f32.mrb[2].mxu1 }
 0x23d   : > { %v844_v45 = vmul.f32 1.442695, %v839_v40  ;;  %v841_v46 = vsub.f32 0.0, %v696_v44  ;;  %v835_v52 = vpop.f32.mrb[3].mxu1 }
 0x23e   : > { %1499 = vpow2.f32 %v842_v42  ;;  %v846_v47 = vmul.f32 1.442695, %v840_v43 }
 0x23f   : > { %1501 = vpow2.f32 %v844_v45  ;;  %v848_v48 = vmul.f32 1.442695, %v841_v46 }
 0x240   : > { %1503 = vpow2.f32 %v846_v47 }
 0x241   : > { %1505 = vpow2.f32 %v848_v48 }
 0x248   : > { %v1500_v53 = vpop.eup %1499 }
 0x249   : > { %v1502_v54 = vpop.eup %1501  ;;  %v850_v55 = vadd.f32 1.0, %v1500_v53 }
 0x24a   : > { %v1504_v56 = vpop.eup %1503  ;;  %v851_v57 = vadd.f32 1.0, %v1502_v54 }
 0x24b   : > { %v1506_v58 = vpop.eup %1505  ;;  %1507 = vrcp.f32 %v850_v55  ;;  %v852_v59 = vadd.f32 1.0, %v1504_v56 }
 0x24c   : > { %1509 = vrcp.f32 %v851_v57  ;;  %v853_v60 = vadd.f32 1.0, %v1506_v58 }
 0x24d   : > { %1511 = vrcp.f32 %v852_v59 }
 0x24e   : > { %1513 = vrcp.f32 %v853_v60 }
 0x255   : > { %v1508_v61 = vpop.eup %1507 }
 0x256   : > { %v1510_v62 = vpop.eup %1509  ;;  %v858_v63 = vmul.f32 %v1508_v61, %v690_v37 }
 0x257   : > { %v1512_v0 = vpop.eup %1511  ;;  %v859_v1 = vmul.f32 %v1510_v62, %v692_v39 }
 0x258   : > { %v1514_v2 = vpop.eup %1513  ;;  %v860_v3 = vmul.f32 %v1512_v0, %v694_v41  ;;  %v864_v4 = vmul.f32 %v858_v63, %v829_v49 }
 0x259   : > { %v861_v5 = vmul.f32 %v1514_v2, %v696_v44  ;;  %v865_v6 = vmul.f32 %v859_v1, %v831_v50 }
 0x25a   : > { %v866_v7 = vmul.f32 %v860_v3, %v833_v51 }
 0x25b   : > { %v867_v8 = vmul.f32 %v861_v5, %v835_v52 }
 0x25c   : > { %v868_v9 = vpack.c.bf16 %v866_v7, %v864_v4 }
 0x25d   : > { %v869_v10 = vpack.c.bf16 %v867_v8, %v865_v6 }
 0x25f   : > { %1030 = vmatprep.mubr.bf16.mxu0 %v869_v10 }
 0x260   : > { %1031 = vmatmul.mubr.bf16.vlgmr.msra.gmra.mrb[4].mxu0 %v868_v9 }
 0x333   : > { %v1311_v11 = vpop.f32.mrb[4].mxu0 }
 0x334   : > { %v1312_v13 = vpop.f32.mrb[5].mxu0 }
 0x335   : > { %v1313_v14 = vadd.f32 %v1312_v13, %v1311_v11  ;;  %v1314_v15 = vpop.f32.mrb[6].mxu0  ;;  %1046 = sbr.rel (%p1285_p1) target bundleno = 838 (0x346), region = 132 }
 0x336   : > { %v1315_v17 = vpop.f32.mrb[7].mxu0 }
 0x337   : > { %v1039_v18 = vadd.f32 %v1313_v14, %v862_v12  ;;  %v1316_v19 = vadd.f32 %v1315_v17, %v1314_v15 }
 0x339   : > { %1041 = vst [vmem:[#allocation3] sm:$0xff] %v1039_v18  ;;  %v1040_v20 = vadd.f32 %v1316_v19, %v863_v16 }
 0x33b   : > { %1042 = vst [vmem:[#allocation3 + $0x8] sm:$0xff] %v1040_v20 }
 0x340   : > { %v1047_v21 = vld [vmem:[#allocation3] sm:$0xff] }
 0x341   : > { %v1051_v24 = vadd.f32 %v1049_v22, %v1047_v21 }
 0x342   : > { %v1048_v23 = vld [vmem:[#allocation3 + $0x8] sm:$0xff] }
 0x343   : > { %v1052_v26 = vadd.f32 %v1050_v25, %v1048_v23  ;;  %1053 = vst [vmem:[%s1982_s7] sm:$0xff] %v1051_v24 }
 0x345   : > { %1054 = vst [vmem:[%s1982_s7 + $0x8] sm:$0xff] %v1052_v26 }
 0x346 PF: > { %s1294_s13 = sshll.u32 %s1685_s25, 8  ;;  %s1069_s14 = sshll.u32 %s1982_s7, 4  ;;  %s2047_s14 = int_to_ptr.vmem [resolvable:$true] %s1069_s14 }
 0x347   : > { %s2044_s30 = scalar_lea.hbm %s2117_s5, %s1294_s13  ;;  %s2051_s27 = scalar_lea.sflag [#allocation6], %s511_s11 }
 0x348   : > { %s1571_s29 = scalar_lea.vmem %s2047_s14, 256  ;;  %p2149_p6 = scmp.ne.s32.totalorder %s2137_s17, 0 }
 0x349   : > { %p1572_p2 = scmp.ne.s32.totalorder %s2047_s14, %s1571_s29  ;;  %s1705_s25 = smov [#allocation11]  }
 0x34a   : > { %s1575_s10 = sshll.u32 %s1705_s25, 4  ;;  %s1576_s10 = int_to_ptr.vmem [resolvable:$false] %s1575_s10 }
 0x34b   : > { %p1573_p10 = pnand %p1572_p2, %p2149_p6  ;;  %s1577_s6 = scalar_lea.vmem %s1576_s10, 512 }
 0x34c   : > { %p1578_p3 = scmp.lt.s32.totalorder %s2047_s14, %s1576_s10  ;;  %p1579_p7 = scmp.lt.s32.totalorder %s1577_s6, %s1571_s29 }
 0x34d   : > { %p1574_p13 = pneg %p1573_p10 }
 0x34e   : > { %p1580_p12 = por %p1579_p7, %p1578_p3 }
 0x350   : > { %p1581_p5 = pnand %p1580_p12, %p1574_p13 }
 0x352   : > { %1584 = shalt.err (!%p1581_p5)
}
 0x353   : > { %s1585_s11 = scalar_lea.hbm %s2044_s30, 256  ;;  %s1589_s16 = scalar_lea.hbm %s2117_s5, 512 }
 0x354   : > { %p1586_p4 = scmp.ne.s32.totalorder %s2044_s30, %s1585_s11  ;;  %p1590_p11 = scmp.lt.u32.totalorder %s2044_s30, %s2117_s5 }
 0x355   : > { %p1591_p0 = scmp.lt.u32.totalorder %s1589_s16, %s1585_s11  ;;  %p1593_p2 = scmp.lt.u32.totalorder %s1585_s11, %s2044_s30 }
 0x356   : > { %p1587_p9 = pnand %p1586_p4, %p2149_p6 }
 0x357   : > { %p1592_p1 = por %p1591_p0, %p1590_p11 }
 0x358   : > { %p1588_p8 = pneg %p1587_p9 }
 0x359   : > { %p1594_p10 = por %p1593_p2, %p1592_p1 }
 0x35b   : > { %p1595_p13 = pnand %p1594_p10, %p1588_p8 }
 0x35d   : > { %1598 = shalt.err (!%p1595_p13)
}
 0x35e   : > { %s1706_s9 = smov 128   ;;  %s1707_s7 = smov 8  }
 0x35f   : > { %1323 = dma.vmem_to_hbm [thread:$0]  (%p2149_p6), %s2047_s14, 256, %s2044_s30, %s2051_s27, %s1706_s9, %s1706_s9, %s1707_s7  }
 0x360 PF: > { %p1335_p3 = scmp.ge.s32.totalorder %s1697_s28, 2  ;;  %s1084_s13 = sand.u32 1, %s1657_s18  }
 0x361   : > { %p2150_p7 = scmp.ne.s32.totalorder %s2138_s21, 0  ;;  %s1085_s24 = scalar_lea.sflag [#allocation6], %s1084_s13 }
 0x363   : > { %p1330_p12 = pnand %p1335_p3, %p2150_p7 }
 0x365   : > { %1652 = dma.done.wait (!%p1330_p12), %s1085_s24, 256  }
 0x366   : > { %1654 = vsyncadd (!%p1330_p12), %s1085_s24, 4294967040  ;;  %s22_s28 = sadd.s32 1, %s1697_s28   ;;  %s2151_s15 = sld [smem:[#allocation19_spill]] }
 0x367   : > { %p19_p5 = scmp.ge.s32.totalorder %s22_s28, 6   ;;  %s2152_s17 = sld [smem:[#allocation18_spill]] }
 0x368   : > { %s2153_s25 = sld [smem:[#allocation15_spill]]  ;;  %s2154_s30 = sld [smem:[#allocation16_spill]] }
 0x369   : > { %s2155_s27 = sld [smem:[#allocation17_spill]]  ;;  %s2156_s18 = smov %s1661_s19 }
 0x36a   : > { %s2157_s19 = smov %s1665_s20  ;;  %s2159_s21 = smov %s1673_s22 }
 0x36b   : > { %s2160_s22 = smov %s1677_s23  ;;  %s2162_s24 = smov %s1689_s26 }
 0x36c   : > { %s2158_s20 = smov %s2151_s15  ;;  %21 = sbr.rel (!%p19_p5) target bundleno = 13 (0xd), region = 193 }
 0x36d   : > { %s2161_s23 = smov %s2152_s17 }
 0x36e   : > { %s2163_s26 = smov %s2154_s30 }
 0x373   :  { %1090 = vsyncpa [#allocation5], 1 }
 0x374   :  { %1092 = vsyncpa [#allocation5 + $0x1], 1 }
 0x375   :  { %1093 = vsyncpa [#allocation10], 1 }
 0x376   :  { %1095 = vsyncpa [#allocation10 + $0x1], 1 }
 0x377   :  { %1096 = vsyncpa [#allocation6], 1 }
 0x378   :  { %1098 = vsyncpa [#allocation6 + $0x1], 1 }

// kernel: transformer_block.5
= control target key start
LH: loop header
LB: loop body
LE: loop exit
PB: predicated region body
PF: predicated region fallthrough
CT: control target
= control target key end

     0   :  { %8 = vsyncpa [#allocation3], 0  ;;  %s1540_s12 = smov 0   ;;  %s1928_s0 = inlined_call_operand.vmem [shape: bf16[32,384], index: 0, kind: input, shape index: {}]   ;;  %s1929_s1 = inlined_call_operand.vmem [shape: f32[16,16], index: 1, kind: input, shape index: {}]   ;;  %s1930_s2 = inlined_call_operand.hbm [shape: f32[16,16], index: 2, kind: input, shape index: {}]   ;;  %s1931_s3 = inlined_call_operand.vmem [shape: bf16[32,128], index: 3, kind: output, shape index: {}]  }
   0x1 LB: > { %s1230_s13 = sadd.s32 4294967295, %s1506_s12   ;;  %p1232_p0 = scmp.ge.s32.totalorder %s1506_s12, 1  ;;  %s1506_s12 = sphi %s1540_s12, %s14_s12  }
   0x2   : > { %p113_p1 = scmp.lt.s32.totalorder %s1506_s12, 3  ;;  %s1508_s14 = smov [#allocation2]  }
   0x3   : > { %s128_s15 = sshll.u32 %s1508_s14, 4  ;;  %p1554_p3 = scmp.eq.s32.totalorder %s1230_s13, 0  ;;  %s129_s15 = int_to_ptr.vmem [resolvable:$true] %s128_s15 }
   0x4   : > { %p1548_p2 = pnand %p1232_p0, %p113_p1  ;;  %s1468_s21 = scalar_lea.hbm %s1930_s2, 256 }
   0x5   : > { %s1936_s17 = scalar_select %p1554_p3, 1, 0 }
   0x6   : > { %s1935_s16 = scalar_select %p1548_p2, 1, 0 }
   0x7   : > { %p1334_p4 = pneg %p1548_p2  ;;  %p1469_p6 = scmp.ne.s32.totalorder %s1930_s2, %s1468_s21 }
   0x8   : > { %p1475_p10 = scmp.lt.u32.totalorder %s1468_s21, %s1930_s2 }
   0x9   : > { %p1562_p5 = pnand %p1554_p3, %p1334_p4 }
   0xb   : > { %p1470_p7 = pneg %p1562_p5 }
   0xd   : > { %p1471_p8 = pnand %p1470_p7, %p1469_p6 }
   0xf   : > { %p1472_p9 = pneg %p1471_p8 }
  0x11   : > { %p1477_p11 = pnand %p1475_p10, %p1472_p9 }
  0x13   : > { %1480 = shalt.err (!%p1477_p11)
}
  0x14   : > { %s1481_s26 = scalar_lea.vmem %s129_s15, 256  ;;  %p1489_p1 = scmp.lt.s32.totalorder %s129_s15, %s129_s15 }
  0x15   : > { %p1482_p12 = scmp.ne.s32.totalorder %s129_s15, %s1481_s26  ;;  %p1490_p4 = scmp.lt.s32.totalorder %s1481_s26, %s1481_s26 }
  0x17   : > { %p1484_p13 = pnand %p1482_p12, %p1470_p7  ;;  %p1491_p3 = por %p1490_p4, %p1489_p1 }
  0x19   : > { %p1485_p0 = pneg %p1484_p13 }
  0x1b   : > { %p1492_p2 = pnand %p1491_p3, %p1485_p0 }
  0x1d   : > { %1495 = shalt.err (!%p1492_p2)
}
  0x1e   : > { %s1509_s27 = smov 128   ;;  %s1510_s28 = smov 8  }
  0x1f   : > { %1337 = dma.hbm_to_vmem [thread:$0]  (!%p1562_p5), %s1930_s2, 256, %s129_s15, [#allocation3], %s1509_s27, %s1509_s27, %s1510_s28  }
  0x20   : > { %p1938_p6 = scmp.ne.s32.totalorder %s1935_s16, 0 }
  0x21   : > { %p1939_p8 = scmp.ne.s32.totalorder (!%p1938_p6), %s1936_s17, 0 }
  0x22   : > { %154 = sbr.rel (%p1938_p6) target bundleno = 1719 (0x6b7), region = 32 }
  0x29   : > { %1501 = dma.done.wait (%p1939_p8), [#allocation3], 256  }
  0x2a   : > { %1503 = vsyncadd (%p1939_p8), [#allocation3], 4294967040  ;;  %s1237_s4 = sshll.u32 %s1230_s13, 1  ;;  %v195_v0 = vld [vmem:[#allocation2] sm:$0xff]  ;;  %s1511_s11 = smov 16   ;;  %v196_v2 = vld [vmem:[#allocation2 + $0x8] sm:$0xff] }
  0x2b   : > { %p180_p2 = scmp.lt.s32.totalorder %s1237_s4, 3  ;;  %v1596_v1 = vld [vmem:[%s1929_s1] sm:$0xff]  ;;  %211 = vrot.lane.b32.xlu0 %v195_v0, %s1511_s11  ;;  %v1610_v4 = vld [vmem:[%s1929_s1 + $0x8] sm:$0xff]  ;;  %v1512_v10 = vmov 0.0   ;;  %s1513_s15 = smov 112   ;;  %vm1514_vm0 = vmmov 0  }
  0x2c   : > { %231 = vrot.lane.b32.xlu1 %v1596_v1, %s1511_s11  ;;  %1281 = vmatprep.subr.bf16.mxu0 %v1512_v10  ;;  %s1515_s16 = smov 48   ;;  %s1516_s17 = smov 32   ;;  %vm251_vm1 = vcmask 130048   ;;  %vm286_vm2 = vcmask 261120   ;;  %vm1146_vm3 = vcmask 523264   ;;  %vm1149_vm4 = vcmask 785408  }
  0x2d   : > { %s1941_s4 = smov (!%p180_p2, %s1237_s4), 3  ;;  %1287 = vmatprep.subr.bf16.mxu1 %v1512_v10  ;;  %1283 = vmatprep.mubr.msk.bf16.mxu0 %vm1514_vm0, %v1512_v10  ;;  %s1517_s18 = smov 80  }
  0x2e   : > { %s1329_s5 = smul.u32 12, %s1941_s4  ;;  %1289 = vmatprep.mubr.msk.bf16.mxu1 %vm1514_vm0, %v1512_v10  ;;  %s1518_s19 = smov 64  }
  0x2f   : > { %213 = vrot.lane.b32.xlu0 %v196_v2, %s1511_s11  ;;  %s1519_s20 = smov 96   ;;  %s1240_s21 = sshll.u32 %s1941_s4, 2 }
  0x30   : > { %s1601_s10 = scalar_lea.vmem %s1928_s0, %s1329_s5  ;;  %233 = vrot.lane.b32.xlu1 %v1610_v4, %s1511_s11  ;;  %s190_s24 = scalar_lea.vmem %s1931_s3, %s1240_s21 }
  0x31   : > { %v1257_v3 = vld [vmem:[%s1601_s10] sm:$0xff]   ;;  %v202_v6 = vld [vmem:[%s1601_s10 + $0xc] sm:$0xff]  }
  0x32   : > { %v1612_v5 = vunpack.c.h.bf16 %v1257_v3  ;;  %v1615_v7 = vunpack.c.h.bf16 %v202_v6  ;;  %v1626_v12 = vunpack.c.l.bf16 %v1257_v3  ;;  %v1631_v16 = vunpack.c.l.bf16 %v202_v6 }
  0x34   : > { %v271_v8 = vmul.f32 %v1612_v5, %v195_v0  ;;  %v272_v9 = vmul.f32 %v1615_v7, %v196_v2  ;;  %v239_v18 = vmul.f32 %v1626_v12, %v195_v0  ;;  %v240_v20 = vmul.f32 %v1631_v16, %v196_v2 }
  0x35   : > { %v255_v24 = vmul.f32 %v1612_v5, %v1596_v1  ;;  %v256_v29 = vmul.f32 %v1615_v7, %v1610_v4  ;;  %v207_v42 = vmul.f32 %v1626_v12, %v1596_v1  ;;  %v208_v43 = vmul.f32 %v1631_v16, %v1610_v4 }
  0x36   : > { %275 = vrot.lane.b32.xlu0 %v271_v8, %s1511_s11  ;;  %277 = vrot.lane.b32.xlu1 %v272_v9, %s1511_s11 }
  0x9d   : > { %v212_v11 = vpop.permute.xlu0 %211 }
  0x9e   : > { %v257_v13 = vmul.f32 %v1612_v5, %v212_v11  ;;  %v217_v15 = vmul.f32 %v1626_v12, %v212_v11  ;;  %v232_v21 = vpop.permute.xlu1 %231 }
  0x9f   : > { %v269_v27 = vmul.f32 %v1612_v5, %v232_v21  ;;  %v237_v41 = vmul.f32 %v1626_v12, %v232_v21 }
  0xa0   : > { %261 = vrot.lane.b32.xlu0 %v257_v13, %s1513_s15 }
  0xa1   : > { %v214_v14 = vpop.permute.xlu0 %213 }
  0xa2   : > { %v258_v17 = vmul.f32 %v214_v14, %v1615_v7  ;;  %v218_v19 = vmul.f32 %v214_v14, %v1631_v16  ;;  %v234_v22 = vpop.permute.xlu1 %233 }
  0xa3   : > { %v270_v28 = vmul.f32 %v234_v22, %v1615_v7  ;;  %v238_v45 = vmul.f32 %v234_v22, %v1631_v16 }
  0xa4   : > { %221 = vrot.lane.b32.xlu0 %v217_v15, %s1513_s15  ;;  %263 = vrot.lane.b32.xlu1 %v258_v17, %s1513_s15 }
  0xa8   : > { %243 = vrot.lane.b32.xlu0 %v239_v18, %s1511_s11  ;;  %223 = vrot.lane.b32.xlu1 %v218_v19, %s1513_s15  ;;  %v276_v23 = vpop.permute.xlu0 %275  ;;  %v278_v25 = vpop.permute.xlu1 %277 }
  0xa9   : > { %v281_v33 = vadd.f32 %v276_v23, %v269_v27  ;;  %v282_v34 = vadd.f32 %v278_v25, %v270_v28 }
  0xac   : > { %245 = vrot.lane.b32.xlu1 %v240_v20, %s1511_s11  ;;  %417 = vrot.lane.b32.xlu0 %v195_v0, %s1515_s16 }
  0xb0   : > { %419 = vrot.lane.b32.xlu1 %v196_v2, %s1515_s16  ;;  %443 = vrot.lane.b32.xlu0 %v195_v0, %s1516_s17 }
  0xb4   : > { %445 = vrot.lane.b32.xlu1 %v196_v2, %s1516_s17  ;;  %654 = vrot.lane.b32.xlu0 %v195_v0, %s1517_s18 }
  0xb8   : > { %656 = vrot.lane.b32.xlu1 %v196_v2, %s1517_s18  ;;  %680 = vrot.lane.b32.xlu0 %v195_v0, %s1518_s19 }
  0xbc   : > { %682 = vrot.lane.b32.xlu1 %v196_v2, %s1518_s19  ;;  %891 = vrot.lane.b32.xlu0 %v195_v0, %s1513_s15 }
  0xc0   : > { %893 = vrot.lane.b32.xlu1 %v196_v2, %s1513_s15  ;;  %917 = vrot.lane.b32.xlu0 %v195_v0, %s1519_s20 }
  0xc4   : > { %919 = vrot.lane.b32.xlu1 %v196_v2, %s1519_s20  ;;  %409 = vrot.lane.b32.xlu0 %v1596_v1, %s1516_s17 }
  0xc8   : > { %411 = vrot.lane.b32.xlu1 %v1610_v4, %s1516_s17  ;;  %435 = vrot.lane.b32.xlu0 %v1596_v1, %s1515_s16 }
  0xcc   : > { %437 = vrot.lane.b32.xlu1 %v1610_v4, %s1515_s16  ;;  %646 = vrot.lane.b32.xlu0 %v1596_v1, %s1518_s19 }
  0xd0   : > { %648 = vrot.lane.b32.xlu1 %v1610_v4, %s1518_s19  ;;  %672 = vrot.lane.b32.xlu0 %v1596_v1, %s1517_s18 }
  0xd4   : > { %674 = vrot.lane.b32.xlu1 %v1610_v4, %s1517_s18 }
 0x112   : > { %v262_v26 = vpop.permute.xlu0 %261 }
 0x113   : > { %v267_v30 = vsub.f32 %v255_v24, %v262_v26 }
 0x115   : > { %v283_v36 = vsel %vm251_vm1, %v267_v30, %v281_v33 }
 0x116   : > { %v222_v31 = vpop.permute.xlu0 %221  ;;  %v264_v32 = vpop.permute.xlu1 %263 }
 0x117   : > { %v268_v35 = vsub.f32 %v256_v29, %v264_v32  ;;  %v227_v49 = vsub.f32 %v207_v42, %v222_v31 }
 0x119   : > { %v284_v37 = vsel %vm251_vm1, %v268_v35, %v282_v34 }
 0x11a   : > { %v244_v38 = vpop.permute.xlu0 %243  ;;  %v224_v39 = vpop.permute.xlu1 %223  ;;  %v285_v40 = vpack.c.bf16 %v284_v37, %v283_v36 }
 0x11b   : > { %v249_v46 = vadd.f32 %v244_v38, %v237_v41  ;;  %v228_v50 = vsub.f32 %v208_v43, %v224_v39 }
 0x11c   : > { %v291_v44 = vsel %vm286_vm2, %v285_v40, 0 }
 0x11d   : > { %1282 = vmatpush3.bf16.xpose.msra.mxu0 %v291_v44  ;;  %v252_v53 = vsel %vm251_vm1, %v227_v49, %v249_v46 }
 0x11e   : > { %v246_v47 = vpop.permute.xlu1 %245  ;;  %v418_v48 = vpop.permute.xlu0 %417  ;;  %1299 = vmatprep.subr.bf16.mxu0 %v1512_v10 }
 0x11f   : > { %v250_v51 = vadd.f32 %v246_v47, %v238_v45  ;;  %v482_v52 = vmul.f32 %v1612_v5, %v418_v48  ;;  %v423_v60 = vmul.f32 %v1626_v12, %v418_v48 }
 0x121   : > { %v253_v54 = vsel %vm251_vm1, %v228_v50, %v250_v51  ;;  %486 = vrot.lane.b32.xlu0 %v482_v52, %s1513_s15 }
 0x122   : > { %v254_v55 = vpack.c.bf16 %v253_v54, %v252_v53  ;;  %v420_v56 = vpop.permute.xlu1 %419  ;;  %v444_v57 = vpop.permute.xlu0 %443 }
 0x123   : > { %v483_v58 = vmul.f32 %v420_v56, %v1615_v7  ;;  %v496_v59 = vmul.f32 %v1612_v5, %v444_v57  ;;  %v424_v63 = vmul.f32 %v420_v56, %v1631_v16  ;;  %v449_v0 = vmul.f32 %v1626_v12, %v444_v57 }
 0x124   : > { %1284 = vmatmul.mubr.msk.bf16.vlgmr.msra.gmra.mrb[0].mxu0 %vm286_vm2, %v254_v55 }
 0x125   : > { %488 = vrot.lane.b32.xlu1 %v483_v58, %s1513_s15  ;;  %500 = vrot.lane.b32.xlu0 %v496_v59, %s1511_s11 }
 0x126   : > { %v446_v61 = vpop.permute.xlu1 %445  ;;  %1301 = vmatprep.mubr.msk.bf16.mxu0 %vm1514_vm0, %v1512_v10  ;;  %v1699_v2 = vpop.permute.xlu0 %654 }
 0x127   : > { %v497_v62 = vmul.f32 %v446_v61, %v1615_v7  ;;  %v450_v6 = vmul.f32 %v446_v61, %v1631_v16  ;;  %v719_v8 = vmul.f32 %v1612_v5, %v1699_v2 }
 0x129   : > { %502 = vrot.lane.b32.xlu1 %v497_v62, %s1511_s11  ;;  %427 = vrot.lane.b32.xlu0 %v423_v60, %s1513_s15  ;;  %v660_v60 = vmul.f32 %v1626_v12, %v1699_v2 }
 0x12a   : > { %v657_v3 = vpop.permute.xlu1 %656  ;;  %v681_v14 = vpop.permute.xlu0 %680 }
 0x12b   : > { %v720_v9 = vmul.f32 %v657_v3, %v1615_v7  ;;  %v733_v56 = vmul.f32 %v1612_v5, %v681_v14  ;;  %v661_v57 = vmul.f32 %v657_v3, %v1631_v16 }
 0x12d   : > { %429 = vrot.lane.b32.xlu1 %v424_v63, %s1513_s15  ;;  %453 = vrot.lane.b32.xlu0 %v449_v0, %s1511_s11 }
 0x12e   : > { %v683_v11 = vpop.permute.xlu1 %682  ;;  %v1712_v15 = vpop.permute.xlu0 %891 }
 0x12f   : > { %v734_v13 = vmul.f32 %v683_v11, %v1615_v7  ;;  %v687_v58 = vmul.f32 %v683_v11, %v1631_v16  ;;  %v956_v62 = vmul.f32 %v1612_v5, %v1712_v15 }
 0x131   : > { %455 = vrot.lane.b32.xlu1 %v450_v6, %s1511_s11  ;;  %723 = vrot.lane.b32.xlu0 %v719_v8, %s1513_s15 }
 0x132   : > { %v894_v17 = vpop.permute.xlu1 %893  ;;  %v1714_v18 = vpop.permute.xlu0 %917 }
 0x133   : > { %v957_v59 = vmul.f32 %v894_v17, %v1615_v7  ;;  %v898_v0 = vmul.f32 %v894_v17, %v1631_v16  ;;  %v970_v2 = vmul.f32 %v1612_v5, %v1714_v18 }
 0x135   : > { %725 = vrot.lane.b32.xlu1 %v720_v9, %s1513_s15 }
 0x136   : > { %v1716_v19 = vpop.permute.xlu1 %919  ;;  %v1718_v20 = vpop.permute.xlu0 %409 }
 0x137   : > { %v415_v32 = vmul.f32 %v1626_v12, %v1718_v20  ;;  %v971_v61 = vmul.f32 %v1716_v19, %v1615_v7  ;;  %v924_v11 = vmul.f32 %v1716_v19, %v1631_v16  ;;  %v923_v19 = vmul.f32 %v1626_v12, %v1714_v18 }
 0x139   : > { %739 = vrot.lane.b32.xlu1 %v734_v13, %s1511_s11 }
 0x13a   : > { %v1720_v21 = vpop.permute.xlu1 %411  ;;  %v436_v22 = vpop.permute.xlu0 %435 }
 0x13b   : > { %v416_v33 = vmul.f32 %v1720_v21, %v1631_v16  ;;  %v441_v3 = vmul.f32 %v1626_v12, %v436_v22 }
 0x13e   : > { %v438_v23 = vpop.permute.xlu1 %437  ;;  %v1722_v24 = vpop.permute.xlu0 %646 }
 0x13f   : > { %v717_v41 = vmul.f32 %v1612_v5, %v1722_v24  ;;  %v495_v63 = vmul.f32 %v438_v23, %v1615_v7  ;;  %v442_v6 = vmul.f32 %v438_v23, %v1631_v16  ;;  %v481_v23 = vmul.f32 %v1720_v21, %v1615_v7 }
 0x142   : > { %v1724_v25 = vpop.permute.xlu1 %648  ;;  %v1726_v26 = vpop.permute.xlu0 %672 }
 0x143   : > { %v718_v42 = vmul.f32 %v1724_v25, %v1615_v7  ;;  %v731_v18 = vmul.f32 %v1612_v5, %v1726_v26 }
 0x146   : > { %v1728_v27 = vpop.permute.xlu1 %674 }
 0x193   : > { %v1730_v28 = vpop.permute.xlu0 %486 }
 0x197   : > { %v1732_v29 = vpop.permute.xlu1 %488  ;;  %v501_v30 = vpop.permute.xlu0 %500 }
 0x19b   : > { %v503_v31 = vpop.permute.xlu1 %502  ;;  %v428_v34 = vpop.permute.xlu0 %427 }
 0x19c   : > { %v433_v36 = vsub.f32 %v415_v32, %v428_v34  ;;  %v507_v9 = vadd.f32 %v503_v31, %v495_v63  ;;  %v897_v32 = vmul.f32 %v1626_v12, %v1712_v15  ;;  %v732_v34 = vmul.f32 %v1728_v27, %v1615_v7 }
 0x19f   : > { %v430_v35 = vpop.permute.xlu1 %429  ;;  %v454_v39 = vpop.permute.xlu0 %453 }
 0x1a0   : > { %v434_v37 = vsub.f32 %v416_v33, %v430_v35  ;;  %v493_v33 = vsub.f32 %v481_v23, %v1732_v29 }
 0x1a2   : > { %v1738_v38 = vpack.i.bf16 %v434_v37, %v433_v36 }
 0x1a3   : > { %v456_v40 = vpop.permute.xlu1 %455  ;;  %v724_v43 = vpop.permute.xlu0 %723 }
 0x1a4   : > { %v729_v45 = vsub.f32 %v717_v41, %v724_v43  ;;  %v460_v17 = vadd.f32 %v456_v40, %v442_v6 }
 0x1a7   : > { %v726_v44 = vpop.permute.xlu1 %725 }
 0x1a8   : > { %v730_v46 = vsub.f32 %v718_v42, %v726_v44 }
 0x1aa   : > { %v1744_v47 = vpack.i.bf16 %v730_v46, %v729_v45 }
 0x1f7   : > { %v327_v48 = vpop.f32.mrb[0].mxu0 }
 0x1f8   : > { %v1746_v49 = vmul.f32 0.17677669, %v327_v48  ;;  %v1285_v50 = vpop.f32.mrb[1].mxu0 }
 0x1f9   : > { %v330_v51 = vpop.f32.mrb[2].mxu0  ;;  %v652_v50 = vmul.f32 %v1626_v12, %v1722_v24  ;;  %v679_v24 = vmul.f32 %v1728_v27, %v1631_v16  ;;  %v1834_v27 = vld [vmem:[%s1601_s10 + $0x8] ss:$12 sps:$4 sm:$0xff]  }
 0x1fa   : > { %v1748_v52 = vmul.f32 0.17677669, %v330_v51  ;;  %v1286_v53 = vpop.f32.mrb[3].mxu0  ;;  %v336_v54 = vsel %vm251_vm1, %v1746_v49, -inf  ;;  %v653_v51 = vmul.f32 %v1724_v25, %v1631_v16  ;;  %1288 = vmatpush3.bf16.msra.mxu1 %v1834_v27 }
 0x1fb   : > { %337 = vmax.xlane.f32.xlu0 %v336_v54  ;;  %1293 = vmatprep.subr.bf16.mxu1 %v1512_v10 }
 0x1fc   : > { %v339_v55 = vsel %vm251_vm1, %v1748_v52, -inf }
 0x1fd   : > { %340 = vmax.xlane.f32.xlu1 %v339_v55 }
 0x20e   : > { %885 = vrot.lane.b32.xlu1 %v1610_v4, %s1519_s20 }
 0x211   : > { %737 = vrot.lane.b32.xlu0 %v733_v56, %s1511_s11 }
 0x212   : > { %911 = vrot.lane.b32.xlu1 %v1610_v4, %s1513_s15  ;;  %v686_v4 = vmul.f32 %v1626_v12, %v681_v14  ;;  %v459_v14 = vadd.f32 %v454_v39, %v441_v3 }
 0x215   : > { %883 = vrot.lane.b32.xlu0 %v1596_v1, %s1519_s20 }
 0x216   : > { %666 = vrot.lane.b32.xlu1 %v661_v57, %s1513_s15 }
 0x219   : > { %909 = vrot.lane.b32.xlu0 %v1596_v1, %s1513_s15  ;;  %v494_v1 = vmul.f32 %v1612_v5, %v436_v22  ;;  %v480_v22 = vmul.f32 %v1612_v5, %v1718_v20  ;;  %v740_v20 = vpop.permute.xlu1 %739 }
 0x21a   : > { %692 = vrot.lane.b32.xlu1 %v687_v58, %s1511_s11  ;;  %v744_v39 = vadd.f32 %v740_v20, %v732_v34 }
 0x21b   : > { %v506_v8 = vadd.f32 %v501_v30, %v494_v1  ;;  %v1375_v30 = vpack.i.bf16 %v460_v17, %v459_v14  ;;  %v492_v31 = vsub.f32 %v480_v22, %v1730_v28 }
 0x21d   : > { %664 = vrot.lane.b32.xlu0 %v660_v60, %s1513_s15  ;;  %v1365_v13 = vpack.i.bf16 %v507_v9, %v506_v8  ;;  %v1360_v15 = vpack.i.bf16 %v493_v33, %v492_v31 }
 0x21e   : > { %962 = vrot.lane.b32.xlu1 %v957_v59, %s1513_s15  ;;  %v678_v59 = vmul.f32 %v1626_v12, %v1726_v26 }
 0x221   : > { %690 = vrot.lane.b32.xlu0 %v686_v4, %s1511_s11 }
 0x222   : > { %976 = vrot.lane.b32.xlu1 %v971_v61, %s1511_s11 }
 0x225   : > { %960 = vrot.lane.b32.xlu0 %v956_v62, %s1513_s15 }
 0x226   : > { %903 = vrot.lane.b32.xlu1 %v898_v0, %s1513_s15 }
 0x229   : > { %974 = vrot.lane.b32.xlu0 %v970_v2, %s1511_s11 }
 0x22a   : > { %929 = vrot.lane.b32.xlu1 %v924_v11, %s1511_s11 }
 0x22d   : > { %901 = vrot.lane.b32.xlu0 %v897_v32, %s1513_s15 }
 0x22e   : > { %1366 = vrot.lane.b32.xlu1 %v1365_v13, %s1519_s20 }
 0x231   : > { %927 = vrot.lane.b32.xlu0 %v923_v19, %s1511_s11 }
 0x232   : > { %1376 = vrot.lane.b32.xlu1 %v1375_v30, %s1519_s20 }
 0x235   : > { %1361 = vrot.lane.b32.xlu0 %v1360_v15, %s1519_s20 }
 0x288   : > { %v338_v21 = vpop.xlane.xlu0 %337 }
 0x289   : > { %v342_v35 = vsub.f32 %v1746_v49, %v338_v21 }
 0x28a   : > { %v341_v36 = vpop.xlane.xlu1 %340 }
 0x28b   : > { %v344_v28 = vmul.f32 1.442695, %v342_v35  ;;  %v343_v29 = vsub.f32 %v1748_v52, %v341_v36 }
 0x28c   : > { %v738_v37 = vpop.permute.xlu0 %737 }
 0x28d   : > { %1436 = vpow2.f32 %v344_v28  ;;  %v346_v40 = vmul.f32 1.442695, %v343_v29  ;;  %v743_v41 = vadd.f32 %v738_v37, %v731_v18 }
 0x28e   : > { %v886_v42 = vpop.permute.xlu1 %885 }
 0x28f   : > { %1438 = vpow2.f32 %v346_v40  ;;  %v1385_v43 = vpack.i.bf16 %v744_v39, %v743_v41  ;;  %v955_v19 = vmul.f32 %v886_v42, %v1615_v7  ;;  %v890_v20 = vmul.f32 %v886_v42, %v1631_v16 }
 0x290   : > { %v884_v44 = vpop.permute.xlu0 %883 }
 0x291   : > { %v954_v32 = vmul.f32 %v1612_v5, %v884_v44  ;;  %v889_v31 = vmul.f32 %v1626_v12, %v884_v44 }
 0x292   : > { %v912_v45 = vpop.permute.xlu1 %911 }
 0x293   : > { %v969_v26 = vmul.f32 %v912_v45, %v1615_v7  ;;  %v916_v14 = vmul.f32 %v912_v45, %v1631_v16 }
 0x294   : > { %v910_v46 = vpop.permute.xlu0 %909 }
 0x295   : > { %v968_v6 = vmul.f32 %v1612_v5, %v910_v46  ;;  %v915_v9 = vmul.f32 %v1626_v12, %v910_v46 }
 0x296   : > { %v667_v48 = vpop.permute.xlu1 %666 }
 0x297   : > { %v1814_v49 = vpop.eup %1436  ;;  %v671_v55 = vsub.f32 %v653_v51, %v667_v48 }
 0x298   : > { %v665_v52 = vpop.permute.xlu0 %664  ;;  %v348_v53 = vsel %vm251_vm1, %v1814_v49, 0.0 }
 0x299   : > { %v1822_v54 = vpop.eup %1438  ;;  %v670_v56 = vsub.f32 %v652_v50, %v665_v52  ;;  %349 = vadd.xlane.f32.xlu0 %v348_v53 }
 0x29a   : > { %v693_v57 = vpop.permute.xlu1 %692  ;;  %v351_v58 = vsel %vm251_vm1, %v1822_v54, 0.0 }
 0x29b   : > { %v1390_v25 = vpack.i.bf16 %v671_v55, %v670_v56  ;;  %352 = vadd.xlane.f32.xlu1 %v351_v58  ;;  %v697_v4 = vadd.f32 %v693_v57, %v679_v24 }
 0x29c   : > { %v691_v60 = vpop.permute.xlu0 %690 }
 0x29d   : > { %v696_v61 = vadd.f32 %v691_v60, %v678_v59 }
 0x29e   : > { %v963_v1 = vpop.permute.xlu1 %962 }
 0x29f   : > { %v1395_v62 = vpack.i.bf16 %v697_v4, %v696_v61  ;;  %v967_v21 = vsub.f32 %v955_v19, %v963_v1 }
 0x2a0   : > { %v961_v63 = vpop.permute.xlu0 %960 }
 0x2a1   : > { %v966_v33 = vsub.f32 %v954_v32, %v961_v63 }
 0x2a2   : > { %v977_v2 = vpop.permute.xlu1 %976 }
 0x2a3   : > { %v981_v17 = vadd.f32 %v977_v2, %v969_v26  ;;  %v1400_v5 = vpack.i.bf16 %v967_v21, %v966_v33 }
 0x2a4   : > { %v975_v0 = vpop.permute.xlu0 %974 }
 0x2a5   : > { %v980_v11 = vadd.f32 %v975_v0, %v968_v6 }
 0x2a6   : > { %v904_v8 = vpop.permute.xlu1 %903 }
 0x2a7   : > { %v1405_v23 = vpack.i.bf16 %v981_v17, %v980_v11  ;;  %v908_v7 = vsub.f32 %v890_v20, %v904_v8 }
 0x2a8   : > { %v902_v3 = vpop.permute.xlu0 %901 }
 0x2a9   : > { %v907_v34 = vsub.f32 %v889_v31, %v902_v3 }
 0x2aa   : > { %v930_v22 = vpop.permute.xlu1 %929 }
 0x2ac   : > { %1386 = vrot.lane.b32.xlu1 %v1385_v43, %s1518_s19  ;;  %v928_v13 = vpop.permute.xlu0 %927 }
 0x2ad   : > { %v933_v30 = vadd.f32 %v928_v13, %v915_v9 }
 0x2ae   : > { %v1367_v35 = vpop.permute.xlu1 %1366 }
 0x2af   : > { %1371 = vrot.lane.b32.xlu0 %v1738_v38, %s1519_s20  ;;  %v934_v38 = vadd.f32 %v930_v22, %v916_v14  ;;  %v1369_v40 = vunpack.i.h.bf16 %v1367_v35  ;;  %v1368_v41 = vunpack.i.l.bf16 %v1367_v35 }
 0x2b0   : > { %1396 = vrot.lane.b32.xlu1 %v1395_v62, %s1518_s19  ;;  %v1362_v36 = vpop.permute.xlu0 %1361 }
 0x2b1   : > { %v1415_v15 = vpack.i.bf16 %v934_v38, %v933_v30  ;;  %v1364_v29 = vunpack.i.h.bf16 %v1362_v36  ;;  %v1363_v37 = vunpack.i.l.bf16 %v1362_v36 }
 0x2b2   : > { %v1377_v12 = vpop.permute.xlu1 %1376 }
 0x2b3   : > { %1381 = vrot.lane.b32.xlu0 %v1744_v47, %s1518_s19  ;;  %v1410_v47 = vpack.i.bf16 %v908_v7, %v907_v34  ;;  %v524_v44 = vsel %vm251_vm1, %v1363_v37, %v1368_v41  ;;  %v525_v45 = vsel %vm251_vm1, %v1364_v29, %v1369_v40  ;;  %v1379_v4 = vunpack.i.h.bf16 %v1377_v12 }
 0x2b4   : > { %1406 = vrot.lane.b32.xlu1 %v1405_v23, %s1516_s17  ;;  %v526_v52 = vpack.c.bf16 %v525_v45, %v524_v44  ;;  %v1378_v61 = vunpack.i.l.bf16 %v1377_v12 }
 0x2b6   : > { %v531_v60 = vsel %vm286_vm2, %v526_v52, 0 }
 0x2b7   : > { %1391 = vrot.lane.b32.xlu0 %v1390_v25, %s1518_s19 }
 0x2b8   : > { %1416 = vrot.lane.b32.xlu1 %v1415_v15, %s1516_s17 }
 0x2bb   : > { %1401 = vrot.lane.b32.xlu0 %v1400_v5, %s1516_s17 }
 0x2bf   : > { %1411 = vrot.lane.b32.xlu0 %v1410_v47, %s1516_s17 }
 0x326   : > { %v350_v18 = vpop.xlane.xlu0 %349 }
 0x327   : > { %1440 = vrcp.f32 %v350_v18 }
 0x328   : > { %v353_v28 = vpop.xlane.xlu1 %352 }
 0x329   : > { %1442 = vrcp.f32 %v353_v28 }
 0x32a   : > { %v1372_v16 = vpop.permute.xlu0 %1371 }
 0x32b   : > { %v1374_v58 = vunpack.i.h.bf16 %v1372_v16  ;;  %v1373_v59 = vunpack.i.l.bf16 %v1372_v16 }
 0x32c   : > { %v1387_v42 = vpop.permute.xlu1 %1386 }
 0x32d   : > { %v1389_v24 = vunpack.i.h.bf16 %v1387_v42  ;;  %v1388_v25 = vunpack.i.l.bf16 %v1387_v42  ;;  %v477_v1 = vsel %vm251_vm1, %v1373_v59, %v1378_v61  ;;  %v478_v63 = vsel %vm251_vm1, %v1374_v58, %v1379_v4 }
 0x32e   : > { %v1382_v39 = vpop.permute.xlu0 %1381  ;;  %v479_v8 = vpack.c.bf16 %v478_v63, %v477_v1 }
 0x32f   : > { %v1384_v53 = vunpack.i.h.bf16 %v1382_v39  ;;  %v1383_v55 = vunpack.i.l.bf16 %v1382_v39 }
 0x330   : > { %v1397_v56 = vpop.permute.xlu1 %1396 }
 0x331   : > { %v1441_v43 = vpop.eup %1440  ;;  %v761_v62 = vsel %vm251_vm1, %v1383_v55, %v1388_v25  ;;  %v1399_v17 = vunpack.i.h.bf16 %v1397_v56  ;;  %v1398_v32 = vunpack.i.l.bf16 %v1397_v56 }
 0x332   : > { %v1392_v48 = vpop.permute.xlu0 %1391  ;;  %v356_v50 = vmul.f32 %v1441_v43, %v1814_v49  ;;  %v762_v49 = vsel %vm251_vm1, %v1384_v53, %v1389_v24 }
 0x333   : > { %v1443_v46 = vpop.eup %1442  ;;  %v763_v2 = vpack.c.bf16 %v762_v49, %v761_v62  ;;  %v1394_v26 = vunpack.i.h.bf16 %v1392_v48  ;;  %v1393_v9 = vunpack.i.l.bf16 %v1392_v48 }
 0x334   : > { %v357_v51 = vmul.f32 %v1443_v46, %v1822_v54  ;;  %v1407_v0 = vpop.permute.xlu1 %1406 }
 0x335   : > { %v1409_v11 = vunpack.i.h.bf16 %v1407_v0  ;;  %v1408_v13 = vunpack.i.l.bf16 %v1407_v0  ;;  %v768_v14 = vsel %vm286_vm2, %v763_v2, 0  ;;  %v714_v30 = vsel %vm251_vm1, %v1393_v9, %v1398_v32 }
 0x336   : > { %v358_v57 = vpack.c.bf16 %v357_v51, %v356_v50  ;;  %v1402_v54 = vpop.permute.xlu0 %1401  ;;  %v715_v19 = vsel %vm251_vm1, %v1394_v26, %v1399_v17 }
 0x337   : > { %v1404_v3 = vunpack.i.h.bf16 %v1402_v54  ;;  %v1403_v6 = vunpack.i.l.bf16 %v1402_v54  ;;  %v716_v33 = vpack.c.bf16 %v715_v19, %v714_v30 }
 0x338   : > { %1290 = vmatmul.mubr.msk.bf16.vlgmr.msra.gmra.mrb[0].mxu1 %vm251_vm1, %v358_v57  ;;  %v1417_v15 = vpop.permute.xlu1 %1416 }
 0x339   : > { %1294 = vmatpush3.bf16.xpose.msra.mxu1 %v531_v60  ;;  %1295 = vmatprep.mubr.msk.bf16.mxu1 %vm1514_vm0, %v1512_v10  ;;  %v998_v22 = vsel %vm251_vm1, %v1403_v6, %v1408_v13  ;;  %v999_v23 = vsel %vm251_vm1, %v1404_v3, %v1409_v11  ;;  %v1419_v34 = vunpack.i.h.bf16 %v1417_v15  ;;  %v1418_v7 = vunpack.i.l.bf16 %v1417_v15 }
 0x33a   : > { %1305 = vmatprep.subr.bf16.mxu1 %v1512_v10  ;;  %v1412_v38 = vpop.permute.xlu0 %1411  ;;  %v1000_v31 = vpack.c.bf16 %v999_v23, %v998_v22 }
 0x33b   : > { %v1414_v20 = vunpack.i.h.bf16 %v1412_v38  ;;  %v1413_v21 = vunpack.i.l.bf16 %v1412_v38 }
 0x33c   : > { %v1005_v5 = vsel %vm286_vm2, %v1000_v31, 0 }
 0x33d   : > { %v951_v47 = vsel %vm251_vm1, %v1413_v21, %v1418_v7  ;;  %v952_v35 = vsel %vm251_vm1, %v1414_v20, %v1419_v34 }
 0x33e   : > { %v953_v36 = vpack.c.bf16 %v952_v35, %v951_v47 }
 0x340   : > { %1296 = vmatmul.mubr.msk.bf16.vlgmr.msra.gmra.mrb[4].mxu1 %vm286_vm2, %v479_v8 }
 0x341   : > { %1306 = vmatpush3.bf16.xpose.msra.mxu1 %v768_v14  ;;  %1307 = vmatprep.mubr.msk.bf16.mxu1 %vm1514_vm0, %v1512_v10 }
 0x342   : > { %1317 = vmatprep.subr.bf16.mxu1 %v1512_v10 }
 0x348   : > { %1308 = vmatmul.mubr.msk.bf16.vlgmr.msra.gmra.mrb[8].mxu1 %vm286_vm2, %v716_v33 }
 0x349   : > { %1318 = vmatpush3.bf16.xpose.msra.mxu1 %v1005_v5  ;;  %1319 = vmatprep.mubr.msk.bf16.mxu1 %vm1514_vm0, %v1512_v10 }
 0x350   : > { %1320 = vmatmul.mubr.msk.bf16.vlgmr.msra.gmra.mrb[12].mxu1 %vm286_vm2, %v953_v36 }
 0x40b   : > { %v1883_v12 = vpop.f32.mrb[0].mxu1 }
 0x40c   : > { %v1291_v18 = vpop.f32.mrb[1].mxu1 }
 0x40d   : > { %v1885_v28 = vpop.f32.mrb[2].mxu1 }
 0x40e   : > { %v1292_v16 = vpop.f32.mrb[3].mxu1 }
 0x413   : > { %v567_v29 = vpop.f32.mrb[4].mxu1 }
 0x414   : > { %v574_v37 = vmul.f32 0.17677669, %v567_v29  ;;  %v1297_v39 = vpop.f32.mrb[5].mxu1 }
 0x415   : > { %v570_v40 = vpop.f32.mrb[6].mxu1 }
 0x416   : > { %v575_v41 = vmul.f32 0.17677669, %v570_v40  ;;  %v1298_v42 = vpop.f32.mrb[7].mxu1  ;;  %v576_v43 = vsel %vm251_vm1, %v574_v37, -inf }
 0x417   : > { %577 = vmax.xlane.f32.xlu0 %v576_v43 }
 0x418   : > { %v579_v44 = vsel %vm251_vm1, %v575_v41, -inf }
 0x419   : > { %580 = vmax.xlane.f32.xlu1 %v579_v44 }
 0x41b   : > { %v804_v45 = vpop.f32.mrb[8].mxu1 }
 0x41c   : > { %v811_v46 = vmul.f32 0.17677669, %v804_v45  ;;  %v1309_v48 = vpop.f32.mrb[9].mxu1 }
 0x41d   : > { %v807_v50 = vpop.f32.mrb[10].mxu1 }
 0x41e   : > { %v812_v51 = vmul.f32 0.17677669, %v807_v50  ;;  %v1310_v52 = vpop.f32.mrb[11].mxu1  ;;  %v813_v53 = vsel %vm251_vm1, %v811_v46, -inf }
 0x41f   : > { %814 = vmax.xlane.f32.xlu0 %v813_v53 }
 0x420   : > { %v816_v55 = vsel %vm251_vm1, %v812_v51, -inf }
 0x423   : > { %817 = vmax.xlane.f32.xlu0 %v816_v55  ;;  %v1041_v56 = vpop.f32.mrb[12].mxu1 }
 0x424   : > { %v1048_v57 = vmul.f32 0.17677669, %v1041_v56  ;;  %v1321_v58 = vpop.f32.mrb[13].mxu1 }
 0x425   : > { %v1044_v59 = vpop.f32.mrb[14].mxu1 }
 0x426   : > { %v1049_v24 = vmul.f32 0.17677669, %v1044_v59  ;;  %v1322_v25 = vpop.f32.mrb[15].mxu1  ;;  %v1050_v60 = vsel %vm251_vm1, %v1048_v57, -inf }
 0x427   : > { %1051 = vmax.xlane.f32.xlu1 %v1050_v60 }
 0x428   : > { %v1053_v4 = vsel %vm251_vm1, %v1049_v24, -inf }
 0x429   : > { %1054 = vmax.xlane.f32.xlu0 %v1053_v4 }
 0x438   : > { %599 = vrot.lane.b32.xlu1 %v1834_v27, %s1519_s20 }
 0x4a4   : > { %v578_v61 = vpop.xlane.xlu0 %577 }
 0x4a5   : > { %v582_v62 = vsub.f32 %v574_v37, %v578_v61 }
 0x4a6   : > { %v581_v49 = vpop.xlane.xlu1 %580 }
 0x4a7   : > { %v584_v54 = vmul.f32 1.442695, %v582_v62  ;;  %v583_v1 = vsub.f32 %v575_v41, %v581_v49 }
 0x4a9   : > { %1444 = vpow2.f32 %v584_v54  ;;  %v586_v63 = vmul.f32 1.442695, %v583_v1 }
 0x4ab   : > { %1446 = vpow2.f32 %v586_v63 }
 0x4ac   : > { %v815_v0 = vpop.xlane.xlu0 %814 }
 0x4ad   : > { %v819_v2 = vsub.f32 %v811_v46, %v815_v0 }
 0x4af   : > { %v821_v3 = vmul.f32 1.442695, %v819_v2 }
 0x4b0   : > { %v818_v6 = vpop.xlane.xlu0 %817 }
 0x4b1   : > { %1448 = vpow2.f32 %v821_v3  ;;  %v820_v8 = vsub.f32 %v812_v51, %v818_v6 }
 0x4b3   : > { %v1445_v26 = vpop.eup %1444  ;;  %v823_v9 = vmul.f32 1.442695, %v820_v8 }
 0x4b4   : > { %v1052_v11 = vpop.xlane.xlu1 %1051  ;;  %v588_v13 = vsel %vm251_vm1, %v1445_v26, 0.0 }
 0x4b5   : > { %v1447_v14 = vpop.eup %1446  ;;  %1450 = vpow2.f32 %v823_v9  ;;  %v1056_v17 = vsub.f32 %v1048_v57, %v1052_v11  ;;  %589 = vadd.xlane.f32.xlu1 %v588_v13 }
 0x4b6   : > { %v1055_v32 = vpop.xlane.xlu0 %1054  ;;  %v591_v22 = vsel %vm251_vm1, %v1447_v14, 0.0 }
 0x4b7   : > { %v1058_v23 = vmul.f32 1.442695, %v1056_v17  ;;  %v1057_v30 = vsub.f32 %v1049_v24, %v1055_v32  ;;  %592 = vadd.xlane.f32.xlu0 %v591_v22 }
 0x4b8   : > { %v600_v19 = vpop.permute.xlu1 %599 }
 0x4b9   : > { %1452 = vpow2.f32 %v1058_v23  ;;  %v1060_v38 = vmul.f32 1.442695, %v1057_v30  ;;  %1300 = vmatpush3.bf16.msra.mxu0 %v600_v19 }
 0x4ba   : > { %1311 = vmatprep.subr.bf16.mxu0 %v1512_v10 }
 0x4bb   : > { %v1449_v31 = vpop.eup %1448  ;;  %1454 = vpow2.f32 %v1060_v38 }
 0x4bc   : > { %v825_v33 = vsel %vm251_vm1, %v1449_v31, 0.0 }
 0x4bd   : > { %826 = vadd.xlane.f32.xlu1 %v825_v33 }
 0x4bf   : > { %v1451_v15 = vpop.eup %1450 }
 0x4c0   : > { %v828_v20 = vsel %vm251_vm1, %v1451_v15, 0.0 }
 0x4c1   : > { %829 = vadd.xlane.f32.xlu0 %v828_v20 }
 0x4c3   : > { %v1453_v21 = vpop.eup %1452 }
 0x4c4   : > { %v1062_v5 = vsel %vm251_vm1, %v1453_v21, 0.0 }
 0x4c5   : > { %v1455_v34 = vpop.eup %1454  ;;  %1063 = vadd.xlane.f32.xlu1 %v1062_v5 }
 0x4c6   : > { %v1065_v7 = vsel %vm251_vm1, %v1455_v34, 0.0 }
 0x4c7   : > { %1066 = vadd.xlane.f32.xlu0 %v1065_v7 }
 0x4d6   : > { %1073 = vrot.lane.b32.xlu1 %v1834_v27, %s1516_s17 }
 0x4dd   : > { %836 = vrot.lane.b32.xlu0 %v1834_v27, %s1518_s19 }
 0x542   : > { %v590_v47 = vpop.xlane.xlu1 %589 }
 0x543   : > { %1456 = vrcp.f32 %v590_v47 }
 0x544   : > { %v593_v35 = vpop.xlane.xlu0 %592 }
 0x545   : > { %1458 = vrcp.f32 %v593_v35 }
 0x54a   : > { %v827_v36 = vpop.xlane.xlu1 %826 }
 0x54b   : > { %1460 = vrcp.f32 %v827_v36 }
 0x54d   : > { %v1457_v18 = vpop.eup %1456 }
 0x54e   : > { %v830_v16 = vpop.xlane.xlu0 %829  ;;  %v596_v37 = vmul.f32 %v1457_v18, %v1445_v26 }
 0x54f   : > { %v1459_v29 = vpop.eup %1458  ;;  %1462 = vrcp.f32 %v830_v16 }
 0x550   : > { %v597_v39 = vmul.f32 %v1459_v29, %v1447_v14 }
 0x552   : > { %v1064_v40 = vpop.xlane.xlu1 %1063  ;;  %v598_v41 = vpack.c.bf16 %v597_v39, %v596_v37 }
 0x553   : > { %1464 = vrcp.f32 %v1064_v40 }
 0x554   : > { %1302 = vmatmul.mubr.msk.bf16.vlgmr.msra.gmra.mrb[4].mxu0 %vm251_vm1, %v598_v41  ;;  %v1067_v42 = vpop.xlane.xlu0 %1066 }
 0x555   : > { %1466 = vrcp.f32 %v1067_v42  ;;  %1313 = vmatprep.mubr.msk.bf16.mxu0 %vm1514_vm0, %v1512_v10  ;;  %v1461_v27 = vpop.eup %1460 }
 0x556   : > { %v833_v45 = vmul.f32 %v1461_v27, %v1449_v31  ;;  %v1074_v50 = vpop.permute.xlu1 %1073 }
 0x558   : > { %v837_v43 = vpop.permute.xlu0 %836 }
 0x559   : > { %v1463_v44 = vpop.eup %1462  ;;  %1312 = vmatpush3.bf16.msra.mxu0 %v837_v43 }
 0x55a   : > { %v834_v46 = vmul.f32 %v1463_v44, %v1451_v15  ;;  %1323 = vmatprep.subr.bf16.mxu0 %v1512_v10 }
 0x55c   : > { %v835_v48 = vpack.c.bf16 %v834_v46, %v833_v45 }
 0x55d   : > { %v1465_v51 = vpop.eup %1464 }
 0x55e   : > { %1314 = vmatmul.mubr.msk.bf16.vlgmr.msra.gmra.mrb[8].mxu0 %vm251_vm1, %v835_v48  ;;  %v1070_v55 = vmul.f32 %v1465_v51, %v1453_v21 }
 0x55f   : > { %v1467_v52 = vpop.eup %1466  ;;  %1324 = vmatpush3.bf16.msra.mxu0 %v1074_v50  ;;  %1325 = vmatprep.mubr.msk.bf16.mxu0 %vm1514_vm0, %v1512_v10 }
 0x560   : > { %v1071_v53 = vmul.f32 %v1467_v52, %v1455_v34 }
 0x562   : > { %v1072_v56 = vpack.c.bf16 %v1071_v53, %v1070_v55 }
 0x566   : > { %1326 = vmatmul.mubr.msk.bf16.vlgmr.msra.gmra.mrb[12].mxu0 %vm251_vm1, %v1072_v56 }
 0x627   : > { %v639_v57 = vpop.f32.mrb[4].mxu0 }
 0x628   : > { %v1303_v58 = vpop.f32.mrb[5].mxu0 }
 0x629   : > { %v642_v59 = vpop.f32.mrb[6].mxu0 }
 0x62a   : > { %v1420_v24 = vpack.i.bf16 %v642_v59, %v639_v57  ;;  %v1304_v25 = vpop.f32.mrb[7].mxu0 }
 0x62c   : > { %1421 = vrot.lane.b32.xlu1 %v1420_v24, %s1516_s17 }
 0x631   : > { %v876_v60 = vpop.f32.mrb[8].mxu0 }
 0x632   : > { %v1315_v4 = vpop.f32.mrb[9].mxu0 }
 0x633   : > { %v879_v61 = vpop.f32.mrb[10].mxu0 }
 0x634   : > { %v1425_v62 = vpack.i.bf16 %v879_v61, %v876_v60  ;;  %v1316_v49 = vpop.f32.mrb[11].mxu0 }
 0x636   : > { %1426 = vrot.lane.b32.xlu0 %v1425_v62, %s1518_s19 }
 0x639   : > { %v1113_v10 = vpop.f32.mrb[12].mxu0 }
 0x63a   : > { %v1327_v54 = vpop.f32.mrb[13].mxu0 }
 0x63b   : > { %v1116_v1 = vpop.f32.mrb[14].mxu0 }
 0x63c   : > { %v1430_v63 = vpack.i.bf16 %v1116_v1, %v1113_v10  ;;  %v1328_v0 = vpop.f32.mrb[15].mxu0 }
 0x63e   : > { %1431 = vrot.lane.b32.xlu1 %v1430_v63, %s1519_s20 }
 0x69e   : > { %v1422_v2 = vpop.permute.xlu1 %1421 }
 0x69f   : > { %v1424_v6 = vunpack.i.h.bf16 %v1422_v2  ;;  %v1423_v8 = vunpack.i.l.bf16 %v1422_v2 }
 0x6a1   : > { %v1145_v13 = vsel %vm286_vm2, %v1885_v28, %v1424_v6  ;;  %v1144_v14 = vsel %vm286_vm2, %v1883_v12, %v1423_v8 }
 0x6a8   : > { %v1427_v3 = vpop.permute.xlu0 %1426 }
 0x6a9   : > { %v1429_v26 = vunpack.i.h.bf16 %v1427_v3  ;;  %v1428_v9 = vunpack.i.l.bf16 %v1427_v3 }
 0x6ab   : > { %v1148_v22 = vsel %vm1146_vm3, %v1145_v13, %v1429_v26  ;;  %v1147_v23 = vsel %vm1146_vm3, %v1144_v14, %v1428_v9 }
 0x6b0   : > { %v1432_v11 = vpop.permute.xlu1 %1431 }
 0x6b1   : > { %v1434_v17 = vunpack.i.h.bf16 %v1432_v11  ;;  %v1433_v32 = vunpack.i.l.bf16 %v1432_v11 }
 0x6b3   : > { %v1151_v30 = vsel %vm1149_vm4, %v1148_v22, %v1434_v17  ;;  %v1150_v19 = vsel %vm1149_vm4, %v1147_v23, %v1433_v32 }
 0x6b4   : > { %v1263_v38 = vpack.c.bf16 %v1151_v30, %v1150_v19 }
 0x6b6   : > { %1264 = vst [vmem:[%s190_s24] sm:$0xff] %v1263_v38  }
 0x6b7 PF: > { %s14_s12 = sadd.s32 1, %s1506_s12  }
 0x6b8   : > { %p11_p3 = scmp.ge.s32.totalorder %s14_s12, 4  }
 0x6ba   :  { %13 = sbr.rel (!%p11_p3) target bundleno = 1 (0x1), region = 67 }
 0x6c1   :  { %1184 = vsyncpa [#allocation3], 1 }
 0x6c2   :  { %1186 = vsyncpa [#allocation3 + $0x1], 1 }

</bundles_post_ra>
